<compile_context>
chip_gen: v5e
topology: v5e:2x2
jax: 0.10.0
libtpu: 0.0.40
codegen_flags: <defaults>
</compile_context>

<pallas_src>
import functools

import jax
import jax.numpy as jnp
import numpy as np
from jax.experimental import pallas as pl
from jax.experimental.pallas import tpu as pltpu

LANE = 128      # last-dim tile (lanes)
SUBLANE = 8     # second-to-last-dim tile (sublanes)


def _round_up(x, m):
    return (x + m - 1) // m * m


def _pick_tile(total, unit, cap):
    """Largest divisor of `total` that is a multiple of `unit` and <= cap."""
    t = min(total, cap)
    t = (t // unit) * unit
    while total % t != 0:
        t -= unit
    return t


def _vmem_limit_bytes():
    """~3/4 of physical VMEM: ~96 MiB on v5e/v6e (128 MiB), ~48 MiB on v7x (64 MiB)."""
    cap = None
    try:
        info = pltpu.get_tpu_info()
        cap = getattr(info, "vmem_capacity_bytes", None)
    except Exception:
        cap = None
    if not cap:
        cap = 64 * 1024 * 1024   # conservative fallback (v7x per-core VMEM)
    return int(min(cap * 3 // 4, 100 * 1024 * 1024))


# ----------------------------------------------------------------------------
# Tiled matmul + bias kernel (postnet).
# ----------------------------------------------------------------------------
def _matmul_bias_kernel(x_ref, w_ref, b_ref, o_ref):
    o_ref[...] = (jnp.dot(x_ref[...], w_ref[...],
                          preferred_element_type=jnp.float32)
                  + b_ref[...]).astype(o_ref.dtype)


def matmul_bias(x, w, b, *, tm_cap=256, tn_cap=512, vmem_limit=None):
    """x: (M, K) @ w: (K, N) + b: (1, N) -> (M, N).  M % 8 == 0, N % 128 == 0."""
    M, K = x.shape
    N = w.shape[1]
    assert M % SUBLANE == 0 and N % LANE == 0 and K % LANE == 0
    tm = _pick_tile(M, SUBLANE, tm_cap)
    tn = _pick_tile(N, LANE, tn_cap)
    if vmem_limit is None:
        vmem_limit = _vmem_limit_bytes()
    return pl.pallas_call(
        _matmul_bias_kernel,
        out_shape=jax.ShapeDtypeStruct((M, N), x.dtype),
        grid_spec=pltpu.PrefetchScalarGridSpec(
            num_scalar_prefetch=0,
            grid=(M // tm, N // tn),
            in_specs=[
                pl.BlockSpec((tm, K), lambda i, j: (i, 0)),
                pl.BlockSpec((K, tn), lambda i, j: (0, j)),
                pl.BlockSpec((1, tn), lambda i, j: (0, j)),
            ],
            out_specs=pl.BlockSpec((tm, tn), lambda i, j: (i, j)),
        ),
        compiler_params=pltpu.CompilerParams(
            dimension_semantics=("parallel", "parallel"),
            vmem_limit_bytes=vmem_limit),
    )(x, w, b)


# ----------------------------------------------------------------------------
# Fused multi-layer GRU stack kernel (time-chunked grid, in-kernel layer-0
# projection, fused chunk-size selection).
# ----------------------------------------------------------------------------
def _gru_stack_kernel(*refs, n_layers, T, chunk_size, Bp, Hp,
                      residual0, residual_rest):
    """One grid step processes a chunk of T timesteps through ALL layers.

    refs layout:
      [x, w_ih0, b_comb0, w_hh*n_layers, b_hn*n_layers,
       w_ih*(n_layers-1), b_comb*(n_layers-1), out, h_sc, cur_sc, gi_sc]
    """
    idx = 0
    x_ref = refs[idx]; idx += 1
    w_ih0_ref = refs[idx]; idx += 1
    b_cb0_ref = refs[idx]; idx += 1
    w_hh_refs = refs[idx:idx + n_layers]; idx += n_layers
    b_hn_refs = refs[idx:idx + n_layers]; idx += n_layers
    w_ih_refs = refs[idx:idx + n_layers - 1]; idx += n_layers - 1
    b_cb_refs = refs[idx:idx + n_layers - 1]; idx += n_layers - 1
    out_ref = refs[idx]; idx += 1
    h_sc, cur_sc, gi_sc = refs[idx], refs[idx + 1], refs[idx + 2]

    n_windows = T // chunk_size

    @pl.when(pl.program_id(0) == 0)
    def _():
        h_sc[...] = jnp.zeros_like(h_sc)

    for l in range(n_layers):
        is_last = (l == n_layers - 1)
        w_hh_ref = w_hh_refs[l]            # (Hp, 3Hp) fused [r|z|n] gate slab
        b_hn = b_hn_refs[l][...]           # (1, 3Hp) = [0 | 0 | b_hh_n]

        # Chunk-batched input projection, hoisted off the sequential critical
        # path: one (T*Bp, Din) @ (Din, 3Hp) MXU matmul per chunk & layer.
        if l == 0:
            gi_sc[...] = (jnp.dot(x_ref[...], w_ih0_ref[...],
                                  preferred_element_type=jnp.float32)
                          + b_cb0_ref[...])
        else:
            gi_sc[...] = (jnp.dot(cur_sc[...], w_ih_refs[l - 1][...],
                                  preferred_element_type=jnp.float32)
                          + b_cb_refs[l - 1][...])

        def window_body(w, h, l=l, is_last=is_last,
                        w_hh_ref=w_hh_ref, b_hn=b_hn):
            base = w * (chunk_size * Bp)
            for s in range(chunk_size):            # bounded static unroll
                row = pl.multiple_of(base + s * Bp, Bp)
                gi_s = gi_sc[pl.ds(row, Bp), :]    # (Bp, 3Hp), 128-aligned cols
                # ONE fused recurrent gate matmul instead of three.
                gh = jnp.dot(h, w_hh_ref[...],
                             preferred_element_type=jnp.float32) + b_hn
                rz = jax.nn.sigmoid(gi_s[:, :2 * Hp] + gh[:, :2 * Hp])
                r = rz[:, :Hp]
                z = rz[:, Hp:]
                n = jnp.tanh(gi_s[:, 2 * Hp:] + r * gh[:, 2 * Hp:])
                h = (1.0 - z) * n + z * h

                if l == 0:
                    y = (h + x_ref[pl.ds(row, Bp), :]) if residual0 else h
                else:
                    y = (h + cur_sc[pl.ds(row, Bp), :]) if residual_rest else h

                if is_last:
                    if s == chunk_size - 1:
                        # Fused chunk-size selection: only the last step of
                        # each window is written back to HBM.
                        out_row = pl.multiple_of(w * Bp, Bp)
                        out_ref[pl.ds(out_row, Bp), :] = y.astype(out_ref.dtype)
                else:
                    cur_sc[pl.ds(row, Bp), :] = y  # input to the next layer
            return h

        # fori_loop over windows: bounded live ranges, LLO-visible loop,
        # hidden state carried in vregs.
        h_sc[l] = jax.lax.fori_loop(0, n_windows, window_body, h_sc[l])


def gru_stack(x_flat, padded_layers, *, L, Bp, Hp, D0p, T, chunk_size,
              residual0, residual_rest, dtype, vmem_limit):
    n_layers = len(padded_layers)
    G = 3 * Hp
    n_chunks = L // T
    sel_per_chunk = T // chunk_size
    n_sel = L // chunk_size

    inputs = [x_flat, padded_layers[0]["w_ih"], padded_layers[0]["b_comb"]]
    in_specs = [
        pl.BlockSpec((T * Bp, D0p), lambda t: (t, 0)),
        # Loop-invariant weights: constant index maps -> DMA'd once, reused.
        pl.BlockSpec((D0p, G), lambda t: (0, 0)),
        pl.BlockSpec((1, G), lambda t: (0, 0)),
    ]
    for p in padded_layers:
        inputs.append(p["w_hh"])
        in_specs.append(pl.BlockSpec((Hp, G), lambda t: (0, 0)))
    for p in padded_layers:
        inputs.append(p["b_hn"])
        in_specs.append(pl.BlockSpec((1, G), lambda t: (0, 0)))
    for p in padded_layers[1:]:
        inputs.append(p["w_ih"])
        in_specs.append(pl.BlockSpec((Hp, G), lambda t: (0, 0)))
    for p in padded_layers[1:]:
        inputs.append(p["b_comb"])
        in_specs.append(pl.BlockSpec((1, G), lambda t: (0, 0)))

    kernel = functools.partial(
        _gru_stack_kernel, n_layers=n_layers, T=T, chunk_size=chunk_size,
        Bp=Bp, Hp=Hp, residual0=residual0, residual_rest=residual_rest)

    return pl.pallas_call(
        kernel,
        out_shape=jax.ShapeDtypeStruct((n_sel * Bp, Hp), dtype),
        grid_spec=pltpu.PrefetchScalarGridSpec(
            num_scalar_prefetch=0,
            grid=(n_chunks,),
            in_specs=in_specs,
            out_specs=pl.BlockSpec((sel_per_chunk * Bp, Hp), lambda t: (t, 0)),
            scratch_shapes=[
                pltpu.VMEM((n_layers, Bp, Hp), jnp.float32),  # hidden states
                pltpu.VMEM((T * Bp, Hp), jnp.float32),        # chunk activations
                pltpu.VMEM((T * Bp, G), jnp.float32),         # chunk gate inputs
            ],
        ),
        # Time chunks carry hidden state -> strictly sequential grid.
        compiler_params=pltpu.CompilerParams(
            dimension_semantics=("arbitrary",),
            vmem_limit_bytes=vmem_limit),
    )(*inputs)


# ----------------------------------------------------------------------------
# VMEM-budgeted time-chunk selection.
# ----------------------------------------------------------------------------
def _gru_chunk_vmem_bytes(T, chunk_size, Bp, Hp, D0p):
    """T-dependent VMEM (double-buffered streams + chunk scratch), f32."""
    G = 3 * Hp
    b = 2 * T * Bp * D0p * 4                     # x chunk block (double-buffered)
    b += 2 * (T // chunk_size) * Bp * Hp * 4     # out chunk block (double-buffered)
    b += T * Bp * Hp * 4                         # cur_sc
    b += T * Bp * G * 4                          # gi_sc
    return b


def _gru_fixed_vmem_bytes(n_layers, Bp, Hp, D0p):
    """Weights (double-buffered BlockSpecs) + hidden-state scratch, f32."""
    G = 3 * Hp
    b = 2 * (D0p * G + G) * 4                    # layer-0 w_ih + b_comb
    b += 2 * n_layers * (Hp * G + G) * 4         # w_hh + b_hn
    b += 2 * (n_layers - 1) * (Hp * G + G) * 4   # w_ih + b_comb, layers > 0
    b += n_layers * Bp * Hp * 4                  # h_sc
    return b


def _auto_time_chunk(L, chunk_size, Bp, Hp, D0p, n_layers, vmem_limit):
    """Largest multiple of chunk_size dividing L that fits the VMEM budget."""
    budget = int(vmem_limit * 0.8) - _gru_fixed_vmem_bytes(n_layers, Bp, Hp, D0p)
    n_win = L // chunk_size
    best = chunk_size
    for k in range(1, n_win + 1):
        if n_win % k != 0:
            continue
        T = k * chunk_size
        if _gru_chunk_vmem_bytes(T, chunk_size, Bp, Hp, D0p) <= budget:
            best = T
    return best


# ----------------------------------------------------------------------------
# Parameter preparation (padding to lane/sublane-dense kernel layout).
# ----------------------------------------------------------------------------
def _pad_gate_cols(a, H, Hp):
    """(R, 3H) with gate blocks [r|z|n] -> (R, 3Hp), each gate at offset g*Hp."""
    R = a.shape[0]
    a3 = a.reshape(R, 3, H)
    out = jnp.zeros((R, 3, Hp), a.dtype).at[:, :, :H].set(a3)
    return out.reshape(R, 3 * Hp)


def _prepare_layer(p, din, H, Hp, din_pad):
    dt = p["w_ih"].dtype
    w_ih = jnp.zeros((din_pad, 3 * Hp), dt
                     ).at[:din, :].set(_pad_gate_cols(p["w_ih"], H, Hp))
    # Recurrent weights as ONE lane-aligned (Hp, 3Hp) slab -> single wide dot.
    w_hh = jnp.zeros((Hp, 3 * Hp), p["w_hh"].dtype
                     ).at[:H, :].set(_pad_gate_cols(p["w_hh"], H, Hp))
    # b_ih plus the r/z parts of b_hh pre-combined; the n-part of b_hh must
    # stay separate because of the r * (h @ W_hn + b_hn) term.
    b_rz = jnp.concatenate(
        [p["b_hh"][:, :2 * H], jnp.zeros((1, H), p["b_hh"].dtype)], axis=1)
    b_comb = _pad_gate_cols(p["b_ih"] + b_rz, H, Hp)                # (1, 3Hp)
    # hh-bias for the n gate, padded into the n block of a (1, 3Hp) vector.
    b_hn = jnp.zeros((1, 3 * Hp), p["b_hh"].dtype
                     ).at[:, 2 * Hp:2 * Hp + H].set(p["b_hh"][:, 2 * H:])
    return {"w_ih": w_ih, "w_hh": w_hh, "b_comb": b_comb, "b_hn": b_hn}


def init_simunet_params(key, mel_dim, out_len, hdim, rnn_num_layers):
    """Logical (unpadded) params: w_ih (Din,3H), w_hh (H,3H), gate order [r,z,n]."""
    params = {"rnns": []}
    in_sizes = [mel_dim] + [hdim] * (rnn_num_layers - 1)
    for din in in_sizes:
        key, k1, k2, k3, k4 = jax.random.split(key, 5)
        s = 1.0 / np.sqrt(hdim)
        params["rnns"].append({
            "w_ih": jax.random.uniform(k1, (din, 3 * hdim), jnp.float32, -s, s),
            "w_hh": jax.random.uniform(k2, (hdim, 3 * hdim), jnp.float32, -s, s),
            "b_ih": jax.random.uniform(k3, (1, 3 * hdim), jnp.float32, -s, s),
            "b_hh": jax.random.uniform(k4, (1, 3 * hdim), jnp.float32, -s, s),
        })
    key, k1, k2 = jax.random.split(key, 3)
    s = 1.0 / np.sqrt(hdim)
    params["post_w"] = jax.random.uniform(k1, (hdim, out_len * mel_dim),
                                          jnp.float32, -s, s)
    params["post_b"] = jax.random.uniform(k2, (1, out_len * mel_dim),
                                          jnp.float32, -s, s)
    return params


# ----------------------------------------------------------------------------
# SimuNet forward.
# ----------------------------------------------------------------------------
def simu_net_forward(params, inputs, chunk_size, *, out_len, mel_dim,
                     rnn_residual=True, time_chunk=None):
    B, L, D0 = inputs.shape
    assert L % chunk_size == 0, "seq_len must be divisible by chunk_size"
    H = params["rnns"][0]["w_hh"].shape[0]
    dtype = inputs.dtype
    n_layers = len(params["rnns"])

    Bp = _round_up(B, SUBLANE)
    Hp = _round_up(H, LANE)
    D0p = _round_up(D0, LANE)

    vmem_limit = _vmem_limit_bytes()

    # Time-chunk size: a multiple of chunk_size that divides L, grown up to the
    # per-generation VMEM budget (amortizes per-grid-step overhead and makes
    # the per-chunk projection matmuls larger).
    if time_chunk is None:
        time_chunk = _auto_time_chunk(L, chunk_size, Bp, Hp, D0p,
                                      n_layers, vmem_limit)
    assert time_chunk % chunk_size == 0 and L % time_chunk == 0

    residual0 = rnn_residual and (D0 == H)
    residual_rest = rnn_residual

    padded_layers = []
    for i, p in enumerate(params["rnns"]):
        din = D0 if i == 0 else H
        dinp = D0p if i == 0 else Hp
        padded_layers.append(_prepare_layer(p, din, H, Hp, dinp))

    # Inputs in (time, batch) layout, lane/sublane-dense, flattened to rows.
    # The layer-0 projection happens inside the fused kernel (no gi0 HBM trip).
    x_lbd = jnp.transpose(inputs, (1, 0, 2))                    # (L, B, D0)
    x_pad = jnp.zeros((L, Bp, D0p), dtype).at[:, :B, :D0].set(x_lbd)
    x_flat = x_pad.reshape(L * Bp, D0p)

    # ---- fused GRU stack (+ fused chunk-size selection of the outputs).
    sel_flat = gru_stack(x_flat, padded_layers, L=L, Bp=Bp, Hp=Hp, D0p=D0p,
                         T=time_chunk, chunk_size=chunk_size,
                         residual0=residual0, residual_rest=residual_rest,
                         dtype=dtype, vmem_limit=vmem_limit)   # (n_sel*Bp, Hp)

    n_sel = L // chunk_size
    sel = sel_flat.reshape(n_sel, Bp, Hp)[:, :B, :]             # (n_sel, B, Hp)
    sel = jnp.transpose(sel, (1, 0, 2)).reshape(B * n_sel, Hp)  # (b, w) order

    # ---- postnet: tiled, lane-dense matmul + bias.
    F = out_len * mel_dim
    Fp = _round_up(F, LANE)
    Np = _round_up(B * n_sel, SUBLANE)
    rows = jnp.zeros((Np, Hp), dtype).at[:B * n_sel, :].set(sel)
    w_post = jnp.zeros((Hp, Fp), params["post_w"].dtype
                       ).at[:H, :F].set(params["post_w"])
    b_post = jnp.zeros((1, Fp), params["post_b"].dtype
                       ).at[:, :F].set(params["post_b"])
    pred = matmul_bias(rows, w_post, b_post, vmem_limit=vmem_limit)[:B * n_sel, :F]
    return pred.reshape(-1, out_len, mel_dim)


# ----------------------------------------------------------------------------
# Pure-JAX reference (lax.scan GRU) for correctness check.
# ----------------------------------------------------------------------------
def _gru_ref(x, p, residual):
    B, L, _ = x.shape
    H = p["w_hh"].shape[0]

    def step(h, x_t):
        gi = x_t @ p["w_ih"] + p["b_ih"]
        gh = h @ p["w_hh"] + p["b_hh"]
        r = jax.nn.sigmoid(gi[:, :H] + gh[:, :H])
        z = jax.nn.sigmoid(gi[:, H:2 * H] + gh[:, H:2 * H])
        n = jnp.tanh(gi[:, 2 * H:] + r * gh[:, 2 * H:])
        h_new = (1.0 - z) * n + z * h
        return h_new, h_new

    _, ys = jax.lax.scan(step, jnp.zeros((B, H), jnp.float32),
                         jnp.transpose(x, (1, 0, 2)))
    y = jnp.transpose(ys, (1, 0, 2))
    return y + x if residual else y


def simu_net_ref(params, inputs, chunk_size, *, out_len, mel_dim,
                 rnn_residual=True):
    x = inputs
    for p in params["rnns"]:
        residual = rnn_residual and (x.shape[-1] == p["w_hh"].shape[0])
        x = _gru_ref(x, p, residual)
    B, L, H = x.shape
    chunked = x.reshape(B * L // chunk_size, chunk_size, H)[:, -1, :]
    pred = chunked @ params["post_w"] + params["post_b"]
    return pred.reshape(-1, out_len, mel_dim)


if __name__ == "__main__":
    B, L = 2, 16
    mel_dim, hdim = 16, 32
    out_len, rnn_num_layers = 2, 2
    chunk_size = 4

    key = jax.random.PRNGKey(0)
    key, pkey, xkey = jax.random.split(key, 3)
    params = init_simunet_params(pkey, mel_dim, out_len, hdim, rnn_num_layers)
    inputs = jax.random.normal(xkey, (B, L, mel_dim), jnp.float32)

    ref = simu_net_ref(params, inputs, chunk_size,
                       out_len=out_len, mel_dim=mel_dim)

    # time_chunk=8 -> 2 sequential grid steps: exercises the hidden-state carry
    # across grid steps and multi-window selection within a chunk.
    out = simu_net_forward(params, inputs, chunk_size,
                           out_len=out_len, mel_dim=mel_dim, time_chunk=8)
    out = jax.block_until_ready(out)
    assert out.shape == (B * L // chunk_size, out_len, mel_dim), out.shape
    np.testing.assert_allclose(np.asarray(out), np.asarray(ref),
                               rtol=1e-4, atol=1e-4)

    # Auto (VMEM-budgeted) time chunk: whole sequence in one grid step here.
    out2 = simu_net_forward(params, inputs, chunk_size,
                            out_len=out_len, mel_dim=mel_dim)
    out2 = jax.block_until_ready(out2)
    np.testing.assert_allclose(np.asarray(out2), np.asarray(ref),
                               rtol=1e-4, atol=1e-4)

    print("KERNEL_OK")
</pallas_src>

<mosaic_0001>
module attributes {stable_mosaic.version = 11 : i64} {
  func.func @_gru_stack_kernel(%arg0: i32, %arg1: memref<64x128xf32, #tpu.memory_space<vmem>>, %arg2: memref<128x384xf32, #tpu.memory_space<vmem>>, %arg3: memref<1x384xf32, #tpu.memory_space<vmem>>, %arg4: memref<128x384xf32, #tpu.memory_space<vmem>>, %arg5: memref<128x384xf32, #tpu.memory_space<vmem>>, %arg6: memref<1x384xf32, #tpu.memory_space<vmem>>, %arg7: memref<1x384xf32, #tpu.memory_space<vmem>>, %arg8: memref<128x384xf32, #tpu.memory_space<vmem>>, %arg9: memref<1x384xf32, #tpu.memory_space<vmem>>, %arg10: memref<16x128xf32, #tpu.memory_space<vmem>>, %arg11: memref<2x8x128xf32, #tpu.memory_space<vmem>>, %arg12: memref<64x128xf32, #tpu.memory_space<vmem>>, %arg13: memref<64x384xf32, #tpu.memory_space<vmem>>) attributes {dimension_semantics = [#tpu.dimension_semantics<arbitrary>], iteration_bounds = array<i64: 2>, scalar_prefetch = 0 : i64, scratch_operands = 3 : i64, tpu.core_type = #tpu.core_type<tc>, window_params = [{transform_indices = @transform_0, window_bounds = array<i64: 64, 128>}, {pipeline_mode = #tpu.pipeline_mode<synchronous>, transform_indices = @transform_1, window_bounds = array<i64: 128, 384>}, {pipeline_mode = #tpu.pipeline_mode<synchronous>, transform_indices = @transform_2, window_bounds = array<i64: 1, 384>}, {pipeline_mode = #tpu.pipeline_mode<synchronous>, transform_indices = @transform_3, window_bounds = array<i64: 128, 384>}, {pipeline_mode = #tpu.pipeline_mode<synchronous>, transform_indices = @transform_4, window_bounds = array<i64: 128, 384>}, {pipeline_mode = #tpu.pipeline_mode<synchronous>, transform_indices = @transform_5, window_bounds = array<i64: 1, 384>}, {pipeline_mode = #tpu.pipeline_mode<synchronous>, transform_indices = @transform_6, window_bounds = array<i64: 1, 384>}, {pipeline_mode = #tpu.pipeline_mode<synchronous>, transform_indices = @transform_7, window_bounds = array<i64: 128, 384>}, {pipeline_mode = #tpu.pipeline_mode<synchronous>, transform_indices = @transform_8, window_bounds = array<i64: 1, 384>}, {transform_indices = @transform_9, window_bounds = array<i64: 16, 128>}]} {
    %c0_i32 = arith.constant 0 : i32
    %0 = arith.cmpi eq, %arg0, %c0_i32 : i32
    %1 = arith.extui %0 : i1 to i32
    %c0_i32_0 = arith.constant 0 : i32
    %2 = arith.cmpi ne, %1, %c0_i32_0 : i32
    scf.if %2 {
      %cst_38 = arith.constant 0.000000e+00 : f32
      %33 = vector.broadcast %cst_38 : f32 to vector<2x8x128xf32>
      %c0_39 = arith.constant 0 : index
      %c0_40 = arith.constant 0 : index
      %c0_41 = arith.constant 0 : index
      %34 = vector.load %arg11[%c0_39, %c0_40, %c0_41] : memref<2x8x128xf32, #tpu.memory_space<vmem>>, vector<2x8x128xf32>
      tpu.vector_store %arg11[%c0_39, %c0_40, %c0_41], %33 {strides = array<i32>} : memref<2x8x128xf32, #tpu.memory_space<vmem>>, vector<2x8x128xf32>,
    } else {
    }
    %c0 = arith.constant 0 : index
    %c0_1 = arith.constant 0 : index
    %3 = vector.load %arg6[%c0, %c0_1] : memref<1x384xf32, #tpu.memory_space<vmem>>, vector<1x384xf32>
    %c0_2 = arith.constant 0 : index
    %c0_3 = arith.constant 0 : index
    %4 = vector.load %arg1[%c0_2, %c0_3] : memref<64x128xf32, #tpu.memory_space<vmem>>, vector<64x128xf32>
    %c0_4 = arith.constant 0 : index
    %c0_5 = arith.constant 0 : index
    %5 = vector.load %arg2[%c0_4, %c0_5] : memref<128x384xf32, #tpu.memory_space<vmem>>, vector<128x384xf32>
    %cst = arith.constant dense<0.000000e+00> : vector<64x384xf32>
    %6 = tpu.matmul %4, %5, %cst {dimension_numbers = #tpu.dot_dimension_numbers<[1], [0], [0], [1], [0, 0, 1, 1], [], []>} : vector<64x128xf32>, vector<128x384xf32>, vector<64x384xf32> -> vector<64x384xf32>
    %c0_6 = arith.constant 0 : index
    %c0_7 = arith.constant 0 : index
    %7 = vector.load %arg3[%c0_6, %c0_7] : memref<1x384xf32, #tpu.memory_space<vmem>>, vector<1x384xf32>
    %8 = vector.broadcast %7 : vector<1x384xf32> to vector<64x384xf32>
    %9 = arith.addf %6, %8 : vector<64x384xf32>
    %c0_8 = arith.constant 0 : index
    %c0_9 = arith.constant 0 : index
    %10 = vector.load %arg13[%c0_8, %c0_9] : memref<64x384xf32, #tpu.memory_space<vmem>>, vector<64x384xf32>
    tpu.vector_store %arg13[%c0_8, %c0_9], %9 {strides = array<i32>} : memref<64x384xf32, #tpu.memory_space<vmem>>, vector<64x384xf32>,
    %c0_10 = arith.constant 0 : index
    %c0_11 = arith.constant 0 : index
    %c0_12 = arith.constant 0 : index
    %11 = vector.load %arg11[%c0_10, %c0_11, %c0_12] : memref<2x8x128xf32, #tpu.memory_space<vmem>>, vector<1x8x128xf32>
    %12 = vector.shape_cast %11 : vector<1x8x128xf32> to vector<8x128xf32>
    %c0_i32_13 = arith.constant 0 : i32
    %c2_i32 = arith.constant 2 : i32
    %13 = arith.addi %c0_i32_13, %c2_i32 : i32
    %c1_i32 = arith.constant 1 : i32
    %14 = scf.for %arg14 = %c0_i32_13 to %13 step %c1_i32 iter_args(%arg15 = %12) -> (vector<8x128xf32>)  : i32 {
      %c32_i32 = arith.constant 32 : i32
      %33 = arith.muli %arg14, %c32_i32 : i32
      %c0_i32_38 = arith.constant 0 : i32
      %34 = arith.addi %33, %c0_i32_38 : i32
      %35 = tpu.assume_multiple %34, 8 : i32
      %36 = arith.index_cast %35 : i32 to index
      %c0_39 = arith.constant 0 : index
      %37 = vector.load %arg13[%36, %c0_39] : memref<64x384xf32, #tpu.memory_space<vmem>>, vector<8x384xf32>
      %c0_40 = arith.constant 0 : index
      %c0_41 = arith.constant 0 : index
      %38 = vector.load %arg4[%c0_40, %c0_41] : memref<128x384xf32, #tpu.memory_space<vmem>>, vector<128x384xf32>
      %cst_42 = arith.constant dense<0.000000e+00> : vector<8x384xf32>
      %39 = tpu.matmul %arg15, %38, %cst_42 {dimension_numbers = #tpu.dot_dimension_numbers<[1], [0], [0], [1], [0, 0, 1, 1], [], []>} : vector<8x128xf32>, vector<128x384xf32>, vector<8x384xf32> -> vector<8x384xf32>
      %40 = vector.broadcast %3 : vector<1x384xf32> to vector<8x384xf32>
      %41 = arith.addf %39, %40 : vector<8x384xf32>
      %42 = vector.extract_strided_slice %37 {offsets = [0, 0], sizes = [8, 256], strides = [1, 1]} : vector<8x384xf32> to vector<8x256xf32>
      %43 = vector.extract_strided_slice %41 {offsets = [0, 0], sizes = [8, 256], strides = [1, 1]} : vector<8x384xf32> to vector<8x256xf32>
      %44 = arith.addf %42, %43 : vector<8x256xf32>
      %45 = arith.negf %44 : vector<8x256xf32>
      %46 = math.exp %45 : vector<8x256xf32>
      %cst_43 = arith.constant 1.000000e+00 : f32
      %47 = vector.broadcast %cst_43 : f32 to vector<8x256xf32>
      %48 = arith.addf %47, %46 : vector<8x256xf32>
      %49 = arith.divf %47, %48 : vector<8x256xf32>
      %50 = vector.extract_strided_slice %49 {offsets = [0, 0], sizes = [8, 128], strides = [1, 1]} : vector<8x256xf32> to vector<8x128xf32>
      %51 = vector.extract_strided_slice %49 {offsets = [0, 128], sizes = [8, 128], strides = [1, 1]} : vector<8x256xf32> to vector<8x128xf32>
      %52 = vector.extract_strided_slice %37 {offsets = [0, 256], sizes = [8, 128], strides = [1, 1]} : vector<8x384xf32> to vector<8x128xf32>
      %53 = vector.extract_strided_slice %41 {offsets = [0, 256], sizes = [8, 128], strides = [1, 1]} : vector<8x384xf32> to vector<8x128xf32>
      %54 = arith.mulf %50, %53 : vector<8x128xf32>
      %55 = arith.addf %52, %54 : vector<8x128xf32>
      %56 = math.tanh %55 : vector<8x128xf32>
      %cst_44 = arith.constant 1.000000e+00 : f32
      %57 = vector.broadcast %cst_44 : f32 to vector<8x128xf32>
      %58 = arith.subf %57, %51 : vector<8x128xf32>
      %59 = arith.mulf %58, %56 : vector<8x128xf32>
      %60 = arith.mulf %51, %arg15 : vector<8x128xf32>
      %61 = arith.addf %59, %60 : vector<8x128xf32>
      %62 = arith.index_cast %35 : i32 to index
      %c0_45 = arith.constant 0 : index
      %63 = vector.load %arg12[%62, %c0_45] : memref<64x128xf32, #tpu.memory_space<vmem>>, vector<8x128xf32>
      tpu.vector_store %arg12[%62, %c0_45], %61 {strides = array<i32>} : memref<64x128xf32, #tpu.memory_space<vmem>>, vector<8x128xf32>,
      %c8_i32 = arith.constant 8 : i32
      %64 = arith.addi %33, %c8_i32 : i32
      %65 = tpu.assume_multiple %64, 8 : i32
      %66 = arith.index_cast %65 : i32 to index
      %c0_46 = arith.constant 0 : index
      %67 = vector.load %arg13[%66, %c0_46] : memref<64x384xf32, #tpu.memory_space<vmem>>, vector<8x384xf32>
      %c0_47 = arith.constant 0 : index
      %c0_48 = arith.constant 0 : index
      %68 = vector.load %arg4[%c0_47, %c0_48] : memref<128x384xf32, #tpu.memory_space<vmem>>, vector<128x384xf32>
      %cst_49 = arith.constant dense<0.000000e+00> : vector<8x384xf32>
      %69 = tpu.matmul %61, %68, %cst_49 {dimension_numbers = #tpu.dot_dimension_numbers<[1], [0], [0], [1], [0, 0, 1, 1], [], []>} : vector<8x128xf32>, vector<128x384xf32>, vector<8x384xf32> -> vector<8x384xf32>
      %70 = vector.broadcast %3 : vector<1x384xf32> to vector<8x384xf32>
      %71 = arith.addf %69, %70 : vector<8x384xf32>
      %72 = vector.extract_strided_slice %67 {offsets = [0, 0], sizes = [8, 256], strides = [1, 1]} : vector<8x384xf32> to vector<8x256xf32>
      %73 = vector.extract_strided_slice %71 {offsets = [0, 0], sizes = [8, 256], strides = [1, 1]} : vector<8x384xf32> to vector<8x256xf32>
      %74 = arith.addf %72, %73 : vector<8x256xf32>
      %75 = arith.negf %74 : vector<8x256xf32>
      %76 = math.exp %75 : vector<8x256xf32>
      %cst_50 = arith.constant 1.000000e+00 : f32
      %77 = vector.broadcast %cst_50 : f32 to vector<8x256xf32>
      %78 = arith.addf %77, %76 : vector<8x256xf32>
      %79 = arith.divf %77, %78 : vector<8x256xf32>
      %80 = vector.extract_strided_slice %79 {offsets = [0, 0], sizes = [8, 128], strides = [1, 1]} : vector<8x256xf32> to vector<8x128xf32>
      %81 = vector.extract_strided_slice %79 {offsets = [0, 128], sizes = [8, 128], strides = [1, 1]} : vector<8x256xf32> to vector<8x128xf32>
      %82 = vector.extract_strided_slice %67 {offsets = [0, 256], sizes = [8, 128], strides = [1, 1]} : vector<8x384xf32> to vector<8x128xf32>
      %83 = vector.extract_strided_slice %71 {offsets = [0, 256], sizes = [8, 128], strides = [1, 1]} : vector<8x384xf32> to vector<8x128xf32>
      %84 = arith.mulf %80, %83 : vector<8x128xf32>
      %85 = arith.addf %82, %84 : vector<8x128xf32>
      %86 = math.tanh %85 : vector<8x128xf32>
      %cst_51 = arith.constant 1.000000e+00 : f32
      %87 = vector.broadcast %cst_51 : f32 to vector<8x128xf32>
      %88 = arith.subf %87, %81 : vector<8x128xf32>
      %89 = arith.mulf %88, %86 : vector<8x128xf32>
      %90 = arith.mulf %81, %61 : vector<8x128xf32>
      %91 = arith.addf %89, %90 : vector<8x128xf32>
      %92 = arith.index_cast %65 : i32 to index
      %c0_52 = arith.constant 0 : index
      %93 = vector.load %arg12[%92, %c0_52] : memref<64x128xf32, #tpu.memory_space<vmem>>, vector<8x128xf32>
      tpu.vector_store %arg12[%92, %c0_52], %91 {strides = array<i32>} : memref<64x128xf32, #tpu.memory_space<vmem>>, vector<8x128xf32>,
      %c16_i32 = arith.constant 16 : i32
      %94 = arith.addi %33, %c16_i32 : i32
      %95 = tpu.assume_multiple %94, 8 : i32
      %96 = arith.index_cast %95 : i32 to index
      %c0_53 = arith.constant 0 : index
      %97 = vector.load %arg13[%96, %c0_53] : memref<64x384xf32, #tpu.memory_space<vmem>>, vector<8x384xf32>
      %c0_54 = arith.constant 0 : index
      %c0_55 = arith.constant 0 : index
      %98 = vector.load %arg4[%c0_54, %c0_55] : memref<128x384xf32, #tpu.memory_space<vmem>>, vector<128x384xf32>
      %cst_56 = arith.constant dense<0.000000e+00> : vector<8x384xf32>
      %99 = tpu.matmul %91, %98, %cst_56 {dimension_numbers = #tpu.dot_dimension_numbers<[1], [0], [0], [1], [0, 0, 1, 1], [], []>} : vector<8x128xf32>, vector<128x384xf32>, vector<8x384xf32> -> vector<8x384xf32>
      %100 = vector.broadcast %3 : vector<1x384xf32> to vector<8x384xf32>
      %101 = arith.addf %99, %100 : vector<8x384xf32>
      %102 = vector.extract_strided_slice %97 {offsets = [0, 0], sizes = [8, 256], strides = [1, 1]} : vector<8x384xf32> to vector<8x256xf32>
      %103 = vector.extract_strided_slice %101 {offsets = [0, 0], sizes = [8, 256], strides = [1, 1]} : vector<8x384xf32> to vector<8x256xf32>
      %104 = arith.addf %102, %103 : vector<8x256xf32>
      %105 = arith.negf %104 : vector<8x256xf32>
      %106 = math.exp %105 : vector<8x256xf32>
      %cst_57 = arith.constant 1.000000e+00 : f32
      %107 = vector.broadcast %cst_57 : f32 to vector<8x256xf32>
      %108 = arith.addf %107, %106 : vector<8x256xf32>
      %109 = arith.divf %107, %108 : vector<8x256xf32>
      %110 = vector.extract_strided_slice %109 {offsets = [0, 0], sizes = [8, 128], strides = [1, 1]} : vector<8x256xf32> to vector<8x128xf32>
      %111 = vector.extract_strided_slice %109 {offsets = [0, 128], sizes = [8, 128], strides = [1, 1]} : vector<8x256xf32> to vector<8x128xf32>
      %112 = vector.extract_strided_slice %97 {offsets = [0, 256], sizes = [8, 128], strides = [1, 1]} : vector<8x384xf32> to vector<8x128xf32>
      %113 = vector.extract_strided_slice %101 {offsets = [0, 256], sizes = [8, 128], strides = [1, 1]} : vector<8x384xf32> to vector<8x128xf32>
      %114 = arith.mulf %110, %113 : vector<8x128xf32>
      %115 = arith.addf %112, %114 : vector<8x128xf32>
      %116 = math.tanh %115 : vector<8x128xf32>
      %cst_58 = arith.constant 1.000000e+00 : f32
      %117 = vector.broadcast %cst_58 : f32 to vector<8x128xf32>
      %118 = arith.subf %117, %111 : vector<8x128xf32>
      %119 = arith.mulf %118, %116 : vector<8x128xf32>
      %120 = arith.mulf %111, %91 : vector<8x128xf32>
      %121 = arith.addf %119, %120 : vector<8x128xf32>
      %122 = arith.index_cast %95 : i32 to index
      %c0_59 = arith.constant 0 : index
      %123 = vector.load %arg12[%122, %c0_59] : memref<64x128xf32, #tpu.memory_space<vmem>>, vector<8x128xf32>
      tpu.vector_store %arg12[%122, %c0_59], %121 {strides = array<i32>} : memref<64x128xf32, #tpu.memory_space<vmem>>, vector<8x128xf32>,
      %c24_i32 = arith.constant 24 : i32
      %124 = arith.addi %33, %c24_i32 : i32
      %125 = tpu.assume_multiple %124, 8 : i32
      %126 = arith.index_cast %125 : i32 to index
      %c0_60 = arith.constant 0 : index
      %127 = vector.load %arg13[%126, %c0_60] : memref<64x384xf32, #tpu.memory_space<vmem>>, vector<8x384xf32>
      %c0_61 = arith.constant 0 : index
      %c0_62 = arith.constant 0 : index
      %128 = vector.load %arg4[%c0_61, %c0_62] : memref<128x384xf32, #tpu.memory_space<vmem>>, vector<128x384xf32>
      %cst_63 = arith.constant dense<0.000000e+00> : vector<8x384xf32>
      %129 = tpu.matmul %121, %128, %cst_63 {dimension_numbers = #tpu.dot_dimension_numbers<[1], [0], [0], [1], [0, 0, 1, 1], [], []>} : vector<8x128xf32>, vector<128x384xf32>, vector<8x384xf32> -> vector<8x384xf32>
      %130 = vector.broadcast %3 : vector<1x384xf32> to vector<8x384xf32>
      %131 = arith.addf %129, %130 : vector<8x384xf32>
      %132 = vector.extract_strided_slice %127 {offsets = [0, 0], sizes = [8, 256], strides = [1, 1]} : vector<8x384xf32> to vector<8x256xf32>
      %133 = vector.extract_strided_slice %131 {offsets = [0, 0], sizes = [8, 256], strides = [1, 1]} : vector<8x384xf32> to vector<8x256xf32>
      %134 = arith.addf %132, %133 : vector<8x256xf32>
      %135 = arith.negf %134 : vector<8x256xf32>
      %136 = math.exp %135 : vector<8x256xf32>
      %cst_64 = arith.constant 1.000000e+00 : f32
      %137 = vector.broadcast %cst_64 : f32 to vector<8x256xf32>
      %138 = arith.addf %137, %136 : vector<8x256xf32>
      %139 = arith.divf %137, %138 : vector<8x256xf32>
      %140 = vector.extract_strided_slice %139 {offsets = [0, 0], sizes = [8, 128], strides = [1, 1]} : vector<8x256xf32> to vector<8x128xf32>
      %141 = vector.extract_strided_slice %139 {offsets = [0, 128], sizes = [8, 128], strides = [1, 1]} : vector<8x256xf32> to vector<8x128xf32>
      %142 = vector.extract_strided_slice %127 {offsets = [0, 256], sizes = [8, 128], strides = [1, 1]} : vector<8x384xf32> to vector<8x128xf32>
      %143 = vector.extract_strided_slice %131 {offsets = [0, 256], sizes = [8, 128], strides = [1, 1]} : vector<8x384xf32> to vector<8x128xf32>
      %144 = arith.mulf %140, %143 : vector<8x128xf32>
      %145 = arith.addf %142, %144 : vector<8x128xf32>
      %146 = math.tanh %145 : vector<8x128xf32>
      %cst_65 = arith.constant 1.000000e+00 : f32
      %147 = vector.broadcast %cst_65 : f32 to vector<8x128xf32>
      %148 = arith.subf %147, %141 : vector<8x128xf32>
      %149 = arith.mulf %148, %146 : vector<8x128xf32>
      %150 = arith.mulf %141, %121 : vector<8x128xf32>
      %151 = arith.addf %149, %150 : vector<8x128xf32>
      %152 = arith.index_cast %125 : i32 to index
      %c0_66 = arith.constant 0 : index
      %153 = vector.load %arg12[%152, %c0_66] : memref<64x128xf32, #tpu.memory_space<vmem>>, vector<8x128xf32>
      tpu.vector_store %arg12[%152, %c0_66], %151 {strides = array<i32>} : memref<64x128xf32, #tpu.memory_space<vmem>>, vector<8x128xf32>,
      scf.yield %151 : vector<8x128xf32>
    }
    %c2_i32_14 = arith.constant 2 : i32
    %c0_15 = arith.constant 0 : index
    %c0_16 = arith.constant 0 : index
    %c0_17 = arith.constant 0 : index
    %15 = vector.load %arg11[%c0_15, %c0_16, %c0_17] : memref<2x8x128xf32, #tpu.memory_space<vmem>>, vector<1x8x128xf32>
    %16 = vector.shape_cast %15 : vector<1x8x128xf32> to vector<8x128xf32>
    %17 = vector.shape_cast %14 : vector<8x128xf32> to vector<1x8x128xf32>
    tpu.vector_store %arg11[%c0_15, %c0_16, %c0_17], %17 {strides = array<i32>} : memref<2x8x128xf32, #tpu.memory_space<vmem>>, vector<1x8x128xf32>,
    %c0_18 = arith.constant 0 : index
    %c0_19 = arith.constant 0 : index
    %18 = vector.load %arg7[%c0_18, %c0_19] : memref<1x384xf32, #tpu.memory_space<vmem>>, vector<1x384xf32>
    %c0_20 = arith.constant 0 : index
    %c0_21 = arith.constant 0 : index
    %19 = vector.load %arg12[%c0_20, %c0_21] : memref<64x128xf32, #tpu.memory_space<vmem>>, vector<64x128xf32>
    %c0_22 = arith.constant 0 : index
    %c0_23 = arith.constant 0 : index
    %20 = vector.load %arg8[%c0_22, %c0_23] : memref<128x384xf32, #tpu.memory_space<vmem>>, vector<128x384xf32>
    %cst_24 = arith.constant dense<0.000000e+00> : vector<64x384xf32>
    %21 = tpu.matmul %19, %20, %cst_24 {dimension_numbers = #tpu.dot_dimension_numbers<[1], [0], [0], [1], [0, 0, 1, 1], [], []>} : vector<64x128xf32>, vector<128x384xf32>, vector<64x384xf32> -> vector<64x384xf32>
    %c0_25 = arith.constant 0 : index
    %c0_26 = arith.constant 0 : index
    %22 = vector.load %arg9[%c0_25, %c0_26] : memref<1x384xf32, #tpu.memory_space<vmem>>, vector<1x384xf32>
    %23 = vector.broadcast %22 : vector<1x384xf32> to vector<64x384xf32>
    %24 = arith.addf %21, %23 : vector<64x384xf32>
    %c0_27 = arith.constant 0 : index
    %c0_28 = arith.constant 0 : index
    %25 = vector.load %arg13[%c0_27, %c0_28] : memref<64x384xf32, #tpu.memory_space<vmem>>, vector<64x384xf32>
    tpu.vector_store %arg13[%c0_27, %c0_28], %24 {strides = array<i32>} : memref<64x384xf32, #tpu.memory_space<vmem>>, vector<64x384xf32>,
    %c1 = arith.constant 1 : index
    %c0_29 = arith.constant 0 : index
    %c0_30 = arith.constant 0 : index
    %26 = vector.load %arg11[%c1, %c0_29, %c0_30] : memref<2x8x128xf32, #tpu.memory_space<vmem>>, vector<1x8x128xf32>
    %27 = vector.shape_cast %26 : vector<1x8x128xf32> to vector<8x128xf32>
    %c0_i32_31 = arith.constant 0 : i32
    %c2_i32_32 = arith.constant 2 : i32
    %28 = arith.addi %c0_i32_31, %c2_i32_32 : i32
    %c1_i32_33 = arith.constant 1 : i32
    %29 = scf.for %arg14 = %c0_i32_31 to %28 step %c1_i32_33 iter_args(%arg15 = %27) -> (vector<8x128xf32>)  : i32 {
      %c32_i32 = arith.constant 32 : i32
      %33 = arith.muli %arg14, %c32_i32 : i32
      %c0_i32_38 = arith.constant 0 : i32
      %34 = arith.addi %33, %c0_i32_38 : i32
      %35 = tpu.assume_multiple %34, 8 : i32
      %36 = arith.index_cast %35 : i32 to index
      %c0_39 = arith.constant 0 : index
      %37 = vector.load %arg13[%36, %c0_39] : memref<64x384xf32, #tpu.memory_space<vmem>>, vector<8x384xf32>
      %c0_40 = arith.constant 0 : index
      %c0_41 = arith.constant 0 : index
      %38 = vector.load %arg5[%c0_40, %c0_41] : memref<128x384xf32, #tpu.memory_space<vmem>>, vector<128x384xf32>
      %cst_42 = arith.constant dense<0.000000e+00> : vector<8x384xf32>
      %39 = tpu.matmul %arg15, %38, %cst_42 {dimension_numbers = #tpu.dot_dimension_numbers<[1], [0], [0], [1], [0, 0, 1, 1], [], []>} : vector<8x128xf32>, vector<128x384xf32>, vector<8x384xf32> -> vector<8x384xf32>
      %40 = vector.broadcast %18 : vector<1x384xf32> to vector<8x384xf32>
      %41 = arith.addf %39, %40 : vector<8x384xf32>
      %42 = vector.extract_strided_slice %37 {offsets = [0, 0], sizes = [8, 256], strides = [1, 1]} : vector<8x384xf32> to vector<8x256xf32>
      %43 = vector.extract_strided_slice %41 {offsets = [0, 0], sizes = [8, 256], strides = [1, 1]} : vector<8x384xf32> to vector<8x256xf32>
      %44 = arith.addf %42, %43 : vector<8x256xf32>
      %45 = arith.negf %44 : vector<8x256xf32>
      %46 = math.exp %45 : vector<8x256xf32>
      %cst_43 = arith.constant 1.000000e+00 : f32
      %47 = vector.broadcast %cst_43 : f32 to vector<8x256xf32>
      %48 = arith.addf %47, %46 : vector<8x256xf32>
      %49 = arith.divf %47, %48 : vector<8x256xf32>
      %50 = vector.extract_strided_slice %49 {offsets = [0, 0], sizes = [8, 128], strides = [1, 1]} : vector<8x256xf32> to vector<8x128xf32>
      %51 = vector.extract_strided_slice %49 {offsets = [0, 128], sizes = [8, 128], strides = [1, 1]} : vector<8x256xf32> to vector<8x128xf32>
      %52 = vector.extract_strided_slice %37 {offsets = [0, 256], sizes = [8, 128], strides = [1, 1]} : vector<8x384xf32> to vector<8x128xf32>
      %53 = vector.extract_strided_slice %41 {offsets = [0, 256], sizes = [8, 128], strides = [1, 1]} : vector<8x384xf32> to vector<8x128xf32>
      %54 = arith.mulf %50, %53 : vector<8x128xf32>
      %55 = arith.addf %52, %54 : vector<8x128xf32>
      %56 = math.tanh %55 : vector<8x128xf32>
      %cst_44 = arith.constant 1.000000e+00 : f32
      %57 = vector.broadcast %cst_44 : f32 to vector<8x128xf32>
      %58 = arith.subf %57, %51 : vector<8x128xf32>
      %59 = arith.mulf %58, %56 : vector<8x128xf32>
      %60 = arith.mulf %51, %arg15 : vector<8x128xf32>
      %61 = arith.addf %59, %60 : vector<8x128xf32>
      %c8_i32 = arith.constant 8 : i32
      %62 = arith.addi %33, %c8_i32 : i32
      %63 = tpu.assume_multiple %62, 8 : i32
      %64 = arith.index_cast %63 : i32 to index
      %c0_45 = arith.constant 0 : index
      %65 = vector.load %arg13[%64, %c0_45] : memref<64x384xf32, #tpu.memory_space<vmem>>, vector<8x384xf32>
      %c0_46 = arith.constant 0 : index
      %c0_47 = arith.constant 0 : index
      %66 = vector.load %arg5[%c0_46, %c0_47] : memref<128x384xf32, #tpu.memory_space<vmem>>, vector<128x384xf32>
      %cst_48 = arith.constant dense<0.000000e+00> : vector<8x384xf32>
      %67 = tpu.matmul %61, %66, %cst_48 {dimension_numbers = #tpu.dot_dimension_numbers<[1], [0], [0], [1], [0, 0, 1, 1], [], []>} : vector<8x128xf32>, vector<128x384xf32>, vector<8x384xf32> -> vector<8x384xf32>
      %68 = vector.broadcast %18 : vector<1x384xf32> to vector<8x384xf32>
      %69 = arith.addf %67, %68 : vector<8x384xf32>
      %70 = vector.extract_strided_slice %65 {offsets = [0, 0], sizes = [8, 256], strides = [1, 1]} : vector<8x384xf32> to vector<8x256xf32>
      %71 = vector.extract_strided_slice %69 {offsets = [0, 0], sizes = [8, 256], strides = [1, 1]} : vector<8x384xf32> to vector<8x256xf32>
      %72 = arith.addf %70, %71 : vector<8x256xf32>
      %73 = arith.negf %72 : vector<8x256xf32>
      %74 = math.exp %73 : vector<8x256xf32>
      %cst_49 = arith.constant 1.000000e+00 : f32
      %75 = vector.broadcast %cst_49 : f32 to vector<8x256xf32>
      %76 = arith.addf %75, %74 : vector<8x256xf32>
      %77 = arith.divf %75, %76 : vector<8x256xf32>
      %78 = vector.extract_strided_slice %77 {offsets = [0, 0], sizes = [8, 128], strides = [1, 1]} : vector<8x256xf32> to vector<8x128xf32>
      %79 = vector.extract_strided_slice %77 {offsets = [0, 128], sizes = [8, 128], strides = [1, 1]} : vector<8x256xf32> to vector<8x128xf32>
      %80 = vector.extract_strided_slice %65 {offsets = [0, 256], sizes = [8, 128], strides = [1, 1]} : vector<8x384xf32> to vector<8x128xf32>
      %81 = vector.extract_strided_slice %69 {offsets = [0, 256], sizes = [8, 128], strides = [1, 1]} : vector<8x384xf32> to vector<8x128xf32>
      %82 = arith.mulf %78, %81 : vector<8x128xf32>
      %83 = arith.addf %80, %82 : vector<8x128xf32>
      %84 = math.tanh %83 : vector<8x128xf32>
      %cst_50 = arith.constant 1.000000e+00 : f32
      %85 = vector.broadcast %cst_50 : f32 to vector<8x128xf32>
      %86 = arith.subf %85, %79 : vector<8x128xf32>
      %87 = arith.mulf %86, %84 : vector<8x128xf32>
      %88 = arith.mulf %79, %61 : vector<8x128xf32>
      %89 = arith.addf %87, %88 : vector<8x128xf32>
      %c16_i32 = arith.constant 16 : i32
      %90 = arith.addi %33, %c16_i32 : i32
      %91 = tpu.assume_multiple %90, 8 : i32
      %92 = arith.index_cast %91 : i32 to index
      %c0_51 = arith.constant 0 : index
      %93 = vector.load %arg13[%92, %c0_51] : memref<64x384xf32, #tpu.memory_space<vmem>>, vector<8x384xf32>
      %c0_52 = arith.constant 0 : index
      %c0_53 = arith.constant 0 : index
      %94 = vector.load %arg5[%c0_52, %c0_53] : memref<128x384xf32, #tpu.memory_space<vmem>>, vector<128x384xf32>
      %cst_54 = arith.constant dense<0.000000e+00> : vector<8x384xf32>
      %95 = tpu.matmul %89, %94, %cst_54 {dimension_numbers = #tpu.dot_dimension_numbers<[1], [0], [0], [1], [0, 0, 1, 1], [], []>} : vector<8x128xf32>, vector<128x384xf32>, vector<8x384xf32> -> vector<8x384xf32>
      %96 = vector.broadcast %18 : vector<1x384xf32> to vector<8x384xf32>
      %97 = arith.addf %95, %96 : vector<8x384xf32>
      %98 = vector.extract_strided_slice %93 {offsets = [0, 0], sizes = [8, 256], strides = [1, 1]} : vector<8x384xf32> to vector<8x256xf32>
      %99 = vector.extract_strided_slice %97 {offsets = [0, 0], sizes = [8, 256], strides = [1, 1]} : vector<8x384xf32> to vector<8x256xf32>
      %100 = arith.addf %98, %99 : vector<8x256xf32>
      %101 = arith.negf %100 : vector<8x256xf32>
      %102 = math.exp %101 : vector<8x256xf32>
      %cst_55 = arith.constant 1.000000e+00 : f32
      %103 = vector.broadcast %cst_55 : f32 to vector<8x256xf32>
      %104 = arith.addf %103, %102 : vector<8x256xf32>
      %105 = arith.divf %103, %104 : vector<8x256xf32>
      %106 = vector.extract_strided_slice %105 {offsets = [0, 0], sizes = [8, 128], strides = [1, 1]} : vector<8x256xf32> to vector<8x128xf32>
      %107 = vector.extract_strided_slice %105 {offsets = [0, 128], sizes = [8, 128], strides = [1, 1]} : vector<8x256xf32> to vector<8x128xf32>
      %108 = vector.extract_strided_slice %93 {offsets = [0, 256], sizes = [8, 128], strides = [1, 1]} : vector<8x384xf32> to vector<8x128xf32>
      %109 = vector.extract_strided_slice %97 {offsets = [0, 256], sizes = [8, 128], strides = [1, 1]} : vector<8x384xf32> to vector<8x128xf32>
      %110 = arith.mulf %106, %109 : vector<8x128xf32>
      %111 = arith.addf %108, %110 : vector<8x128xf32>
      %112 = math.tanh %111 : vector<8x128xf32>
      %cst_56 = arith.constant 1.000000e+00 : f32
      %113 = vector.broadcast %cst_56 : f32 to vector<8x128xf32>
      %114 = arith.subf %113, %107 : vector<8x128xf32>
      %115 = arith.mulf %114, %112 : vector<8x128xf32>
      %116 = arith.mulf %107, %89 : vector<8x128xf32>
      %117 = arith.addf %115, %116 : vector<8x128xf32>
      %c24_i32 = arith.constant 24 : i32
      %118 = arith.addi %33, %c24_i32 : i32
      %119 = tpu.assume_multiple %118, 8 : i32
      %120 = arith.index_cast %119 : i32 to index
      %c0_57 = arith.constant 0 : index
      %121 = vector.load %arg13[%120, %c0_57] : memref<64x384xf32, #tpu.memory_space<vmem>>, vector<8x384xf32>
      %c0_58 = arith.constant 0 : index
      %c0_59 = arith.constant 0 : index
      %122 = vector.load %arg5[%c0_58, %c0_59] : memref<128x384xf32, #tpu.memory_space<vmem>>, vector<128x384xf32>
      %cst_60 = arith.constant dense<0.000000e+00> : vector<8x384xf32>
      %123 = tpu.matmul %117, %122, %cst_60 {dimension_numbers = #tpu.dot_dimension_numbers<[1], [0], [0], [1], [0, 0, 1, 1], [], []>} : vector<8x128xf32>, vector<128x384xf32>, vector<8x384xf32> -> vector<8x384xf32>
      %124 = vector.broadcast %18 : vector<1x384xf32> to vector<8x384xf32>
      %125 = arith.addf %123, %124 : vector<8x384xf32>
      %126 = vector.extract_strided_slice %121 {offsets = [0, 0], sizes = [8, 256], strides = [1, 1]} : vector<8x384xf32> to vector<8x256xf32>
      %127 = vector.extract_strided_slice %125 {offsets = [0, 0], sizes = [8, 256], strides = [1, 1]} : vector<8x384xf32> to vector<8x256xf32>
      %128 = arith.addf %126, %127 : vector<8x256xf32>
      %129 = arith.negf %128 : vector<8x256xf32>
      %130 = math.exp %129 : vector<8x256xf32>
      %cst_61 = arith.constant 1.000000e+00 : f32
      %131 = vector.broadcast %cst_61 : f32 to vector<8x256xf32>
      %132 = arith.addf %131, %130 : vector<8x256xf32>
      %133 = arith.divf %131, %132 : vector<8x256xf32>
      %134 = vector.extract_strided_slice %133 {offsets = [0, 0], sizes = [8, 128], strides = [1, 1]} : vector<8x256xf32> to vector<8x128xf32>
      %135 = vector.extract_strided_slice %133 {offsets = [0, 128], sizes = [8, 128], strides = [1, 1]} : vector<8x256xf32> to vector<8x128xf32>
      %136 = vector.extract_strided_slice %121 {offsets = [0, 256], sizes = [8, 128], strides = [1, 1]} : vector<8x384xf32> to vector<8x128xf32>
      %137 = vector.extract_strided_slice %125 {offsets = [0, 256], sizes = [8, 128], strides = [1, 1]} : vector<8x384xf32> to vector<8x128xf32>
      %138 = arith.mulf %134, %137 : vector<8x128xf32>
      %139 = arith.addf %136, %138 : vector<8x128xf32>
      %140 = math.tanh %139 : vector<8x128xf32>
      %cst_62 = arith.constant 1.000000e+00 : f32
      %141 = vector.broadcast %cst_62 : f32 to vector<8x128xf32>
      %142 = arith.subf %141, %135 : vector<8x128xf32>
      %143 = arith.mulf %142, %140 : vector<8x128xf32>
      %144 = arith.mulf %135, %117 : vector<8x128xf32>
      %145 = arith.addf %143, %144 : vector<8x128xf32>
      %146 = arith.index_cast %119 : i32 to index
      %c0_63 = arith.constant 0 : index
      %147 = vector.load %arg12[%146, %c0_63] : memref<64x128xf32, #tpu.memory_space<vmem>>, vector<8x128xf32>
      %148 = arith.addf %145, %147 : vector<8x128xf32>
      %c8_i32_64 = arith.constant 8 : i32
      %149 = arith.muli %arg14, %c8_i32_64 : i32
      %150 = tpu.assume_multiple %149, 8 : i32
      %151 = arith.index_cast %150 : i32 to index
      %c0_65 = arith.constant 0 : index
      %152 = vector.load %arg10[%151, %c0_65] : memref<16x128xf32, #tpu.memory_space<vmem>>, vector<8x128xf32>
      tpu.vector_store %arg10[%151, %c0_65], %148 {strides = array<i32>} : memref<16x128xf32, #tpu.memory_space<vmem>>, vector<8x128xf32>,
      scf.yield %145 : vector<8x128xf32>
    }
    %c2_i32_34 = arith.constant 2 : i32
    %c1_35 = arith.constant 1 : index
    %c0_36 = arith.constant 0 : index
    %c0_37 = arith.constant 0 : index
    %30 = vector.load %arg11[%c1_35, %c0_36, %c0_37] : memref<2x8x128xf32, #tpu.memory_space<vmem>>, vector<1x8x128xf32>
    %31 = vector.shape_cast %30 : vector<1x8x128xf32> to vector<8x128xf32>
    %32 = vector.shape_cast %29 : vector<8x128xf32> to vector<1x8x128xf32>
    tpu.vector_store %arg11[%c1_35, %c0_36, %c0_37], %32 {strides = array<i32>} : memref<2x8x128xf32, #tpu.memory_space<vmem>>, vector<1x8x128xf32>,
    return
  }
  func.func @transform_0(%arg0: i32) -> (i32, i32) {
    %c0_i32 = arith.constant 0 : i32
    %c0_i32_0 = arith.constant 0 : i32
    return %arg0, %c0_i32 : i32, i32
  }
  func.func @transform_1(%arg0: i32) -> (i32, i32) {
    %c0_i32 = arith.constant 0 : i32
    %c0_i32_0 = arith.constant 0 : i32
    %c0_i32_1 = arith.constant 0 : i32
    return %c0_i32, %c0_i32_0 : i32, i32
  }
  func.func @transform_2(%arg0: i32) -> (i32, i32) {
    %c0_i32 = arith.constant 0 : i32
    %c0_i32_0 = arith.constant 0 : i32
    %c0_i32_1 = arith.constant 0 : i32
    return %c0_i32, %c0_i32_0 : i32, i32
  }
  func.func @transform_3(%arg0: i32) -> (i32, i32) {
    %c0_i32 = arith.constant 0 : i32
    %c0_i32_0 = arith.constant 0 : i32
    %c0_i32_1 = arith.constant 0 : i32
    return %c0_i32, %c0_i32_0 : i32, i32
  }
  func.func @transform_4(%arg0: i32) -> (i32, i32) {
    %c0_i32 = arith.constant 0 : i32
    %c0_i32_0 = arith.constant 0 : i32
    %c0_i32_1 = arith.constant 0 : i32
    return %c0_i32, %c0_i32_0 : i32, i32
  }
  func.func @transform_5(%arg0: i32) -> (i32, i32) {
    %c0_i32 = arith.constant 0 : i32
    %c0_i32_0 = arith.constant 0 : i32
    %c0_i32_1 = arith.constant 0 : i32
    return %c0_i32, %c0_i32_0 : i32, i32
  }
  func.func @transform_6(%arg0: i32) -> (i32, i32) {
    %c0_i32 = arith.constant 0 : i32
    %c0_i32_0 = arith.constant 0 : i32
    %c0_i32_1 = arith.constant 0 : i32
    return %c0_i32, %c0_i32_0 : i32, i32
  }
  func.func @transform_7(%arg0: i32) -> (i32, i32) {
    %c0_i32 = arith.constant 0 : i32
    %c0_i32_0 = arith.constant 0 : i32
    %c0_i32_1 = arith.constant 0 : i32
    return %c0_i32, %c0_i32_0 : i32, i32
  }
  func.func @transform_8(%arg0: i32) -> (i32, i32) {
    %c0_i32 = arith.constant 0 : i32
    %c0_i32_0 = arith.constant 0 : i32
    %c0_i32_1 = arith.constant 0 : i32
    return %c0_i32, %c0_i32_0 : i32, i32
  }
  func.func @transform_9(%arg0: i32) -> (i32, i32) {
    %c0_i32 = arith.constant 0 : i32
    %c0_i32_0 = arith.constant 0 : i32
    return %arg0, %c0_i32 : i32, i32
  }
}

</mosaic_0001>

<bundles_post_ra>
// kernel: tpu_custom_call.1
= control target key start
LH: loop header
LB: loop body
LE: loop exit
PB: predicated region body
PF: predicated region fallthrough
CT: control target
= control target key end

     0   :  { %s4159_s0 = inlined_call_operand.hbm [shape: f32[128,128], index: 0, kind: input, shape index: {}]   ;;  %s4160_s1 = inlined_call_operand.hbm [shape: f32[128,384], index: 1, kind: input, shape index: {}]   ;;  %s4161_s2 = inlined_call_operand.hbm [shape: f32[1,384], index: 2, kind: input, shape index: {}]   ;;  %s4162_s3 = inlined_call_operand.hbm [shape: f32[128,384], index: 3, kind: input, shape index: {}]   ;;  %s4163_s4 = inlined_call_operand.hbm [shape: f32[128,384], index: 4, kind: input, shape index: {}]   ;;  %s4164_s5 = inlined_call_operand.vmem [shape: f32[1,384], index: 5, kind: input, shape index: {}]   ;;  %s4165_s6 = inlined_call_operand.hbm [shape: f32[1,384], index: 6, kind: input, shape index: {}]   ;;  %s4166_s7 = inlined_call_operand.hbm [shape: f32[128,384], index: 7, kind: input, shape index: {}]   ;;  %s4167_s8 = inlined_call_operand.vmem [shape: f32[1,384], index: 8, kind: input, shape index: {}]   ;;  %s4168_s9 = inlined_call_operand.hbm [shape: f32[32,128], index: 9, kind: output, shape index: {}]  }
   0x1   :  { %4169 = sst [smem:[#allocation23_spill]] %s4160_s1 }
   0x2   :  { %4170 = sst [smem:[#allocation24_spill]] %s4161_s2 }
   0x3   :  { %4171 = sst [smem:[#allocation25_spill]] %s4162_s3 }
   0x4   :  { %4172 = sst [smem:[#allocation26_spill]] %s4163_s4 }
   0x5   :  { %14 = vsyncpa [#allocation6], 0 }
   0x6   :  { %16 = vsyncpa [#allocation6 + $0x1], 0 }
   0x7   :  { %17 = vsyncpa [#allocation9], 0 }
   0x8   :  { %18 = vsyncpa [#allocation12], 0 }
   0x9   :  { %19 = vsyncpa [#allocation15], 0 }
   0xa   :  { %20 = vsyncpa [#allocation7], 0 }
   0xb   :  { %22 = vsyncpa [#allocation7 + $0x1], 0  ;;  %s3036_s30 = smov 0   ;;  %s3038_s10 = smov 0  }
   0xc   :  { %s3040_s11 = smov 0   ;;  %s3042_s12 = smov 0  }
   0xd LB: > { %s4173_s1 = sld [smem:[#allocation23_spill]]  ;;  %s3060_s16 = sadd.s32 4294967295, %s2955_s12   ;;  %s2955_s12 = sphi %s3042_s12, %s4191_s12   ;;  %s2951_s11 = sphi %s3040_s11, %s4190_s11   ;;  %s2947_s10 = sphi %s3038_s10, %s4189_s10   ;;  %s2943_s30 = sphi %s3036_s30, %s4188_s30  }
   0xe   : > { %p2290_p0 = scmp.ge.s32.totalorder %s2955_s12, 1  ;;  %p49_p1 = scmp.eq.s32.totalorder %s3060_s16, 0 }
   0xf   : > { %p253_p2 = scmp.lt.s32.totalorder %s2955_s12, 3  ;;  %s2973_s18 = smov [#allocation8]  }
  0x10   : > { %s266_s19 = sshll.u32 %s2973_s18, 4  ;;  %s4175_s3 = sld [smem:[#allocation25_spill]]  ;;  %s267_s19 = int_to_ptr.vmem [resolvable:$true] %s266_s19 }
  0x11   : > { %p3066_p4 = pnand %p2290_p0, %p253_p2  ;;  %s322_s26 = sshll.u32 %s4165_s6, 4  ;;  %s323_s26 = int_to_ptr.hbm [resolvable:$true] %s322_s26 }
  0x12   : > { %s2974_s27 = smov [#allocation11]   ;;  %s2975_s29 = smov 384  }
  0x13   : > { %s264_s15 = sshll.u32 %s4173_s1, 4  ;;  %p2453_p5 = pneg %p3066_p4  ;;  %s265_s15 = int_to_ptr.hbm [resolvable:$true] %s264_s15 }
  0x14   : > { %s292_s28 = sshll.u32 %s2974_s27, 4  ;;  %s2976_s13 = smov 24   ;;  %s293_s28 = int_to_ptr.vmem [resolvable:$true] %s292_s28 }
  0x15   : > { %p3078_p7 = pnand %p2453_p5, %p49_p1  ;;  %s4177_s2 = sld [smem:[#allocation24_spill]] }
  0x16   : > { %s290_s22 = sshll.u32 %s4175_s3, 4  ;;  %s2977_s21 = smov [#allocation14]   ;;  %s291_s22 = int_to_ptr.hbm [resolvable:$true] %s290_s22 }
  0x17   : > { %2456 = dma.hbm_to_vmem [thread:$0]  (!%p3078_p7), %s265_s15, 6144, %s267_s19, [#allocation9], %s2975_s29, %s2975_s29, %s2976_s13  }
  0x18   : > { %2462 = dma.hbm_to_vmem [thread:$0]  (!%p3078_p7), %s291_s22, 6144, %s293_s28, [#allocation12], %s2975_s29, %s2975_s29, %s2976_s13  }
  0x19   : > { %s324_s24 = sshll.u32 %s2977_s21, 4  ;;  %s2978_s15 = smov [#allocation10]   ;;  %s325_s24 = int_to_ptr.vmem [resolvable:$true] %s324_s24 }
  0x1a   : > { %2468 = dma.hbm_to_vmem [thread:$0]  (!%p3078_p7), %s323_s26, 48, %s325_s24, [#allocation15]  }
  0x1b   : > { %s279_s20 = sshll.u32 %s4177_s2, 4  ;;  %s281_s19 = sshll.u32 %s2978_s15, 4  ;;  %s280_s20 = int_to_ptr.hbm [resolvable:$true] %s279_s20  ;;  %s282_s19 = int_to_ptr.vmem [resolvable:$true] %s281_s19 }
  0x1c   : > { %s4178_s4 = sld [smem:[#allocation26_spill]]  ;;  %s333_s26 = sshll.u32 %s4166_s7, 4  ;;  %s334_s26 = int_to_ptr.hbm [resolvable:$true] %s333_s26 }
  0x1d   : > { %2459 = dma.hbm_to_vmem [thread:$0]  (!%p3078_p7), %s280_s20, 48, %s282_s19, [#allocation9]  }
  0x1e   : > { %s2979_s18 = smov [#allocation13]   ;;  %s2980_s20 = smov [#allocation16]  }
  0x1f   : > { %s306_s21 = sshll.u32 %s2979_s18, 4  ;;  %s335_s24 = sshll.u32 %s2980_s20, 4  ;;  %s307_s21 = int_to_ptr.vmem [resolvable:$true] %s306_s21  ;;  %s336_s24 = int_to_ptr.vmem [resolvable:$true] %s335_s24 }
  0x20   : > { %2471 = dma.hbm_to_vmem [thread:$0]  (!%p3078_p7), %s334_s26, 6144, %s336_s24, [#allocation15], %s2975_s29, %s2975_s29, %s2976_s13  }
  0x21   : > { %s2289_s15 = sadd.s32 4294967294, %s2955_s12   ;;  %s3120_s19 = sadd.s32 1, %s2955_s12  }
  0x22   : > { %s304_s22 = sshll.u32 %s4178_s4, 4  ;;  %s32_s25 = ssub.s32 %s2955_s12, %s3120_s19  ;;  %s305_s22 = int_to_ptr.hbm [resolvable:$true] %s304_s22 }
  0x23   : > { %2465 = dma.hbm_to_vmem [thread:$0]  (!%p3078_p7), %s305_s22, 6144, %s307_s21, [#allocation12], %s2975_s29, %s2975_s29, %s2976_s13  }
  0x24   : > { %s35_s27 = sadd.s32 1, %s2951_s11  ;;  %p33_p8 = scmp.eq.s32.totalorder %s32_s25, 0 }
  0x25   : > { %p42_p9 = scmp.ne.s32.totalorder %s2951_s11, %s2947_s10  ;;  %p43_p10 = scmp.eq.s32.totalorder %s2955_s12, 0 }
  0x26   : > { %p48_p11 = scmp.ne.s32.totalorder %s2947_s10, %s2943_s30  ;;  %p240_p0 = scmp.eq.s32.totalorder %s3060_s16, 1 }
  0x27   : > { %s3131_s22 = scalar_select %p33_p8, %s2951_s11, %s35_s27  }
  0x28   : > { %p3133_p12 = por %p43_p10, %p42_p9  ;;  %p3139_p13 = por %p49_p1, %p48_p11 }
  0x29   : > { %p246_p2 = scmp.eq.s32.totalorder %s2289_s15, 1  ;;  %p2486_p5 = scmp.lt.s32.totalorder %s2955_s12, 2 }
  0x2a   : > { %s352_s13 = sand.u32 1, %s2951_s11   ;;  %p3146_p7 = por %p240_p0, %p42_p9 }
  0x2b   : > { %p3150_p8 = por %p246_p2, %p48_p11  ;;  %s2298_s26 = sshll.u32 %s352_s13, 6 }
  0x2c   : > { %s2351_s18 = sshll.u32 %s2955_s12, 6  ;;  %s356_s25 = scalar_lea.vmem [#allocation5], %s2298_s26 }
  0x2d   : > { %s361_s24 = scalar_lea.hbm %s4159_s0, %s2351_s18  ;;  %s364_s27 = sshll.u32 %s356_s25, 4  ;;  %s365_s27 = int_to_ptr.vmem [resolvable:$true] %s364_s27 }
  0x2e   : > { %s362_s1 = sshll.u32 %s361_s24, 4  ;;  %p3160_p9 = pnand %p2486_p5, %p3133_p12  ;;  %s363_s1 = int_to_ptr.hbm [resolvable:$true] %s362_s1 }
  0x2f   : > { %s353_s2 = scalar_lea.sflag [#allocation6], %s352_s13  ;;  %s2831_s3 = sshra.s32 %s363_s1, 4  ;;  %s2832_s3 = int_to_ptr.hbm [resolvable:$true] %s2831_s3 }
  0x30   : > { %s2833_s4 = scalar_lea.hbm %s2832_s3, 64  ;;  %p2835_p11 = pneg %p3160_p9 }
  0x31   : > { %p2834_p10 = scmp.ne.s32.totalorder %s2832_s3, %s2833_s4  ;;  %s2838_s21 = scalar_lea.hbm %s4159_s0, 128 }
  0x32   : > { %p2839_p12 = scmp.lt.s32.totalorder %s2832_s3, %s4159_s0  ;;  %p2840_p5 = scmp.lt.s32.totalorder %s2838_s21, %s2833_s4 }
  0x33   : > { %p2836_p0 = pnand %p2835_p11, %p2834_p10 }
  0x34   : > { %p2841_p6 = por %p2840_p5, %p2839_p12 }
  0x35   : > { %p2837_p2 = pneg %p2836_p0 }
  0x37   : > { %p2842_p3 = pnand %p2841_p6, %p2837_p2 }
  0x39   : > { %2845 = shalt.err (!%p2842_p3)
}
  0x3a   : > { %s2981_s13 = smov 128   ;;  %s2982_s24 = smov 8  }
  0x3b   : > { %2475 = dma.hbm_to_vmem [thread:$0]  (!%p3160_p9), %s363_s1, 1024, %s365_s27, %s353_s2, %s2981_s13, %s2981_s13, %s2982_s24  }
  0x3c   : > { %376 = sbr.rel (%p3066_p4) target bundleno = 1983 (0x7bf), region = 56  ;;  %s3177_s25 = sand.u32 (!%p3066_p4), 1, %s2947_s10  }
  0x3d   : > { %s2302_s26 = sshll.u32 (!%p3066_p4), %s3177_s25, 6  ;;  %s379_s3 = scalar_lea.sflag (!%p3066_p4), [#allocation6], %s3177_s25 }
  0x3e   : > { %s3181_s4 = scalar_lea.vmem (!%p3066_p4), [#allocation5], %s2302_s26 }
  0x41   : > { %2922 = dma.done.wait (%p3139_p13), %s379_s3, 1024  }
  0x42   : > { %2924 = vsyncadd (%p3139_p13), %s379_s3, 4294966272 }
  0x43   : > { %2926 = dma.done.wait (%p49_p1), [#allocation9], 6192  }
  0x44   : > { %2928 = vsyncadd (%p49_p1), [#allocation9], 4294961104 }
  0x45   : > { %2930 = dma.done.wait (%p49_p1), [#allocation12], 12288  }
  0x46   : > { %2932 = vsyncadd (%p49_p1), [#allocation12], 4294955008 }
  0x47   : > { %2934 = dma.done.wait (%p49_p1), [#allocation15], 6192  }
  0x48   : > { %2936 = vsyncadd (%p49_p1), [#allocation15], 4294961104  ;;  %s2309_s1 = sshll.u32 %s3177_s25, 4  ;;  %p4184_p3 = scmp.ne.s32.totalorder %s3060_s16, 0 }
  0x49   : > { %s3200_s2 = scalar_lea.vmem [#allocation17], %s2309_s1 }
  0x4a   : > { %453 = sbr.rel (%p4184_p3) target bundleno = 82 (0x52), region = 88 }
  0x4f   : > { %v2983_v0 = vmov 0.0  }
  0x50   : > { %454 = vst [vmem:[#allocation2] sm:$0xff] %v2983_v0 }
  0x51   : > { %455 = vst [vmem:[#allocation2 + $0x8] sm:$0xff] %v2983_v0 }
  0x52 PF: > { %v512_v1 = vld [vmem:[#allocation8 + $0x178] sm:$0xff]  ;;  %v509_v2 = vld [vmem:[#allocation8 + $0x160] sm:$0xff]  ;;  %v506_v3 = vld [vmem:[#allocation8 + $0x148] sm:$0xff]  ;;  %s3291_s27 = smov 0  }
  0x53   : > { %603 = vmatpush.msra.mxu2 %v512_v1  ;;  %v3204_v4 = vld [vmem:[#allocation8 + $0x170] sm:$0xff]  ;;  %v3207_v5 = vld [vmem:[#allocation8 + $0x158] sm:$0xff]  ;;  %v3209_v7 = vld [vmem:[#allocation8 + $0x140] sm:$0xff] }
  0x54   : > { %562 = vmatpush.msra.mxu1 %v3204_v4  ;;  %v503_v6 = vld [vmem:[#allocation8 + $0x130] sm:$0xff]  ;;  %v510_v9 = vld [vmem:[#allocation8 + $0x168] sm:$0xff]  ;;  %v500_v10 = vld [vmem:[#allocation8 + $0x118] sm:$0xff] }
  0x55   : > { %604 = vmatpush.msra.mxu2 %v509_v2  ;;  %v3215_v8 = vld [vmem:[%s4164_s5] sm:$0x7]  ;;  %v3217_v11 = vld [vmem:[#allocation8 + $0x128] sm:$0xff]  ;;  %521 = vmatpush.msra.mxu0 %v510_v9  ;;  %v504_v13 = vld [vmem:[#allocation8 + $0x138] sm:$0xff] }
  0x56   : > { %563 = vmatpush.msra.mxu1 %v3207_v5  ;;  %v507_v12 = vld [vmem:[#allocation8 + $0x150] sm:$0xff]  ;;  %2361 = vmatpush.msra.mxu3 %v510_v9  ;;  %v497_v14 = vld [vmem:[#allocation8 + $0x100] sm:$0xff]  ;;  %v494_v17 = vld [vmem:[#allocation8 + $0xe8] sm:$0xff] }
  0x57   : > { %605 = vmatpush.msra.mxu2 %v506_v3  ;;  %v3220_v15 = vld [vmem:[#allocation8 + $0x110] sm:$0xff]  ;;  %522 = vmatpush.msra.mxu0 %v507_v12  ;;  %v501_v16 = vld [vmem:[#allocation8 + $0x120] sm:$0xff]  ;;  %v3223_v18 = vld [vmem:[#allocation8 + $0xf8] sm:$0xff] }
  0x58   : > { %564 = vmatpush.msra.mxu1 %v3209_v7  ;;  %2362 = vmatpush.msra.mxu3 %v507_v12  ;;  %v498_v19 = vld [vmem:[#allocation8 + $0x108] sm:$0xff]  ;;  %v491_v20 = vld [vmem:[#allocation8 + $0xd0] sm:$0xff]  ;;  %v3226_v21 = vld [vmem:[#allocation8 + $0xe0] sm:$0xff] }
  0x59   : > { %606 = vmatpush.msra.mxu2 %v503_v6  ;;  %523 = vmatpush.msra.mxu0 %v504_v13  ;;  %v495_v22 = vld [vmem:[#allocation8 + $0xf0] sm:$0xff]  ;;  %v488_v23 = vld [vmem:[#allocation8 + $0xb8] sm:$0xff]  ;;  %v3229_v24 = vld [vmem:[#allocation8 + $0xc8] sm:$0xff] }
  0x5a   : > { %565 = vmatpush.msra.mxu1 %v3217_v11  ;;  %2363 = vmatpush.msra.mxu3 %v504_v13  ;;  %v492_v25 = vld [vmem:[#allocation8 + $0xd8] sm:$0xff]  ;;  %v485_v26 = vld [vmem:[#allocation8 + $0xa0] sm:$0xff]  ;;  %v3232_v27 = vld [vmem:[#allocation8 + $0xb0] sm:$0xff] }
  0x5b   : > { %607 = vmatpush.msra.mxu2 %v500_v10  ;;  %524 = vmatpush.msra.mxu0 %v501_v16  ;;  %v489_v28 = vld [vmem:[#allocation8 + $0xc0] sm:$0xff]  ;;  %v482_v29 = vld [vmem:[#allocation8 + $0x88] sm:$0xff]  ;;  %v3235_v30 = vld [vmem:[#allocation8 + $0x98] sm:$0xff] }
  0x5c   : > { %566 = vmatpush.msra.mxu1 %v3220_v15  ;;  %2364 = vmatpush.msra.mxu3 %v501_v16  ;;  %v486_v31 = vld [vmem:[#allocation8 + $0xa8] sm:$0xff]  ;;  %v479_v32 = vld [vmem:[#allocation8 + $0x70] sm:$0xff]  ;;  %v3238_v33 = vld [vmem:[#allocation8 + $0x80] sm:$0xff] }
  0x5d   : > { %608 = vmatpush.msra.mxu2 %v497_v14  ;;  %525 = vmatpush.msra.mxu0 %v498_v19  ;;  %v483_v34 = vld [vmem:[#allocation8 + $0x90] sm:$0xff]  ;;  %v476_v35 = vld [vmem:[#allocation8 + $0x58] sm:$0xff]  ;;  %v3241_v36 = vld [vmem:[#allocation8 + $0x68] sm:$0xff] }
  0x5e   : > { %567 = vmatpush.msra.mxu1 %v3223_v18  ;;  %2365 = vmatpush.msra.mxu3 %v498_v19  ;;  %v480_v37 = vld [vmem:[#allocation8 + $0x78] sm:$0xff]  ;;  %v473_v38 = vld [vmem:[#allocation8 + $0x40] sm:$0xff]  ;;  %v3244_v39 = vld [vmem:[#allocation8 + $0x50] sm:$0xff] }
  0x5f   : > { %609 = vmatpush.msra.mxu2 %v494_v17  ;;  %526 = vmatpush.msra.mxu0 %v495_v22  ;;  %v477_v40 = vld [vmem:[#allocation8 + $0x60] sm:$0xff]  ;;  %v470_v41 = vld [vmem:[#allocation8 + $0x28] sm:$0xff]  ;;  %v472_v42 = vld [vmem:[#allocation8 + $0x38] sm:$0xff] }
  0x60   : > { %568 = vmatpush.msra.mxu1 %v3226_v21  ;;  %2366 = vmatpush.msra.mxu3 %v495_v22  ;;  %v474_v43 = vld [vmem:[#allocation8 + $0x48] sm:$0xff]  ;;  %v467_v44 = vld [vmem:[#allocation8 + $0x10] sm:$0xff]  ;;  %v469_v45 = vld [vmem:[#allocation8 + $0x20] sm:$0xff] }
  0x61   : > { %610 = vmatpush.msra.mxu2 %v491_v20  ;;  %527 = vmatpush.msra.mxu0 %v492_v25  ;;  %v457_v46 = vld [vmem:[%s3181_s4] sm:$0xff]  ;;  %v471_v47 = vld [vmem:[#allocation8 + $0x30] sm:$0xff]  ;;  %v466_v48 = vld [vmem:[#allocation8 + $0x8] sm:$0xff] }
  0x62   : > { %569 = vmatpush.msra.mxu1 %v3229_v24  ;;  %2367 = vmatpush.msra.mxu3 %v492_v25  ;;  %v468_v49 = vld [vmem:[#allocation8 + $0x18] sm:$0xff]  ;;  %v465_v50 = vld [vmem:[#allocation8] sm:$0xff]  ;;  %v463_v51 = vld [vmem:[%s3181_s4 + $0x30] sm:$0xff] }
  0x63   : > { %611 = vmatpush.msra.mxu2 %v488_v23  ;;  %528 = vmatpush.msra.mxu0 %v489_v28  ;;  %v458_v52 = vld [vmem:[%s3181_s4 + $0x8] sm:$0xff]  ;;  %v464_v53 = vld [vmem:[%s3181_s4 + $0x38] sm:$0xff]  ;;  %v459_v54 = vld [vmem:[%s3181_s4 + $0x10] sm:$0xff] }
  0x64   : > { %570 = vmatpush.msra.mxu1 %v3232_v27  ;;  %2368 = vmatpush.msra.mxu3 %v489_v28  ;;  %v460_v55 = vld [vmem:[%s3181_s4 + $0x18] sm:$0xff]  ;;  %v461_v56 = vld [vmem:[%s3181_s4 + $0x20] sm:$0xff]  ;;  %v462_v57 = vld [vmem:[%s3181_s4 + $0x28] sm:$0xff] }
  0x65   : > { %612 = vmatpush.msra.mxu2 %v485_v26  ;;  %529 = vmatpush.msra.mxu0 %v486_v31  ;;  %v513_v58 = vld [vmem:[#allocation10] sm:$0x7] }
  0x66   : > { %571 = vmatpush.msra.mxu1 %v3235_v30  ;;  %2369 = vmatpush.msra.mxu3 %v486_v31  ;;  %v3269_v59 = vperm.slane %v513_v58, 1  ;;  %v515_v61 = vperm.slane %v513_v58, 0  ;;  %v3271_v62 = vperm.slane %v513_v58, 2 }
  0x67   : > { %613 = vmatpush.msra.mxu2 %v482_v29  ;;  %530 = vmatpush.msra.mxu0 %v483_v34 }
  0x68   : > { %572 = vmatpush.msra.mxu1 %v3238_v33  ;;  %2370 = vmatpush.msra.mxu3 %v483_v34 }
  0x69   : > { %614 = vmatpush.msra.mxu2 %v479_v32  ;;  %531 = vmatpush.msra.mxu0 %v480_v37 }
  0x6a   : > { %573 = vmatpush.msra.mxu1 %v3241_v36  ;;  %2371 = vmatpush.msra.mxu3 %v480_v37 }
  0x6b   : > { %615 = vmatpush.msra.mxu2 %v476_v35  ;;  %532 = vmatpush.msra.mxu0 %v477_v40 }
  0x6c   : > { %574 = vmatpush.msra.mxu1 %v3244_v39  ;;  %2372 = vmatpush.msra.mxu3 %v477_v40 }
  0x6d   : > { %616 = vmatpush.msra.mxu2 %v473_v38  ;;  %533 = vmatpush.msra.mxu0 %v474_v43 }
  0x6e   : > { %575 = vmatpush.msra.mxu1 %v472_v42  ;;  %2373 = vmatpush.msra.mxu3 %v474_v43 }
  0x6f   : > { %617 = vmatpush.msra.mxu2 %v470_v41  ;;  %534 = vmatpush.msra.mxu0 %v471_v47 }
  0x70   : > { %576 = vmatpush.msra.mxu1 %v469_v45  ;;  %2374 = vmatpush.msra.mxu3 %v471_v47 }
  0x71   : > { %618 = vmatpush.msra.mxu2 %v467_v44  ;;  %535 = vmatpush.msra.mxu0 %v468_v49 }
  0x72   : > { %619 = vmatmul.f32.vlgmr.msra.gmra.mxu2 %v457_v46  ;;  %577 = vmatpush.msra.mxu1 %v466_v48 }
  0x73   : > { %578 = vmatmul.f32.vlgmr.msra.gmra.mxu1 %v457_v46  ;;  %2375 = vmatpush.msra.mxu3 %v468_v49 }
  0x74   : > { %536 = vmatpush.msra.mxu0 %v465_v50 }
  0x75   : > { %537 = vmatmul.f32.vlgmr.msra.gmra.mxu0 %v457_v46  ;;  %2376 = vmatpush.msra.mxu3 %v465_v50 }
  0x76   : > { %555 = vmatmul.f32.vlgmr.msra.gmra.mxu3 %v463_v51 }
  0x77   : > { %2377 = vmatpush.msrb.mxu3 %v3204_v4 }
  0x79   : > { %2378 = vmatpush.msrb.mxu3 %v3207_v5 }
  0x7a   : > { %622 = vmatmul.f32.gmra.mxu2 %v458_v52 }
  0x7b   : > { %581 = vmatmul.f32.gmra.mxu1 %v458_v52  ;;  %2379 = vmatpush.msrb.mxu3 %v3209_v7 }
  0x7d   : > { %2380 = vmatpush.msrb.mxu3 %v3217_v11  ;;  %540 = vmatmul.f32.gmra.mxu0 %v458_v52 }
  0x7e   : > { %558 = vmatmul.f32.gmra.mxu3 %v464_v53 }
  0x7f   : > { %2381 = vmatpush.msrb.mxu3 %v3220_v15 }
  0x81   : > { %2382 = vmatpush.msrb.mxu3 %v3223_v18 }
  0x82   : > { %625 = vmatmul.f32.gmra.mxu2 %v459_v54 }
  0x83   : > { %584 = vmatmul.f32.gmra.mxu1 %v459_v54  ;;  %2383 = vmatpush.msrb.mxu3 %v3226_v21 }
  0x85   : > { %2384 = vmatpush.msrb.mxu3 %v3229_v24  ;;  %543 = vmatmul.f32.gmra.mxu0 %v459_v54 }
  0x87   : > { %2385 = vmatpush.msrb.mxu3 %v3232_v27  ;;  %v668_v27 = vld [vmem:[#allocation2] sm:$0xff]  }
  0x89   : > { %2386 = vmatpush.msrb.mxu3 %v3235_v30 }
  0x8a   : > { %628 = vmatmul.f32.gmra.mxu2 %v460_v55 }
  0x8b   : > { %587 = vmatmul.f32.gmra.mxu1 %v460_v55  ;;  %2387 = vmatpush.msrb.mxu3 %v3238_v33 }
  0x8d   : > { %2388 = vmatpush.msrb.mxu3 %v3241_v36  ;;  %546 = vmatmul.f32.gmra.mxu0 %v460_v55 }
  0x8f   : > { %2389 = vmatpush.msrb.mxu3 %v3244_v39 }
  0x91   : > { %2390 = vmatpush.msrb.mxu3 %v472_v42 }
  0x92   : > { %631 = vmatmul.f32.gmra.mxu2 %v461_v56 }
  0x93   : > { %590 = vmatmul.f32.gmra.mxu1 %v461_v56  ;;  %2391 = vmatpush.msrb.mxu3 %v469_v45 }
  0x95   : > { %2392 = vmatpush.msrb.mxu3 %v466_v48  ;;  %549 = vmatmul.f32.gmra.mxu0 %v461_v56 }
  0x96   : > { %599 = vmatmul.f32.vlgmr.msrb.gmra.mxu3 %v464_v53 }
  0x9a   : > { %634 = vmatmul.f32.gmra.mxu2 %v462_v57 }
  0x9b   : > { %593 = vmatmul.f32.gmra.mxu1 %v462_v57 }
  0x9d   : > { %552 = vmatmul.f32.gmra.mxu0 %v462_v57 }
  0xa2   : > { %637 = vmatmul.f32.gmra.mxu2 %v463_v51 }
  0xa3   : > { %596 = vmatmul.f32.gmra.mxu1 %v463_v51 }
  0xaa   : > { %640 = vmatmul.f32.gmra.mxu2 %v464_v53 }
  0xf0   : > { %v579_v60 = vpop.f32.mrf.mxu1 }
  0xf1   : > { %v580_v63 = vadd.f32 %v579_v60, %v3269_v59 }
  0xf2   : > { %v538_v0 = vpop.f32.mrf.mxu0 }
  0xf3   : > { %645 = vst [vmem:[#allocation4 + $0x8] sm:$0xff] %v580_v63  ;;  %v539_v2 = vadd.f32 %v538_v0, %v515_v61 }
  0xf5   : > { %v620_v1 = vpop.f32.mrf.mxu2  ;;  %644 = vst [vmem:[#allocation4] sm:$0xff] %v539_v2 }
  0xf6   : > { %v621_v3 = vadd.f32 %v620_v1, %v3271_v62 }
  0xf8   : > { %646 = vst [vmem:[#allocation4 + $0x10] sm:$0xff] %v621_v3  ;;  %v582_v4 = vpop.f32.mrf.mxu1 }
  0xf9   : > { %v583_v5 = vadd.f32 %v582_v4, %v3269_v59  ;;  %v556_v7 = vpop.f32.mrf.mxu3 }
  0xfa   : > { %v541_v6 = vpop.f32.mrf.mxu0  ;;  %v557_v11 = vadd.f32 %v556_v7, %v515_v61 }
  0xfb   : > { %648 = vst [vmem:[#allocation4 + $0x20] sm:$0xff] %v583_v5  ;;  %v542_v10 = vadd.f32 %v541_v6, %v515_v61 }
  0xfc   : > { %662 = vst [vmem:[#allocation4 + $0x90] sm:$0xff] %v557_v11 }
  0xfd   : > { %v623_v9 = vpop.f32.mrf.mxu2  ;;  %647 = vst [vmem:[#allocation4 + $0x18] sm:$0xff] %v542_v10 }
  0xfe   : > { %v624_v12 = vadd.f32 %v623_v9, %v3271_v62 }
 0x100   : > { %649 = vst [vmem:[#allocation4 + $0x28] sm:$0xff] %v624_v12  ;;  %v585_v13 = vpop.f32.mrf.mxu1 }
 0x101   : > { %v586_v14 = vadd.f32 %v585_v13, %v3269_v59  ;;  %v559_v16 = vpop.f32.mrf.mxu3 }
 0x102   : > { %v544_v15 = vpop.f32.mrf.mxu0  ;;  %v560_v19 = vadd.f32 %v559_v16, %v515_v61 }
 0x103   : > { %651 = vst [vmem:[#allocation4 + $0x38] sm:$0xff] %v586_v14  ;;  %v545_v18 = vadd.f32 %v544_v15, %v515_v61 }
 0x104   : > { %665 = vst [vmem:[#allocation4 + $0xa8] sm:$0xff] %v560_v19 }
 0x105   : > { %v626_v17 = vpop.f32.mrf.mxu2  ;;  %650 = vst [vmem:[#allocation4 + $0x30] sm:$0xff] %v545_v18 }
 0x106   : > { %v627_v20 = vadd.f32 %v626_v17, %v3271_v62 }
 0x108   : > { %652 = vst [vmem:[#allocation4 + $0x40] sm:$0xff] %v627_v20  ;;  %v588_v21 = vpop.f32.mrf.mxu1 }
 0x109   : > { %v589_v22 = vadd.f32 %v588_v21, %v3269_v59 }
 0x10a   : > { %v547_v23 = vpop.f32.mrf.mxu0 }
 0x10b   : > { %654 = vst [vmem:[#allocation4 + $0x50] sm:$0xff] %v589_v22  ;;  %v548_v25 = vadd.f32 %v547_v23, %v515_v61 }
 0x10d   : > { %v629_v24 = vpop.f32.mrf.mxu2  ;;  %653 = vst [vmem:[#allocation4 + $0x48] sm:$0xff] %v548_v25 }
 0x10e   : > { %v630_v26 = vadd.f32 %v629_v24, %v3271_v62 }
 0x110   : > { %655 = vst [vmem:[#allocation4 + $0x58] sm:$0xff] %v630_v26  ;;  %v591_v28 = vpop.f32.mrf.mxu1 }
 0x111   : > { %v592_v29 = vadd.f32 %v591_v28, %v3269_v59 }
 0x112   : > { %v550_v30 = vpop.f32.mrf.mxu0 }
 0x113   : > { %657 = vst [vmem:[#allocation4 + $0x68] sm:$0xff] %v592_v29  ;;  %v551_v32 = vadd.f32 %v550_v30, %v515_v61 }
 0x115   : > { %v632_v31 = vpop.f32.mrf.mxu2  ;;  %656 = vst [vmem:[#allocation4 + $0x60] sm:$0xff] %v551_v32 }
 0x116   : > { %v633_v33 = vadd.f32 %v632_v31, %v3271_v62 }
 0x118   : > { %658 = vst [vmem:[#allocation4 + $0x70] sm:$0xff] %v633_v33  ;;  %v594_v34 = vpop.f32.mrf.mxu1 }
 0x119   : > { %v595_v35 = vadd.f32 %v594_v34, %v3269_v59  ;;  %v600_v36 = vpop.f32.mrf.mxu3 }
 0x11a   : > { %v601_v37 = vadd.f32 %v600_v36, %v3269_v59  ;;  %v553_v38 = vpop.f32.mrf.mxu0 }
 0x11b   : > { %660 = vst [vmem:[#allocation4 + $0x80] sm:$0xff] %v595_v35  ;;  %v554_v40 = vadd.f32 %v553_v38, %v515_v61 }
 0x11c   : > { %666 = vst [vmem:[#allocation4 + $0xb0] sm:$0xff] %v601_v37 }
 0x11d   : > { %v635_v39 = vpop.f32.mrf.mxu2  ;;  %659 = vst [vmem:[#allocation4 + $0x78] sm:$0xff] %v554_v40 }
 0x11e   : > { %v636_v41 = vadd.f32 %v635_v39, %v3271_v62 }
 0x120   : > { %661 = vst [vmem:[#allocation4 + $0x88] sm:$0xff] %v636_v41  ;;  %v597_v42 = vpop.f32.mrf.mxu1 }
 0x121   : > { %v598_v43 = vadd.f32 %v597_v42, %v3269_v59 }
 0x123   : > { %663 = vst [vmem:[#allocation4 + $0x98] sm:$0xff] %v598_v43 }
 0x125   : > { %v638_v44 = vpop.f32.mrf.mxu2 }
 0x126   : > { %v639_v45 = vadd.f32 %v638_v44, %v3271_v62 }
 0x128   : > { %664 = vst [vmem:[#allocation4 + $0xa0] sm:$0xff] %v639_v45 }
 0x12d   : > { %v641_v46 = vpop.f32.mrf.mxu2 }
 0x12e   : > { %v642_v47 = vadd.f32 %v641_v46, %v3271_v62 }
 0x130   : > { %667 = vst [vmem:[#allocation4 + $0xb8] sm:$0xff] %v642_v47 }
 0x131 LB: >> { %v3299_v48 = vld [vmem:[#allocation11 + $0x168] sm:$0xff]  ;;  %v3301_v49 = vld [vmem:[#allocation11 + $0x170] sm:$0xff]  ;;  %v3307_v51 = vld [vmem:[#allocation11 + $0x158] sm:$0xff]  ;;  %s3575_s15 = sshll.u32 %s2963_s27, 5  ;;  %v3579_v34 = vperm.slane %v3215_v8, 0  ;;  %v3582_v35 = vperm.slane %v3215_v8, 1  ;;  %s2963_s27 = sphi %s3291_s27, %s674_s27   ;;  %v2959_v27 = vphi %v668_v27, %v4185_v27  }
 0x132   : >> { %v3303_v50 = vld [vmem:[#allocation11 + $0x150] sm:$0xff]  ;;  %740 = vmatpush.msra.mxu0 %v3299_v48  ;;  %760 = vmatpush.msra.mxu1 %v3301_v49  ;;  %v3309_v52 = vld [vmem:[#allocation11 + $0x138] sm:$0xff]  ;;  %v3311_v53 = vld [vmem:[#allocation11 + $0x140] sm:$0xff]  ;;  %s677_s18 = sshra.s32 %s3575_s15, 3  ;;  %s3599_s23 = scalar_lea.vmem [#allocation3], %s3575_s15 }
 0x133   : >> { %906 = vmatpush.msra.mxu3 %v3299_v48  ;;  %v3316_v54 = vld [vmem:[#allocation11 + $0x120] sm:$0xff]  ;;  %v3318_v55 = vld [vmem:[#allocation11 + $0x128] sm:$0xff]  ;;  %v3325_v57 = vld [vmem:[#allocation11 + $0x110] sm:$0xff]  ;;  %s2352_s21 = smul.u32 24, %s677_s18  ;;  %s849_s13 = sadd.s32 8, %s3575_s15 }
 0x134   : >> { %741 = vmatpush.msra.mxu0 %v3303_v50  ;;  %761 = vmatpush.msra.mxu1 %v3307_v51  ;;  %v3323_v56 = vld [vmem:[#allocation11 + $0x108] sm:$0xff]  ;;  %v3330_v58 = vld [vmem:[#allocation11 + $0xf0] sm:$0xff]  ;;  %v3332_v59 = vld [vmem:[#allocation11 + $0xf8] sm:$0xff]  ;;  %s850_s24 = sshra.s32 %s849_s13, 3  ;;  %s1015_s4 = sadd.s32 16, %s3575_s15 }
 0x135   : >> { %907 = vmatpush.msra.mxu3 %v3303_v50  ;;  %v3334_v60 = vld [vmem:[#allocation11 + $0x178] sm:$0xff]  ;;  %v3339_v61 = vld [vmem:[#allocation11 + $0x160] sm:$0xff]  ;;  %v3349_v0 = vld [vmem:[#allocation11 + $0x148] sm:$0xff]  ;;  %s3584_s20 = scalar_lea.vmem [#allocation4], %s2352_s21  ;;  %s2353_s26 = smul.u32 24, %s850_s24 }
 0x136   : >> { %742 = vmatpush.msra.mxu0 %v3309_v52  ;;  %762 = vmatpush.msra.mxu1 %v3311_v53  ;;  %v3341_v62 = vld [vmem:[#allocation11 + $0xd8] sm:$0xff]  ;;  %v3343_v63 = vld [vmem:[#allocation11 + $0xe0] sm:$0xff]  ;;  %v3353_v2 = vld [vmem:[#allocation11 + $0xc8] sm:$0xff]  ;;  %s1016_s1 = sshra.s32 %s1015_s4, 3  ;;  %s1181_s18 = sadd.s32 24, %s3575_s15 }
 0x137   : >> { %908 = vmatpush.msra.mxu3 %v3309_v52  ;;  %780 = vmatpush.msra.mxu2 %v3334_v60  ;;  %v3351_v1 = vld [vmem:[#allocation11 + $0xc0] sm:$0xff]  ;;  %v3359_v3 = vld [vmem:[#allocation11 + $0x130] sm:$0xff]  ;;  %v3361_v4 = vld [vmem:[#allocation11 + $0xa8] sm:$0xff]  ;;  %s3623_s3 = scalar_lea.vmem [#allocation4], %s2353_s26  ;;  %s2354_s17 = smul.u32 24, %s1016_s1 }
 0x138   : >> { %743 = vmatpush.msra.mxu0 %v3316_v54  ;;  %763 = vmatpush.msra.mxu1 %v3318_v55  ;;  %v3363_v5 = vld [vmem:[#allocation11 + $0xb0] sm:$0xff]  ;;  %v3369_v6 = vld [vmem:[#allocation11 + $0x118] sm:$0xff]  ;;  %v3379_v10 = vld [vmem:[#allocation11 + $0x100] sm:$0xff]  ;;  %s1182_s21 = sshra.s32 %s1181_s18, 3  ;;  %s674_s27 = sadd.s32 1, %s2963_s27  }
 0x139   : >> { %909 = vmatpush.msra.mxu3 %v3316_v54  ;;  %781 = vmatpush.msra.mxu2 %v3339_v61  ;;  %v3371_v7 = vld [vmem:[#allocation11 + $0x90] sm:$0xff]  ;;  %v3373_v9 = vld [vmem:[#allocation11 + $0x98] sm:$0xff]  ;;  %v3383_v12 = vld [vmem:[#allocation11 + $0x80] sm:$0xff]  ;;  %s3640_s29 = scalar_lea.vmem [#allocation4], %s2354_s17  ;;  %p671_p1 = scmp.ge.s32.totalorder %s674_s27, 2  }
 0x13a   : >> { %744 = vmatpush.msra.mxu0 %v3323_v56  ;;  %764 = vmatpush.msra.mxu1 %v3325_v57  ;;  %v3381_v11 = vld [vmem:[#allocation11 + $0x78] sm:$0xff]  ;;  %v3389_v13 = vld [vmem:[#allocation11 + $0xe8] sm:$0xff]  ;;  %v3391_v14 = vld [vmem:[#allocation11 + $0x60] sm:$0xff] }
 0x13b   : >> { %910 = vmatpush.msra.mxu3 %v3323_v56  ;;  %782 = vmatpush.msra.mxu2 %v3349_v0  ;;  %v3393_v15 = vld [vmem:[#allocation11 + $0x68] sm:$0xff]  ;;  %v3399_v16 = vld [vmem:[#allocation11 + $0xd0] sm:$0xff]  ;;  %v3409_v19 = vld [vmem:[#allocation11 + $0xb8] sm:$0xff] }
 0x13c   : >> { %745 = vmatpush.msra.mxu0 %v3330_v58  ;;  %765 = vmatpush.msra.mxu1 %v3332_v59  ;;  %v3401_v17 = vld [vmem:[#allocation11 + $0x48] sm:$0xff]  ;;  %v3403_v18 = vld [vmem:[#allocation11 + $0x50] sm:$0xff]  ;;  %v3413_v21 = vld [vmem:[#allocation11 + $0x38] sm:$0xff] }
 0x13d   : >> { %911 = vmatpush.msra.mxu3 %v3330_v58  ;;  %783 = vmatpush.msra.mxu2 %v3359_v3  ;;  %v3411_v20 = vld [vmem:[#allocation11 + $0x30] sm:$0xff]  ;;  %v3419_v22 = vld [vmem:[#allocation11 + $0xa0] sm:$0xff]  ;;  %v3421_v23 = vld [vmem:[#allocation11 + $0x18] sm:$0xff] }
 0x13e   : >> { %746 = vmatpush.msra.mxu0 %v3341_v62  ;;  %766 = vmatpush.msra.mxu1 %v3343_v63  ;;  %v3423_v24 = vld [vmem:[#allocation11 + $0x20] sm:$0xff]  ;;  %v3429_v25 = vld [vmem:[#allocation11 + $0x88] sm:$0xff]  ;;  %v3440_v29 = vld [vmem:[#allocation11 + $0x70] sm:$0xff] }
 0x13f   : >> { %912 = vmatpush.msra.mxu3 %v3341_v62  ;;  %784 = vmatpush.msra.mxu2 %v3369_v6  ;;  %v3431_v26 = vld [vmem:[#allocation11] sm:$0xff]  ;;  %v3433_v28 = vld [vmem:[#allocation11 + $0x8] sm:$0xff]  ;;  %v3447_v30 = vld [vmem:[#allocation11 + $0x58] sm:$0xff] }
 0x140   : >> { %747 = vmatpush.msra.mxu0 %v3351_v1  ;;  %767 = vmatpush.msra.mxu1 %v3353_v2  ;;  %v3451_v31 = vld [vmem:[#allocation11 + $0x40] sm:$0xff]  ;;  %v3457_v32 = vld [vmem:[#allocation11 + $0x28] sm:$0xff]  ;;  %v3463_v33 = vld [vmem:[#allocation11 + $0x10] sm:$0xff] }
 0x141   : >> { %913 = vmatpush.msra.mxu3 %v3351_v1  ;;  %785 = vmatpush.msra.mxu2 %v3379_v10  ;;  %v682_v36 = vld [vmem:[%s3584_s20] sm:$0xff]  ;;  %v683_v38 = vld [vmem:[%s3584_s20 + $0x8] sm:$0xff] }
 0x142   : >> { %748 = vmatpush.msra.mxu0 %v3361_v4  ;;  %768 = vmatpush.msra.mxu1 %v3363_v5 }
 0x143   : >> { %914 = vmatpush.msra.mxu3 %v3361_v4  ;;  %786 = vmatpush.msra.mxu2 %v3389_v13 }
 0x144   : >> { %749 = vmatpush.msra.mxu0 %v3371_v7  ;;  %769 = vmatpush.msra.mxu1 %v3373_v9 }
 0x145   : >> { %915 = vmatpush.msra.mxu3 %v3371_v7  ;;  %787 = vmatpush.msra.mxu2 %v3399_v16 }
 0x146   : >> { %750 = vmatpush.msra.mxu0 %v3381_v11  ;;  %770 = vmatpush.msra.mxu1 %v3383_v12 }
 0x147   : >> { %916 = vmatpush.msra.mxu3 %v3381_v11  ;;  %788 = vmatpush.msra.mxu2 %v3409_v19 }
 0x148   : >> { %751 = vmatpush.msra.mxu0 %v3391_v14  ;;  %771 = vmatpush.msra.mxu1 %v3393_v15 }
 0x149   : >> { %917 = vmatpush.msra.mxu3 %v3391_v14  ;;  %789 = vmatpush.msra.mxu2 %v3419_v22 }
 0x14a   : >> { %752 = vmatpush.msra.mxu0 %v3401_v17  ;;  %772 = vmatpush.msra.mxu1 %v3403_v18 }
 0x14b   : >> { %918 = vmatpush.msra.mxu3 %v3401_v17  ;;  %790 = vmatpush.msra.mxu2 %v3429_v25 }
 0x14c   : >> { %753 = vmatpush.msra.mxu0 %v3411_v20  ;;  %773 = vmatpush.msra.mxu1 %v3413_v21 }
 0x14d   : >> { %919 = vmatpush.msra.mxu3 %v3411_v20  ;;  %791 = vmatpush.msra.mxu2 %v3440_v29 }
 0x14e   : >> { %754 = vmatpush.msra.mxu0 %v3421_v23  ;;  %774 = vmatpush.msra.mxu1 %v3423_v24 }
 0x14f   : >> { %920 = vmatpush.msra.mxu3 %v3421_v23  ;;  %792 = vmatpush.msra.mxu2 %v3447_v30 }
 0x150   : >> { %755 = vmatpush.msra.mxu0 %v3431_v26  ;;  %775 = vmatpush.msra.mxu1 %v3433_v28 }
 0x151   : >> { %756 = vmatmul.f32.vlgmr.msra.gmra.mxu0 %v2959_v27  ;;  %776 = vmatmul.f32.vlgmr.msra.gmra.mxu1 %v2959_v27 }
 0x152   : >> { %926 = vmatpush.msrb.mxu0 %v3301_v49  ;;  %946 = vmatpush.msrb.mxu1 %v3334_v60 }
 0x153   : >> { %921 = vmatpush.msra.mxu3 %v3431_v26  ;;  %793 = vmatpush.msra.mxu2 %v3451_v31 }
 0x154   : >> { %927 = vmatpush.msrb.mxu0 %v3307_v51  ;;  %947 = vmatpush.msrb.mxu1 %v3339_v61 }
 0x155   : >> { %1092 = vmatpush.msrb.mxu3 %v3301_v49  ;;  %794 = vmatpush.msra.mxu2 %v3457_v32 }
 0x156   : >> { %928 = vmatpush.msrb.mxu0 %v3311_v53  ;;  %948 = vmatpush.msrb.mxu1 %v3349_v0 }
 0x157   : >> { %1093 = vmatpush.msrb.mxu3 %v3307_v51  ;;  %795 = vmatpush.msra.mxu2 %v3463_v33 }
 0x158   : >> { %929 = vmatpush.msrb.mxu0 %v3318_v55  ;;  %949 = vmatpush.msrb.mxu1 %v3359_v3 }
 0x159   : >> { %1094 = vmatpush.msrb.mxu3 %v3311_v53  ;;  %796 = vmatmul.f32.vlgmr.msra.gmra.mxu2 %v2959_v27 }
 0x15a   : >> { %930 = vmatpush.msrb.mxu0 %v3325_v57  ;;  %950 = vmatpush.msrb.mxu1 %v3369_v6 }
 0x15b   : >> { %1072 = vmatpush.msrb.mxu2 %v3299_v48  ;;  %1095 = vmatpush.msrb.mxu3 %v3318_v55 }
 0x15c   : >> { %931 = vmatpush.msrb.mxu0 %v3332_v59  ;;  %951 = vmatpush.msrb.mxu1 %v3379_v10 }
 0x15d   : >> { %1073 = vmatpush.msrb.mxu2 %v3303_v50  ;;  %1096 = vmatpush.msrb.mxu3 %v3325_v57 }
 0x15e   : >> { %932 = vmatpush.msrb.mxu0 %v3343_v63  ;;  %952 = vmatpush.msrb.mxu1 %v3389_v13 }
 0x15f   : >> { %1074 = vmatpush.msrb.mxu2 %v3309_v52  ;;  %1097 = vmatpush.msrb.mxu3 %v3332_v59 }
 0x160   : >> { %933 = vmatpush.msrb.mxu0 %v3353_v2  ;;  %953 = vmatpush.msrb.mxu1 %v3399_v16 }
 0x161   : >> { %1075 = vmatpush.msrb.mxu2 %v3316_v54  ;;  %1098 = vmatpush.msrb.mxu3 %v3343_v63 }
 0x162   : >> { %934 = vmatpush.msrb.mxu0 %v3363_v5  ;;  %954 = vmatpush.msrb.mxu1 %v3409_v19 }
 0x163   : >> { %1076 = vmatpush.msrb.mxu2 %v3323_v56  ;;  %1099 = vmatpush.msrb.mxu3 %v3353_v2 }
 0x164   : >> { %935 = vmatpush.msrb.mxu0 %v3373_v9  ;;  %955 = vmatpush.msrb.mxu1 %v3419_v22 }
 0x165   : >> { %1077 = vmatpush.msrb.mxu2 %v3330_v58  ;;  %1100 = vmatpush.msrb.mxu3 %v3363_v5 }
 0x166   : >> { %936 = vmatpush.msrb.mxu0 %v3383_v12  ;;  %956 = vmatpush.msrb.mxu1 %v3429_v25 }
 0x167   : >> { %1078 = vmatpush.msrb.mxu2 %v3341_v62  ;;  %1101 = vmatpush.msrb.mxu3 %v3373_v9 }
 0x168   : >> { %937 = vmatpush.msrb.mxu0 %v3393_v15  ;;  %957 = vmatpush.msrb.mxu1 %v3440_v29 }
 0x169   : >> { %1079 = vmatpush.msrb.mxu2 %v3351_v1  ;;  %1102 = vmatpush.msrb.mxu3 %v3383_v12 }
 0x16a   : >> { %938 = vmatpush.msrb.mxu0 %v3403_v18  ;;  %958 = vmatpush.msrb.mxu1 %v3447_v30 }
 0x16b   : >> { %1080 = vmatpush.msrb.mxu2 %v3361_v4  ;;  %1103 = vmatpush.msrb.mxu3 %v3393_v15 }
 0x16c   : >> { %939 = vmatpush.msrb.mxu0 %v3413_v21  ;;  %959 = vmatpush.msrb.mxu1 %v3451_v31 }
 0x16d   : >> { %1081 = vmatpush.msrb.mxu2 %v3371_v7  ;;  %1104 = vmatpush.msrb.mxu3 %v3403_v18 }
 0x16e   : >> { %940 = vmatpush.msrb.mxu0 %v3423_v24  ;;  %960 = vmatpush.msrb.mxu1 %v3457_v32 }
 0x16f   : >> { %1082 = vmatpush.msrb.mxu2 %v3381_v11  ;;  %1105 = vmatpush.msrb.mxu3 %v3413_v21 }
 0x170   : >> { %941 = vmatpush.msrb.mxu0 %v3433_v28  ;;  %961 = vmatpush.msrb.mxu1 %v3463_v33 }
 0x171   : >> { %1083 = vmatpush.msrb.mxu2 %v3391_v14  ;;  %1106 = vmatpush.msrb.mxu3 %v3423_v24 }
 0x172   : >> { %1112 = vmatpush.msra.mxu0 %v3334_v60  ;;  %1238 = vmatpush.msra.mxu1 %v3299_v48 }
 0x173   : >> { %1084 = vmatpush.msrb.mxu2 %v3401_v17  ;;  %1107 = vmatpush.msrb.mxu3 %v3433_v28 }
 0x174   : >> { %1113 = vmatpush.msra.mxu0 %v3339_v61  ;;  %1239 = vmatpush.msra.mxu1 %v3303_v50 }
 0x175   : >> { %1085 = vmatpush.msrb.mxu2 %v3411_v20 }
 0x176   : >> { %1114 = vmatpush.msra.mxu0 %v3349_v0  ;;  %1240 = vmatpush.msra.mxu1 %v3309_v52 }
 0x177   : >> { %1086 = vmatpush.msrb.mxu2 %v3421_v23 }
 0x178   : >> { %1115 = vmatpush.msra.mxu0 %v3359_v3  ;;  %1241 = vmatpush.msra.mxu1 %v3316_v54  ;;  %v3591_v54 = vperm.slane %v3215_v8, 2  ;;  %v1402_v8 = vld [vmem:[#allocation16 + $0x168] sm:$0xff] (%p671_p1) }
 0x179   : >> { %1087 = vmatpush.msrb.mxu2 %v3431_v26 }
 0x17a   : >> { %1116 = vmatpush.msra.mxu0 %v3369_v6  ;;  %1242 = vmatpush.msra.mxu1 %v3323_v56 }
 0x17b   : >> { %1258 = vmatpush.msra.mxu2 %v3301_v49 }
 0x17c   : >> { %1117 = vmatpush.msra.mxu0 %v3379_v10  ;;  %1243 = vmatpush.msra.mxu1 %v3330_v58 }
 0x17d   : >> { %1259 = vmatpush.msra.mxu2 %v3307_v51 }
 0x17e   : >> { %1118 = vmatpush.msra.mxu0 %v3389_v13  ;;  %1244 = vmatpush.msra.mxu1 %v3341_v62 }
 0x17f   : >> { %1260 = vmatpush.msra.mxu2 %v3311_v53 }
 0x180   : >> { %1119 = vmatpush.msra.mxu0 %v3399_v16  ;;  %1245 = vmatpush.msra.mxu1 %v3351_v1 }
 0x181   : >> { %1261 = vmatpush.msra.mxu2 %v3318_v55 }
 0x182   : >> { %1120 = vmatpush.msra.mxu0 %v3409_v19  ;;  %1246 = vmatpush.msra.mxu1 %v3361_v4 }
 0x183   : >> { %1262 = vmatpush.msra.mxu2 %v3325_v57 }
 0x184   : >> { %1121 = vmatpush.msra.mxu0 %v3419_v22  ;;  %1247 = vmatpush.msra.mxu1 %v3371_v7  ;;  %v684_v7 = vld [vmem:[%s3584_s20 + $0x10] sm:$0xff]  ;;  %s2355_s20 = smul.u32 24, %s1182_s21 }
 0x185   : >> { %1263 = vmatpush.msra.mxu2 %v3332_v59 }
 0x186   : >> { %1122 = vmatpush.msra.mxu0 %v3429_v25  ;;  %1248 = vmatpush.msra.mxu1 %v3381_v11  ;;  %s3657_s13 = scalar_lea.vmem [#allocation4], %s2355_s20 }
 0x187   : >> { %1264 = vmatpush.msra.mxu2 %v3343_v63 }
 0x188   : >> { %1123 = vmatpush.msra.mxu0 %v3440_v29  ;;  %1249 = vmatpush.msra.mxu1 %v3391_v14 }
 0x189   : >> { %1265 = vmatpush.msra.mxu2 %v3353_v2 }
 0x18a   : >> { %1124 = vmatpush.msra.mxu0 %v3447_v30  ;;  %1250 = vmatpush.msra.mxu1 %v3401_v17 }
 0x18b   : >> { %1266 = vmatpush.msra.mxu2 %v3363_v5 }
 0x18c   : >> { %1125 = vmatpush.msra.mxu0 %v3451_v31  ;;  %1251 = vmatpush.msra.mxu1 %v3411_v20 }
 0x18d   : >> { %1267 = vmatpush.msra.mxu2 %v3373_v9 }
 0x18e   : >> { %1126 = vmatpush.msra.mxu0 %v3457_v32  ;;  %1252 = vmatpush.msra.mxu1 %v3421_v23 }
 0x18f   : >> { %1268 = vmatpush.msra.mxu2 %v3383_v12 }
 0x190   : >> { %1127 = vmatpush.msra.mxu0 %v3463_v33  ;;  %1253 = vmatpush.msra.mxu1 %v3431_v26 }
 0x191   : >> { %1269 = vmatpush.msra.mxu2 %v3393_v15 }
 0x193   : >> { %1270 = vmatpush.msra.mxu2 %v3403_v18 }
 0x195   : >> { %1271 = vmatpush.msra.mxu2 %v3413_v21 }
 0x197   : >> { %1272 = vmatpush.msra.mxu2 %v3423_v24 }
 0x199   : >> { %1273 = vmatpush.msra.mxu2 %v3433_v28 }
 0x1ce   : >> { %v757_v37 = vpop.f32.mrf.mxu0  ;;  %v777_v39 = vpop.f32.mrf.mxu1 }
 0x1cf   : >> { %v758_v40 = vadd.f32 %v757_v37, %v3579_v34  ;;  %v778_v41 = vadd.f32 %v777_v39, %v3582_v35 }
 0x1d1   : >> { %v800_v42 = vadd.f32 %v758_v40, %v682_v36  ;;  %v801_v43 = vadd.f32 %v778_v41, %v683_v38 }
 0x1d3   : >> { %v2313_v44 = vmul.f32 -1.442695, %v800_v42  ;;  %v2314_v45 = vmul.f32 -1.442695, %v801_v43 }
 0x1d5   : >> { %2571 = vpow2.f32 %v2313_v44 }
 0x1d6   : >> { %2573 = vpow2.f32 %v2314_v45 }
 0x1db   : >> { %v2572_v46 = vpop.eup %2571 }
 0x1dc   : >> { %v2574_v47 = vpop.eup %2573  ;;  %v808_v48 = vadd.f32 1.0, %v2572_v46  ;;  %v797_v57 = vpop.f32.mrf.mxu2 }
 0x1dd   : >> { %v809_v49 = vadd.f32 1.0, %v2574_v47  ;;  %v798_v1 = vadd.f32 %v797_v57, %v3591_v54 }
 0x1de   : >> { %2575 = vrcp.f32 %v808_v48  ;;  %v821_v58 = vand.u32 2147483648, %v808_v48  ;;  %v819_v62 = vand.u32 2147483647, %v808_v48  ;;  %vm815_vm1 = vweird.f32 %v808_v48 }
 0x1df   : >> { %2577 = vrcp.f32 %v809_v49  ;;  %vm830_vm4 = vweird.f32 %v809_v49  ;;  %v836_v12 = vand.u32 2147483648, %v809_v49  ;;  %v834_v15 = vand.u32 2147483647, %v809_v49 }
 0x1e0   : >> { %v822_v4 = vor.u32 1.1754944e-38, %v821_v58  ;;  %vm820_vm3 = vcmp.eq.f32.partialorder %v819_v62, 8.507059e+37 }
 0x1e1   : >> { %v837_v20 = vor.u32 1.1754944e-38, %v836_v12  ;;  %vm835_vm7 = vcmp.eq.f32.partialorder %v834_v15, 8.507059e+37 }
 0x1e4   : >> { %v2576_v50 = vpop.eup %2575 }
 0x1e5   : >> { %v2578_v51 = vpop.eup %2577  ;;  %v811_v52 = vmul.f32 %v2576_v50, %v808_v48  ;;  %vm816_vm0 = vweird.f32 %v2576_v50 }
 0x1e6   : >> { %v826_v53 = vmul.f32 %v2578_v51, %v809_v49  ;;  %vm817_vm2 = vmor %vm815_vm1, %vm816_vm0  ;;  %vm831_vm5 = vweird.f32 %v2578_v51  ;;  %v857_v49 = vld [vmem:[%s3623_s3 + $0x10] sm:$0xff] }
 0x1e7   : >> { %v812_v55 = vsub.f32 1.0, %v811_v52  ;;  %vm832_vm6 = vmor %vm830_vm4, %vm831_vm5 }
 0x1e8   : >> { %v827_v56 = vsub.f32 1.0, %v826_v53 }
 0x1e9   : >> { %v813_v59 = vmul.f32 %v2576_v50, %v812_v55 }
 0x1ea   : >> { %v828_v63 = vmul.f32 %v2578_v51, %v827_v56 }
 0x1eb   : >> { %v814_v2 = vadd.f32 %v2576_v50, %v813_v59 }
 0x1ec   : >> { %v829_v11 = vadd.f32 %v2578_v51, %v828_v63 }
 0x1ed   : >> { %v818_v5 = vsel %vm817_vm2, %v2576_v50, %v814_v2 }
 0x1ee   : >> { %v823_v9 = vsel %vm820_vm3, %v822_v4, %v818_v5  ;;  %v833_v18 = vsel %vm832_vm6, %v2578_v51, %v829_v11  ;;  %v1021_v5 = vld [vmem:[%s3640_s29] sm:$0xff] }
 0x1ef   : >> { %v840_v14 = vmul.f32 %v823_v9, %v798_v1  ;;  %v838_v21 = vsel %vm835_vm7, %v837_v20, %v833_v18  ;;  %v1022_v9 = vld [vmem:[%s3640_s29 + $0x8] sm:$0xff] }
 0x1f0   : >> { %v843_v23 = vsub.f32 1.0, %v838_v21  ;;  %v845_v28 = vmul.f32 %v2959_v27, %v838_v21  ;;  %v856_v27 = vld [vmem:[%s3623_s3 + $0x8] sm:$0xff] }
 0x1f1   : >> { %v841_v17 = vadd.f32 %v840_v14, %v684_v7 }
 0x1f3   : >> { %2579 = vtanh.f32 %v841_v17 }
 0x1f9   : >> { %v2580_v24 = vpop.eup %2579 }
 0x1fa   : >> { %v844_v26 = vmul.f32 %v2580_v24, %v843_v23 }
 0x1fc   : >> { %v3596_v36 = vadd.f32 %v845_v28, %v844_v26 }
 0x1fe   : >> { %848 = vst [vmem:[%s3599_s23] sm:$0xff] %v3596_v36  ;;  %922 = vmatmul.f32.vlgmr.msra.gmra.mxu3 %v3596_v36  ;;  %942 = vmatmul.f32.vlgmr.msrb.gmra.mxu0 %v3596_v36 }
 0x1ff   : >> { %962 = vmatmul.f32.vlgmr.msrb.gmra.mxu1 %v3596_v36  ;;  %1278 = vmatpush.msra.mxu3 %v3334_v60 }
 0x201   : >> { %1279 = vmatpush.msra.mxu3 %v3339_v61 }
 0x203   : >> { %1280 = vmatpush.msra.mxu3 %v3349_v0 }
 0x205   : >> { %1281 = vmatpush.msra.mxu3 %v3359_v3 }
 0x207   : >> { %1282 = vmatpush.msra.mxu3 %v3369_v6  ;;  %v855_v6 = vld [vmem:[%s3623_s3] sm:$0xff] }
 0x209   : >> { %1283 = vmatpush.msra.mxu3 %v3379_v10 }
 0x20b   : >> { %1284 = vmatpush.msra.mxu3 %v3389_v13 }
 0x20d   : >> { %1285 = vmatpush.msra.mxu3 %v3399_v16 }
 0x20f   : >> { %1286 = vmatpush.msra.mxu3 %v3409_v19 }
 0x211   : >> { %1287 = vmatpush.msra.mxu3 %v3419_v22 }
 0x213   : >> { %1288 = vmatpush.msra.mxu3 %v3429_v25 }
 0x215   : >> { %1289 = vmatpush.msra.mxu3 %v3440_v29 }
 0x217   : >> { %1290 = vmatpush.msra.mxu3 %v3447_v30 }
 0x219   : >> { %1291 = vmatpush.msra.mxu3 %v3451_v31 }
 0x21b   : >> { %1292 = vmatpush.msra.mxu3 %v3457_v32 }
 0x21d   : >> { %1293 = vmatpush.msra.mxu3 %v3463_v33 }
 0x27b   : >> { %v943_v60 = vpop.f32.mrf.mxu0 }
 0x27c   : >> { %v944_v61 = vadd.f32 %v943_v60, %v3582_v35  ;;  %v963_v44 = vpop.f32.mrf.mxu1 }
 0x27d   : >> { %v964_v47 = vadd.f32 %v963_v44, %v3591_v54 }
 0x27e   : >> { %v967_v0 = vadd.f32 %v944_v61, %v856_v27 }
 0x280   : >> { %v2317_v3 = vmul.f32 -1.442695, %v967_v0 }
 0x281   : >> { %v923_v10 = vpop.f32.mrf.mxu3 }
 0x282   : >> { %2581 = vpow2.f32 %v2317_v3  ;;  %v924_v13 = vadd.f32 %v923_v10, %v3579_v34 }
 0x284   : >> { %v966_v16 = vadd.f32 %v924_v13, %v855_v6 }
 0x286   : >> { %v2316_v19 = vmul.f32 -1.442695, %v966_v16 }
 0x288   : >> { %v2582_v22 = vpop.eup %2581  ;;  %2583 = vpow2.f32 %v2316_v19 }
 0x289   : >> { %v975_v25 = vadd.f32 1.0, %v2582_v22 }
 0x28b   : >> { %2585 = vrcp.f32 %v975_v25  ;;  %v1002_v52 = vand.u32 2147483648, %v975_v25  ;;  %vm996_vm13 = vweird.f32 %v975_v25  ;;  %v1000_v55 = vand.u32 2147483647, %v975_v25 }
 0x28d   : >> { %v1003_v58 = vor.u32 1.1754944e-38, %v1002_v52  ;;  %vm1001_vm15 = vcmp.eq.f32.partialorder %v1000_v55, 8.507059e+37 }
 0x28e   : >> { %v2584_v29 = vpop.eup %2583 }
 0x28f   : >> { %v974_v30 = vadd.f32 1.0, %v2584_v29 }
 0x291   : >> { %2587 = vrcp.f32 %v974_v30  ;;  %v2586_v31 = vpop.eup %2585  ;;  %v987_v40 = vand.u32 2147483648, %v974_v30  ;;  %v985_v42 = vand.u32 2147483647, %v974_v30  ;;  %vm981_vm9 = vweird.f32 %v974_v30 }
 0x292   : >> { %v992_v32 = vmul.f32 %v2586_v31, %v975_v25  ;;  %vm997_vm12 = vweird.f32 %v2586_v31 }
 0x293   : >> { %v988_v46 = vor.u32 1.1754944e-38, %v987_v40  ;;  %vm986_vm11 = vcmp.eq.f32.partialorder %v985_v42, 8.507059e+37  ;;  %vm998_vm14 = vmor %vm996_vm13, %vm997_vm12 }
 0x294   : >> { %v993_v38 = vsub.f32 1.0, %v992_v32 }
 0x296   : >> { %v994_v43 = vmul.f32 %v2586_v31, %v993_v38 }
 0x297   : >> { %v2588_v33 = vpop.eup %2587 }
 0x298   : >> { %v977_v37 = vmul.f32 %v2588_v33, %v974_v30  ;;  %vm982_vm8 = vweird.f32 %v2588_v33  ;;  %v995_v51 = vadd.f32 %v2586_v31, %v994_v43  ;;  %v1023_v30 = vld [vmem:[%s3640_s29 + $0x10] sm:$0xff] }
 0x299   : >> { %vm983_vm10 = vmor %vm981_vm9, %vm982_vm8 }
 0x29a   : >> { %v978_v39 = vsub.f32 1.0, %v977_v37  ;;  %v999_v57 = vsel %vm998_vm14, %v2586_v31, %v995_v51 }
 0x29b   : >> { %v1004_v59 = vsel %vm1001_vm15, %v1003_v58, %v999_v57 }
 0x29c   : >> { %v979_v41 = vmul.f32 %v2588_v33, %v978_v39  ;;  %v1009_v62 = vsub.f32 1.0, %v1004_v59  ;;  %v1011_v2 = vmul.f32 %v1004_v59, %v3596_v36 }
 0x29e   : >> { %v980_v45 = vadd.f32 %v2588_v33, %v979_v41 }
 0x2a0   : >> { %v984_v48 = vsel %vm983_vm10, %v2588_v33, %v980_v45 }
 0x2a1   : >> { %v989_v50 = vsel %vm986_vm11, %v988_v46, %v984_v48  ;;  %v1187_v48 = vld [vmem:[%s3657_s13] sm:$0xff] }
 0x2a2   : >> { %v1006_v53 = vmul.f32 %v989_v50, %v964_v47 }
 0x2a4   : >> { %v1007_v56 = vadd.f32 %v1006_v53, %v857_v49  ;;  %v1188_v53 = vld [vmem:[%s3657_s13 + $0x8] sm:$0xff] }
 0x2a6   : >> { %2589 = vtanh.f32 %v1007_v56 }
 0x2ac   : >> { %v2590_v63 = vpop.eup %2589 }
 0x2ad   : >> { %v1010_v1 = vmul.f32 %v2590_v63, %v1009_v62 }
 0x2af   : >> { %v3632_v4 = vadd.f32 %v1011_v2, %v1010_v1 }
 0x2b1   : >> { %2319 = vst [vmem:[%s3599_s23 + $0x8] sm:$0xff] %v3632_v4  ;;  %1088 = vmatmul.f32.vlgmr.msrb.gmra.mxu2 %v3632_v4  ;;  %1108 = vmatmul.f32.vlgmr.msrb.gmra.mxu3 %v3632_v4 }
 0x2b2   : >> { %1128 = vmatmul.f32.vlgmr.msra.gmra.mxu0 %v3632_v4 }
 0x2b3   : > { %1413 = vmatpush.msra.mxu0 (%p671_p1), %v1402_v8 }
 0x32f   : >> { %v1129_v13 = vpop.f32.mrf.mxu0 }
 0x330   : >> { %v1130_v25 = vadd.f32 %v1129_v13, %v3591_v54 }
 0x334   : >> { %v1089_v7 = vpop.f32.mrf.mxu2  ;;  %v1109_v11 = vpop.f32.mrf.mxu3 }
 0x335   : >> { %v1090_v12 = vadd.f32 %v1089_v7, %v3579_v34  ;;  %v1110_v14 = vadd.f32 %v1109_v11, %v3582_v35 }
 0x337   : >> { %v1132_v15 = vadd.f32 %v1090_v12, %v1021_v5  ;;  %v1133_v17 = vadd.f32 %v1110_v14, %v1022_v9 }
 0x339   : >> { %v2321_v18 = vmul.f32 -1.442695, %v1132_v15  ;;  %v2322_v20 = vmul.f32 -1.442695, %v1133_v17 }
 0x33b   : >> { %2591 = vpow2.f32 %v2321_v18 }
 0x33c   : >> { %2593 = vpow2.f32 %v2322_v20 }
 0x341   : >> { %v2592_v21 = vpop.eup %2591 }
 0x342   : >> { %v2594_v23 = vpop.eup %2593  ;;  %v1140_v24 = vadd.f32 1.0, %v2592_v21  ;;  %v1189_v21 = vld [vmem:[%s3657_s13 + $0x10] sm:$0xff] }
 0x343   : >> { %v1141_v26 = vadd.f32 1.0, %v2594_v23 }
 0x344   : >> { %2595 = vrcp.f32 %v1140_v24  ;;  %v1153_v0 = vand.u32 2147483648, %v1140_v24  ;;  %v1151_v10 = vand.u32 2147483647, %v1140_v24  ;;  %vm1147_vm1 = vweird.f32 %v1140_v24 }
 0x345   : >> { %2597 = vrcp.f32 %v1141_v26  ;;  %v1168_v37 = vand.u32 2147483648, %v1141_v26  ;;  %vm1162_vm5 = vweird.f32 %v1141_v26  ;;  %v1166_v38 = vand.u32 2147483647, %v1141_v26 }
 0x346   : >> { %v1154_v22 = vor.u32 1.1754944e-38, %v1153_v0  ;;  %vm1152_vm3 = vcmp.eq.f32.partialorder %v1151_v10, 8.507059e+37 }
 0x347   : >> { %v1169_v41 = vor.u32 1.1754944e-38, %v1168_v37  ;;  %vm1167_vm7 = vcmp.eq.f32.partialorder %v1166_v38, 8.507059e+37  ;;  %v1392_v37 = vld [vmem:[#allocation16 + $0x118] sm:$0xff] (%p671_p1)  ;;  %v3682_v38 = vld [vmem:[#allocation16 + $0x128] sm:$0xff] (%p671_p1) }
 0x34a   : >> { %v2596_v28 = vpop.eup %2595 }
 0x34b   : >> { %v2598_v36 = vpop.eup %2597  ;;  %v1143_v27 = vmul.f32 %v2596_v28, %v1140_v24  ;;  %vm1148_vm0 = vweird.f32 %v2596_v28 }
 0x34c   : >> { %v1158_v60 = vmul.f32 %v2598_v36, %v1141_v26  ;;  %vm1149_vm2 = vmor %vm1147_vm1, %vm1148_vm0  ;;  %vm1163_vm4 = vweird.f32 %v2598_v36 }
 0x34d   : >> { %v1144_v61 = vsub.f32 1.0, %v1143_v27  ;;  %vm1164_vm6 = vmor %vm1162_vm5, %vm1163_vm4 }
 0x34e   : >> { %v1159_v3 = vsub.f32 1.0, %v1158_v60 }
 0x34f   : >> { %v1145_v6 = vmul.f32 %v2596_v28, %v1144_v61 }
 0x350   : >> { %v1160_v16 = vmul.f32 %v2598_v36, %v1159_v3 }
 0x351   : >> { %v1146_v19 = vadd.f32 %v2596_v28, %v1145_v6 }
 0x352   : >> { %v1161_v32 = vadd.f32 %v2598_v36, %v1160_v16 }
 0x353   : >> { %v1150_v29 = vsel %vm1149_vm2, %v2596_v28, %v1146_v19  ;;  %v1404_v19 = vld [vmem:[#allocation16 + $0x178] sm:$0xff] (%p671_p1) }
 0x354   : >> { %v1155_v31 = vsel %vm1152_vm3, %v1154_v22, %v1150_v29  ;;  %v1165_v40 = vsel %vm1164_vm6, %v2598_v36, %v1161_v32  ;;  %v1401_v22 = vld [vmem:[#allocation16 + $0x160] sm:$0xff] (%p671_p1)  ;;  %v3672_v29 = vld [vmem:[#allocation16 + $0x170] sm:$0xff] (%p671_p1) }
 0x355   : >> { %v1172_v33 = vmul.f32 %v1155_v31, %v1130_v25  ;;  %v1170_v42 = vsel %vm1167_vm7, %v1169_v41, %v1165_v40  ;;  %v1398_v25 = vld [vmem:[#allocation16 + $0x148] sm:$0xff] (%p671_p1)  ;;  %v1395_v31 = vld [vmem:[#allocation16 + $0x130] sm:$0xff] (%p671_p1)  ;;  %v3677_v32 = vld [vmem:[#allocation16 + $0x140] sm:$0xff] (%p671_p1) }
 0x356   : >> { %v1175_v43 = vsub.f32 1.0, %v1170_v42  ;;  %v1177_v46 = vmul.f32 %v1170_v42, %v3632_v4  ;;  %v1396_v40 = vld [vmem:[#allocation16 + $0x138] sm:$0xff] (%p671_p1)  ;;  %v1389_v41 = vld [vmem:[#allocation16 + $0x100] sm:$0xff] (%p671_p1)  ;;  %v3685_v42 = vld [vmem:[#allocation16 + $0x110] sm:$0xff] (%p671_p1) }
 0x357   : >> { %v1173_v39 = vadd.f32 %v1172_v33, %v1023_v30  ;;  %v3675_v30 = vld [vmem:[#allocation16 + $0x158] sm:$0xff] (%p671_p1) }
 0x358   : > { %v3680_v33 = vld [vmem:[#allocation14] sm:$0x7] (%p671_p1) }
 0x359   : >> { %2599 = vtanh.f32 %v1173_v39  ;;  %v1399_v39 = vld [vmem:[#allocation16 + $0x150] sm:$0xff] (%p671_p1) }
 0x35a   : > { %1414 = vmatpush.msra.mxu0 (%p671_p1), %v1399_v39 }
 0x35c   : > { %1415 = vmatpush.msra.mxu0 (%p671_p1), %v1396_v40 }
 0x35f   : >> { %v2600_v44 = vpop.eup %2599 }
 0x360   : >> { %v1176_v45 = vmul.f32 %v2600_v44, %v1175_v43  ;;  %v1393_v43 = vld [vmem:[#allocation16 + $0x120] sm:$0xff] (%p671_p1)  ;;  %v1386_v44 = vld [vmem:[#allocation16 + $0xe8] sm:$0xff] (%p671_p1) }
 0x361   : > { %1416 = vmatpush.msra.mxu0 (%p671_p1), %v1393_v43 }
 0x362   : >> { %v3649_v47 = vadd.f32 %v1177_v46, %v1176_v45  ;;  %v3688_v45 = vld [vmem:[#allocation16 + $0xf8] sm:$0xff] (%p671_p1)  ;;  %v1390_v46 = vld [vmem:[#allocation16 + $0x108] sm:$0xff] (%p671_p1) }
 0x363   : > { %1417 = vmatpush.msra.mxu0 (%p671_p1), %v1390_v46 }
 0x364   : >> { %2324 = vst [vmem:[%s3599_s23 + $0x10] sm:$0xff] %v3649_v47  ;;  %1254 = vmatmul.f32.vlgmr.msra.gmra.mxu1 %v3649_v47  ;;  %1274 = vmatmul.f32.vlgmr.msra.gmra.mxu2 %v3649_v47 }
 0x365   : >> { %1294 = vmatmul.f32.vlgmr.msra.gmra.mxu3 %v3649_v47  ;;  %1495 = vmatpush.msra.mxu2 (%p671_p1), %v1404_v19 }
 0x366   : > { %1454 = vmatpush.msra.mxu1 (%p671_p1), %v3672_v29  ;;  %2393 = vmatpush.msra.mxu3 (%p671_p1), %v1402_v8 }
 0x367   : > { %1496 = vmatpush.msra.mxu2 (%p671_p1), %v1401_v22 }
 0x368   : > { %1455 = vmatpush.msra.mxu1 (%p671_p1), %v3675_v30  ;;  %2394 = vmatpush.msra.mxu3 (%p671_p1), %v1399_v39 }
 0x369   : > { %1497 = vmatpush.msra.mxu2 (%p671_p1), %v1398_v25 }
 0x36a   : > { %1456 = vmatpush.msra.mxu1 (%p671_p1), %v3677_v32  ;;  %2395 = vmatpush.msra.mxu3 (%p671_p1), %v1396_v40 }
 0x36b   : > { %1498 = vmatpush.msra.mxu2 (%p671_p1), %v1395_v31 }
 0x36c   : > { %1457 = vmatpush.msra.mxu1 (%p671_p1), %v3682_v38  ;;  %2396 = vmatpush.msra.mxu3 (%p671_p1), %v1393_v43 }
 0x36d   : > { %1499 = vmatpush.msra.mxu2 (%p671_p1), %v1392_v37 }
 0x36e   : > { %1458 = vmatpush.msra.mxu1 (%p671_p1), %v3685_v42  ;;  %2397 = vmatpush.msra.mxu3 (%p671_p1), %v1390_v46 }
 0x36f   : > { %1500 = vmatpush.msra.mxu2 (%p671_p1), %v1389_v41 }
 0x370   : > { %1459 = vmatpush.msra.mxu1 (%p671_p1), %v3688_v45 }
 0x371   : > { %1501 = vmatpush.msra.mxu2 (%p671_p1), %v1386_v44 }
 0x3e1   : >> { %v1255_v49 = vpop.f32.mrf.mxu1 }
 0x3e2   : >> { %v1256_v50 = vadd.f32 %v1255_v49, %v3579_v34  ;;  %v1387_v49 = vld [vmem:[#allocation16 + $0xf0] sm:$0xff] (%p671_p1) }
 0x3e3   : > { %1418 = vmatpush.msra.mxu0 (%p671_p1), %v1387_v49  ;;  %2398 = vmatpush.msra.mxu3 (%p671_p1), %v1387_v49 }
 0x3e4   : >> { %v1298_v51 = vadd.f32 %v1256_v50, %v1187_v48  ;;  %v3691_v48 = vld [vmem:[#allocation16 + $0xe0] sm:$0xff] (%p671_p1)  ;;  %v1380_v50 = vld [vmem:[#allocation16 + $0xb8] sm:$0xff] (%p671_p1) }
 0x3e5   : > { %1460 = vmatpush.msra.mxu1 (%p671_p1), %v3691_v48 }
 0x3e6   : >> { %v2326_v52 = vmul.f32 -1.442695, %v1298_v51  ;;  %v3694_v51 = vld [vmem:[#allocation16 + $0xc8] sm:$0xff] (%p671_p1) }
 0x3e7   : >> { %v1275_v55 = vpop.f32.mrf.mxu2  ;;  %1461 = vmatpush.msra.mxu1 (%p671_p1), %v3694_v51 }
 0x3e8   : >> { %2601 = vpow2.f32 %v2326_v52  ;;  %v1276_v56 = vadd.f32 %v1275_v55, %v3582_v35  ;;  %v1295_v12 = vpop.f32.mrf.mxu3  ;;  %v1384_v52 = vld [vmem:[#allocation16 + $0xd8] sm:$0xff] (%p671_p1)  ;;  %v3697_v55 = vld [vmem:[#allocation16 + $0xb0] sm:$0xff] (%p671_p1) }
 0x3e9   : >> { %v1296_v18 = vadd.f32 %v1295_v12, %v3591_v54  ;;  %1419 = vmatpush.msra.mxu0 (%p671_p1), %v1384_v52  ;;  %2399 = vmatpush.msra.mxu3 (%p671_p1), %v1384_v52  ;;  %v1364_v12 = vld [vmem:[#allocation16 + $0x38] sm:$0xff] (%p671_p1) }
 0x3ea   : >> { %v1299_v57 = vadd.f32 %v1276_v56, %v1188_v53  ;;  %v1377_v53 = vld [vmem:[#allocation16 + $0xa0] sm:$0xff] (%p671_p1)  ;;  %1462 = vmatpush.msra.mxu1 (%p671_p1), %v3697_v55 }
 0x3eb   : > { %v1381_v56 = vld [vmem:[#allocation16 + $0xc0] sm:$0xff] (%p671_p1) }
 0x3ec   : >> { %v2327_v58 = vmul.f32 -1.442695, %v1299_v57  ;;  %v1374_v57 = vld [vmem:[#allocation16 + $0x88] sm:$0xff] (%p671_p1)  ;;  %1420 = vmatpush.msra.mxu0 (%p671_p1), %v1381_v56  ;;  %2400 = vmatpush.msra.mxu3 (%p671_p1), %v1381_v56 }
 0x3ee   : >> { %v2602_v59 = vpop.eup %2601  ;;  %2603 = vpow2.f32 %v2327_v58  ;;  %v3700_v58 = vld [vmem:[#allocation16 + $0x98] sm:$0xff] (%p671_p1) }
 0x3ef   : >> { %v1306_v62 = vadd.f32 1.0, %v2602_v59  ;;  %v1378_v59 = vld [vmem:[#allocation16 + $0xa8] sm:$0xff] (%p671_p1)  ;;  %1463 = vmatpush.msra.mxu1 (%p671_p1), %v3700_v58 }
 0x3f0   : > { %1421 = vmatpush.msra.mxu0 (%p671_p1), %v1378_v59  ;;  %2401 = vmatpush.msra.mxu3 (%p671_p1), %v1378_v59 }
 0x3f1   : >> { %2605 = vrcp.f32 %v1306_v62  ;;  %v1319_v34 = vand.u32 2147483648, %v1306_v62  ;;  %v1317_v9 = vand.u32 2147483647, %v1306_v62  ;;  %vm1313_vm9 = vweird.f32 %v1306_v62 }
 0x3f3   : >> { %v1320_v15 = vor.u32 1.1754944e-38, %v1319_v34  ;;  %vm1318_vm11 = vcmp.eq.f32.partialorder %v1317_v9, 8.507059e+37  ;;  %v1365_v34 = vld [vmem:[#allocation16 + $0x40] sm:$0xff] (%p671_p1) }
 0x3f4   : >> { %v2604_v63 = vpop.eup %2603  ;;  %v1369_v9 = vld [vmem:[#allocation16 + $0x60] sm:$0xff] (%p671_p1) }
 0x3f5   : >> { %v1307_v1 = vadd.f32 1.0, %v2604_v63  ;;  %v3703_v63 = vld [vmem:[#allocation16 + $0x80] sm:$0xff] (%p671_p1) }
 0x3f6   : > { %1464 = vmatpush.msra.mxu1 (%p671_p1), %v3703_v63 }
 0x3f7   : >> { %v2606_v2 = vpop.eup %2605  ;;  %2607 = vrcp.f32 %v1307_v1  ;;  %v1334_v26 = vand.u32 2147483648, %v1307_v1  ;;  %v1332_v36 = vand.u32 2147483647, %v1307_v1  ;;  %vm1328_vm13 = vweird.f32 %v1307_v1 }
 0x3f8   : >> { %v1309_v4 = vmul.f32 %v2606_v2, %v1306_v62  ;;  %vm1314_vm8 = vweird.f32 %v2606_v2  ;;  %v1371_v62 = vld [vmem:[#allocation16 + $0x70] sm:$0xff] (%p671_p1) }
 0x3f9   : >> { %vm1315_vm10 = vmor %vm1313_vm9, %vm1314_vm8  ;;  %v1335_v61 = vor.u32 1.1754944e-38, %v1334_v26  ;;  %vm1333_vm15 = vcmp.eq.f32.partialorder %v1332_v36, 8.507059e+37 }
 0x3fa   : >> { %v1310_v5 = vsub.f32 1.0, %v1309_v4  ;;  %v3706_v4 = vld [vmem:[#allocation16 + $0x68] sm:$0xff] (%p671_p1) }
 0x3fb   : > { %1465 = vmatpush.msra.mxu1 (%p671_p1), %v3706_v4 }
 0x3fc   : >> { %v1311_v7 = vmul.f32 %v2606_v2, %v1310_v5  ;;  %v1372_v5 = vld [vmem:[#allocation16 + $0x78] sm:$0xff] (%p671_p1) }
 0x3fd   : >> { %v2608_v11 = vpop.eup %2607 }
 0x3fe   : >> { %v1324_v35 = vmul.f32 %v2608_v11, %v1307_v1  ;;  %v1312_v14 = vadd.f32 %v2606_v2, %v1311_v7  ;;  %vm1329_vm12 = vweird.f32 %v2608_v11  ;;  %v1375_v1 = vld [vmem:[#allocation16 + $0x90] sm:$0xff] (%p671_p1) }
 0x3ff   : >> { %vm1330_vm14 = vmor %vm1328_vm13, %vm1329_vm12  ;;  %v3709_v7 = vld [vmem:[#allocation16 + $0x50] sm:$0xff] (%p671_p1)  ;;  %1422 = vmatpush.msra.mxu0 (%p671_p1), %v1375_v1  ;;  %2402 = vmatpush.msra.mxu3 (%p671_p1), %v1375_v1 }
 0x400   : >> { %v1325_v17 = vsub.f32 1.0, %v1324_v35  ;;  %v1316_v20 = vsel %vm1315_vm10, %v2606_v2, %v1312_v14  ;;  %v1368_v2 = vld [vmem:[#allocation16 + $0x58] sm:$0xff] (%p671_p1)  ;;  %1466 = vmatpush.msra.mxu1 (%p671_p1), %v3709_v7  ;;  %v1366_v35 = vld [vmem:[#allocation16 + $0x48] sm:$0xff] (%p671_p1)  ;;  %v1359_v14 = vld [vmem:[#allocation16 + $0x10] sm:$0xff] (%p671_p1) }
 0x401   : >> { %v1321_v23 = vsel %vm1318_vm11, %v1320_v15, %v1316_v20  ;;  %1423 = vmatpush.msra.mxu0 (%p671_p1), %v1372_v5  ;;  %2403 = vmatpush.msra.mxu3 (%p671_p1), %v1372_v5  ;;  %v1361_v15 = vld [vmem:[#allocation16 + $0x20] sm:$0xff] (%p671_p1)  ;;  %v1358_v20 = vld [vmem:[#allocation16 + $0x8] sm:$0xff] (%p671_p1) }
 0x402   : >> { %v1326_v24 = vmul.f32 %v2608_v11, %v1325_v17  ;;  %v1338_v28 = vmul.f32 %v1321_v23, %v1296_v18  ;;  %1467 = vmatpush.msra.mxu1 (%p671_p1), %v1364_v12  ;;  %v1363_v18 = vld [vmem:[#allocation16 + $0x30] sm:$0xff] (%p671_p1)  ;;  %v1357_v23 = vld [vmem:[#allocation16] sm:$0xff] (%p671_p1) }
 0x403   : > { %1424 = vmatpush.msra.mxu0 (%p671_p1), %v1369_v9  ;;  %2404 = vmatpush.msra.mxu3 (%p671_p1), %v1369_v9 }
 0x404   : >> { %v1327_v27 = vadd.f32 %v2608_v11, %v1326_v24  ;;  %v1339_v60 = vadd.f32 %v1338_v28, %v1189_v21  ;;  %1468 = vmatpush.msra.mxu1 (%p671_p1), %v1361_v15  ;;  %v1360_v21 = vld [vmem:[#allocation16 + $0x18] sm:$0xff] (%p671_p1) }
 0x405   : > { %1425 = vmatpush.msra.mxu0 (%p671_p1), %v1366_v35  ;;  %2405 = vmatpush.msra.mxu3 (%p671_p1), %v1366_v35 }
 0x406   : >> { %v1331_v0 = vsel %vm1330_vm14, %v2608_v11, %v1327_v27  ;;  %2609 = vtanh.f32 %v1339_v60  ;;  %v1362_v11 = vld [vmem:[#allocation16 + $0x28] sm:$0xff] (%p671_p1)  ;;  %1469 = vmatpush.msra.mxu1 (%p671_p1), %v1358_v20 }
 0x407   : >> { %v1336_v3 = vsel %vm1333_vm15, %v1335_v61, %v1331_v0  ;;  %1426 = vmatpush.msra.mxu0 (%p671_p1), %v1363_v18  ;;  %2406 = vmatpush.msra.mxu3 (%p671_p1), %v1363_v18  ;;  %v1405_v0 = vld [vmem:[%s4167_s8] sm:$0x7] (%p671_p1) }
 0x408   : >> { %v1341_v54 = vsub.f32 1.0, %v1336_v3  ;;  %v1343_v13 = vmul.f32 %v1336_v3, %v3649_v47  ;;  %v1383_v47 = vld [vmem:[#allocation16 + $0xd0] sm:$0xff] (%p671_p1)  ;;  %v3729_v3 = vperm.slane (%p671_p1), %v1405_v0, 1 }
 0x409   : > { %1502 = vmatpush.msra.mxu2 (%p671_p1), %v1383_v47  ;;  %1427 = vmatpush.msra.mxu0 (%p671_p1), %v1360_v21 }
 0x40a   : > { %2407 = vmatpush.msra.mxu3 (%p671_p1), %v1360_v21 }
 0x40b   : > { %1503 = vmatpush.msra.mxu2 (%p671_p1), %v1380_v50  ;;  %1428 = vmatpush.msra.mxu0 (%p671_p1), %v1357_v23 }
 0x40c   : >> { %v2610_v6 = vpop.eup %2609  ;;  %2408 = vmatpush.msra.mxu3 (%p671_p1), %v1357_v23 }
 0x40d   : >> { %v1342_v10 = vmul.f32 %v2610_v6, %v1341_v54  ;;  %673 = sbr.rel (!%p671_p1) target bundleno = 305 (0x131), region = 158  ;;  %1504 = vmatpush.msra.mxu2 (%p671_p1), %v1377_v53  ;;  %v1407_v6 = vperm.slane (%p671_p1), %v1405_v0, 0 }
 0x40e   : > { %2409 = vmatpush.msrb.mxu3 (%p671_p1), %v3672_v29 }
 0x40f   : >> { %v1344_v16 = vadd.f32 %v1343_v13, %v1342_v10   ;;  %1505 = vmatpush.msra.mxu2 (%p671_p1), %v1374_v57  ;;  %v3731_v10 = vperm.slane (%p671_p1), %v1405_v0, 2 }
 0x410   : > { %2410 = vmatpush.msrb.mxu3 (%p671_p1), %v3675_v30 }
 0x411   : >> { %2329 = vst [vmem:[%s3599_s23 + $0x18] sm:$0xff] %v1344_v16  ;;  %v4185_v27 = vmov %v1344_v16  ;;  %1506 = vmatpush.msra.mxu2 (%p671_p1), %v1371_v62  ;;  %s3751_s23 = smov (%p671_p1), 0  }
 0x412   : > { %1347 = vst [vmem:[#allocation2] sm:$0xff] %v1344_v16  ;;  %2411 = vmatpush.msrb.mxu3 %v3677_v32 }
 0x413   : > { %1507 = vmatpush.msra.mxu2 %v1368_v2 }
 0x414   : > { %2412 = vmatpush.msrb.mxu3 %v3682_v38 }
 0x415   : > { %1508 = vmatpush.msra.mxu2 %v1365_v34 }
 0x416   : > { %2413 = vmatpush.msrb.mxu3 %v3685_v42 }
 0x417   : > { %1509 = vmatpush.msra.mxu2 %v1362_v11 }
 0x418   : > { %v1349_v17 = vld [vmem:[#allocation3] sm:$0xff]  ;;  %v1355_v24 = vld [vmem:[#allocation3 + $0x30] sm:$0xff]  ;;  %v1350_v26 = vld [vmem:[#allocation3 + $0x8] sm:$0xff]  ;;  %2414 = vmatpush.msrb.mxu3 %v3688_v45 }
 0x419   : > { %1510 = vmatpush.msra.mxu2 %v1359_v14  ;;  %1470 = vmatmul.f32.vlgmr.msra.gmra.mxu1 %v1349_v17  ;;  %v1356_v28 = vld [vmem:[#allocation3 + $0x38] sm:$0xff]  ;;  %v1351_v36 = vld [vmem:[#allocation3 + $0x10] sm:$0xff]  ;;  %v1353_v60 = vld [vmem:[#allocation3 + $0x20] sm:$0xff] }
 0x41a   : > { %1511 = vmatmul.f32.vlgmr.msra.gmra.mxu2 %v1349_v17  ;;  %1429 = vmatmul.f32.vlgmr.msra.gmra.mxu0 %v1349_v17  ;;  %v1352_v27 = vld [vmem:[#allocation3 + $0x18] sm:$0xff]  ;;  %v1354_v61 = vld [vmem:[#allocation3 + $0x28] sm:$0xff] }
 0x41b   : > { %1447 = vmatmul.f32.vlgmr.msra.gmra.mxu3 %v1355_v24 }
 0x41c   : > { %2415 = vmatpush.msrb.mxu3 %v3691_v48 }
 0x41e   : > { %2416 = vmatpush.msrb.mxu3 %v3694_v51 }
 0x420   : > { %2417 = vmatpush.msrb.mxu3 %v3697_v55  ;;  %v1561_v55 = vld [vmem:[#allocation2 + $0x8] sm:$0xff]  }
 0x421   : > { %1473 = vmatmul.f32.gmra.mxu1 %v1350_v26 }
 0x422   : > { %1514 = vmatmul.f32.gmra.mxu2 %v1350_v26  ;;  %1432 = vmatmul.f32.gmra.mxu0 %v1350_v26 }
 0x423   : > { %1450 = vmatmul.f32.gmra.mxu3 %v1356_v28 }
 0x424   : > { %2418 = vmatpush.msrb.mxu3 %v3700_v58 }
 0x426   : > { %2419 = vmatpush.msrb.mxu3 %v3703_v63 }
 0x428   : > { %2420 = vmatpush.msrb.mxu3 %v3706_v4 }
 0x429   : > { %1476 = vmatmul.f32.gmra.mxu1 %v1351_v36 }
 0x42a   : > { %1517 = vmatmul.f32.gmra.mxu2 %v1351_v36  ;;  %1435 = vmatmul.f32.gmra.mxu0 %v1351_v36 }
 0x42b   : > { %2421 = vmatpush.msrb.mxu3 %v3709_v7 }
 0x42d   : > { %2422 = vmatpush.msrb.mxu3 %v1364_v12 }
 0x42f   : > { %2423 = vmatpush.msrb.mxu3 %v1361_v15 }
 0x431   : > { %1479 = vmatmul.f32.gmra.mxu1 %v1352_v27  ;;  %2424 = vmatpush.msrb.mxu3 %v1358_v20 }
 0x432   : > { %1520 = vmatmul.f32.gmra.mxu2 %v1352_v27  ;;  %1438 = vmatmul.f32.gmra.mxu0 %v1352_v27 }
 0x433   : > { %1491 = vmatmul.f32.vlgmr.msrb.gmra.mxu3 %v1356_v28 }
 0x439   : > { %1482 = vmatmul.f32.gmra.mxu1 %v1353_v60 }
 0x43a   : > { %1523 = vmatmul.f32.gmra.mxu2 %v1353_v60  ;;  %1441 = vmatmul.f32.gmra.mxu0 %v1353_v60 }
 0x441   : > { %1485 = vmatmul.f32.gmra.mxu1 %v1354_v61 }
 0x442   : > { %1526 = vmatmul.f32.gmra.mxu2 %v1354_v61  ;;  %1444 = vmatmul.f32.gmra.mxu0 %v1354_v61 }
 0x449   : > { %1488 = vmatmul.f32.gmra.mxu1 %v1355_v24 }
 0x44a   : > { %1529 = vmatmul.f32.gmra.mxu2 %v1355_v24 }
 0x452   : > { %1532 = vmatmul.f32.gmra.mxu2 %v1356_v28 }
 0x496   : > { %v1471_v54 = vpop.f32.mrf.mxu1 }
 0x497   : > { %v1472_v13 = vadd.f32 %v1471_v54, %v3729_v3  ;;  %v1430_v16 = vpop.f32.mrf.mxu0 }
 0x498   : > { %v1431_v22 = vadd.f32 %v1430_v16, %v1407_v6 }
 0x499   : > { %1537 = vst [vmem:[#allocation4 + $0x8] sm:$0xff] %v1472_v13 }
 0x49a   : > { %1536 = vst [vmem:[#allocation4] sm:$0xff] %v1431_v22 }
 0x49d   : > { %v1512_v19 = vpop.f32.mrf.mxu2 }
 0x49e   : > { %v1513_v25 = vadd.f32 %v1512_v19, %v3731_v10  ;;  %v1474_v29 = vpop.f32.mrf.mxu1  ;;  %v1448_v32 = vpop.f32.mrf.mxu3 }
 0x49f   : > { %v1475_v30 = vadd.f32 %v1474_v29, %v3729_v3  ;;  %v1433_v31 = vpop.f32.mrf.mxu0  ;;  %v1449_v38 = vadd.f32 %v1448_v32, %v1407_v6 }
 0x4a0   : > { %1538 = vst [vmem:[#allocation4 + $0x10] sm:$0xff] %v1513_v25  ;;  %v1434_v37 = vadd.f32 %v1433_v31, %v1407_v6 }
 0x4a1   : > { %1540 = vst [vmem:[#allocation4 + $0x20] sm:$0xff] %v1475_v30 }
 0x4a2   : > { %1539 = vst [vmem:[#allocation4 + $0x18] sm:$0xff] %v1434_v37 }
 0x4a3   : > { %1554 = vst [vmem:[#allocation4 + $0x90] sm:$0xff] %v1449_v38 }
 0x4a5   : > { %v1515_v8 = vpop.f32.mrf.mxu2 }
 0x4a6   : > { %v1516_v39 = vadd.f32 %v1515_v8, %v3731_v10  ;;  %v1477_v40 = vpop.f32.mrf.mxu1  ;;  %v1451_v43 = vpop.f32.mrf.mxu3 }
 0x4a7   : > { %v1478_v41 = vadd.f32 %v1477_v40, %v3729_v3  ;;  %v1436_v42 = vpop.f32.mrf.mxu0  ;;  %v1452_v46 = vadd.f32 %v1451_v43, %v1407_v6 }
 0x4a8   : > { %1541 = vst [vmem:[#allocation4 + $0x28] sm:$0xff] %v1516_v39  ;;  %v1437_v45 = vadd.f32 %v1436_v42, %v1407_v6 }
 0x4a9   : > { %1543 = vst [vmem:[#allocation4 + $0x38] sm:$0xff] %v1478_v41 }
 0x4aa   : > { %1542 = vst [vmem:[#allocation4 + $0x30] sm:$0xff] %v1437_v45 }
 0x4ab   : > { %1557 = vst [vmem:[#allocation4 + $0xa8] sm:$0xff] %v1452_v46 }
 0x4ad   : > { %v1518_v44 = vpop.f32.mrf.mxu2 }
 0x4ae   : > { %v1519_v47 = vadd.f32 %v1518_v44, %v3731_v10  ;;  %v1480_v48 = vpop.f32.mrf.mxu1 }
 0x4af   : > { %v1481_v49 = vadd.f32 %v1480_v48, %v3729_v3  ;;  %v1439_v50 = vpop.f32.mrf.mxu0 }
 0x4b0   : > { %1544 = vst [vmem:[#allocation4 + $0x40] sm:$0xff] %v1519_v47  ;;  %v1440_v52 = vadd.f32 %v1439_v50, %v1407_v6 }
 0x4b1   : > { %1546 = vst [vmem:[#allocation4 + $0x50] sm:$0xff] %v1481_v49 }
 0x4b2   : > { %1545 = vst [vmem:[#allocation4 + $0x48] sm:$0xff] %v1440_v52 }
 0x4b5   : > { %v1521_v51 = vpop.f32.mrf.mxu2 }
 0x4b6   : > { %v1522_v53 = vadd.f32 %v1521_v51, %v3731_v10  ;;  %v1483_v56 = vpop.f32.mrf.mxu1  ;;  %v1492_v4 = vpop.f32.mrf.mxu3 }
 0x4b7   : > { %v1484_v57 = vadd.f32 %v1483_v56, %v3729_v3  ;;  %v1442_v58 = vpop.f32.mrf.mxu0  ;;  %v1493_v5 = vadd.f32 %v1492_v4, %v3729_v3 }
 0x4b8   : > { %1547 = vst [vmem:[#allocation4 + $0x58] sm:$0xff] %v1522_v53  ;;  %v1443_v62 = vadd.f32 %v1442_v58, %v1407_v6 }
 0x4b9   : > { %1549 = vst [vmem:[#allocation4 + $0x68] sm:$0xff] %v1484_v57 }
 0x4ba   : > { %1548 = vst [vmem:[#allocation4 + $0x60] sm:$0xff] %v1443_v62 }
 0x4bb   : > { %1558 = vst [vmem:[#allocation4 + $0xb0] sm:$0xff] %v1493_v5 }
 0x4bd   : > { %v1524_v59 = vpop.f32.mrf.mxu2 }
 0x4be   : > { %v1525_v63 = vadd.f32 %v1524_v59, %v3731_v10  ;;  %v1486_v1 = vpop.f32.mrf.mxu1 }
 0x4bf   : > { %v1487_v2 = vadd.f32 %v1486_v1, %v3729_v3  ;;  %v1445_v34 = vpop.f32.mrf.mxu0 }
 0x4c0   : > { %1550 = vst [vmem:[#allocation4 + $0x70] sm:$0xff] %v1525_v63  ;;  %v1446_v9 = vadd.f32 %v1445_v34, %v1407_v6 }
 0x4c1   : > { %1552 = vst [vmem:[#allocation4 + $0x80] sm:$0xff] %v1487_v2 }
 0x4c2   : > { %1551 = vst [vmem:[#allocation4 + $0x78] sm:$0xff] %v1446_v9 }
 0x4c5   : > { %v1527_v7 = vpop.f32.mrf.mxu2 }
 0x4c6   : > { %v1528_v11 = vadd.f32 %v1527_v7, %v3731_v10  ;;  %v1489_v12 = vpop.f32.mrf.mxu1 }
 0x4c7   : > { %v1490_v35 = vadd.f32 %v1489_v12, %v3729_v3 }
 0x4c8   : > { %1553 = vst [vmem:[#allocation4 + $0x88] sm:$0xff] %v1528_v11 }
 0x4c9   : > { %1555 = vst [vmem:[#allocation4 + $0x98] sm:$0xff] %v1490_v35 }
 0x4cd   : > { %v1530_v14 = vpop.f32.mrf.mxu2 }
 0x4ce   : > { %v1531_v15 = vadd.f32 %v1530_v14, %v3731_v10 }
 0x4d0   : > { %1556 = vst [vmem:[#allocation4 + $0xa0] sm:$0xff] %v1531_v15 }
 0x4d5   : > { %v1533_v17 = vpop.f32.mrf.mxu2 }
 0x4d6   : > { %v1534_v18 = vadd.f32 %v1533_v17, %v3731_v10 }
 0x4d8   : > { %1559 = vst [vmem:[#allocation4 + $0xb8] sm:$0xff] %v1534_v18 }
 0x4d9 LB: >> { %v3759_v20 = vld [vmem:[#allocation13 + $0x168] sm:$0xff]  ;;  %v3761_v21 = vld [vmem:[#allocation13 + $0x170] sm:$0xff]  ;;  %v3767_v24 = vld [vmem:[#allocation13 + $0x158] sm:$0xff]  ;;  %s4035_s24 = sshll.u32 %s2971_s23, 5  ;;  %v4039_v1 = vperm.slane %v3680_v33, 0  ;;  %v4042_v2 = vperm.slane %v3680_v33, 1  ;;  %s2971_s23 = sphi %s3751_s23, %s1567_s23   ;;  %v2967_v55 = vphi %v1561_v55, %v4186_v55  }
 0x4da   : >> { %v3763_v23 = vld [vmem:[#allocation13 + $0x150] sm:$0xff]  ;;  %1633 = vmatpush.msra.mxu0 %v3759_v20  ;;  %1653 = vmatpush.msra.mxu1 %v3761_v21  ;;  %v3769_v26 = vld [vmem:[#allocation13 + $0x138] sm:$0xff]  ;;  %v3771_v28 = vld [vmem:[#allocation13 + $0x140] sm:$0xff]  ;;  %s1570_s26 = sshra.s32 %s4035_s24, 3  ;;  %s1740_s1 = sadd.s32 8, %s4035_s24 }
 0x4db   : >> { %1749 = vmatpush.msra.mxu3 %v3759_v20  ;;  %v3776_v36 = vld [vmem:[#allocation13 + $0x120] sm:$0xff]  ;;  %v3778_v27 = vld [vmem:[#allocation13 + $0x128] sm:$0xff]  ;;  %v3785_v61 = vld [vmem:[#allocation13 + $0x110] sm:$0xff]  ;;  %s2356_s3 = smul.u32 24, %s1570_s26  ;;  %s1741_s17 = sshra.s32 %s1740_s1, 3 }
 0x4dc   : >> { %1634 = vmatpush.msra.mxu0 %v3763_v23  ;;  %1654 = vmatpush.msra.mxu1 %v3767_v24  ;;  %v3783_v60 = vld [vmem:[#allocation13 + $0x108] sm:$0xff]  ;;  %v3790_v0 = vld [vmem:[#allocation13 + $0xf0] sm:$0xff]  ;;  %v3792_v3 = vld [vmem:[#allocation13 + $0xf8] sm:$0xff]  ;;  %s2357_s29 = smul.u32 24, %s1741_s17  ;;  %s1856_s21 = sadd.s32 16, %s4035_s24 }
 0x4dd   : >> { %1750 = vmatpush.msra.mxu3 %v3763_v23  ;;  %v3794_v54 = vld [vmem:[#allocation13 + $0x178] sm:$0xff]  ;;  %v3799_v6 = vld [vmem:[#allocation13 + $0x160] sm:$0xff]  ;;  %v3809_v16 = vld [vmem:[#allocation13 + $0x148] sm:$0xff]  ;;  %s4044_s4 = scalar_lea.vmem [#allocation4], %s2356_s3  ;;  %s1857_s20 = sshra.s32 %s1856_s21, 3 }
 0x4de   : >> { %1635 = vmatpush.msra.mxu0 %v3769_v26  ;;  %1655 = vmatpush.msra.mxu1 %v3771_v28  ;;  %v3801_v10 = vld [vmem:[#allocation13 + $0xd8] sm:$0xff]  ;;  %v3803_v13 = vld [vmem:[#allocation13 + $0xe0] sm:$0xff]  ;;  %v3813_v22 = vld [vmem:[#allocation13 + $0xc8] sm:$0xff]  ;;  %s4078_s18 = scalar_lea.vmem [#allocation4], %s2357_s29  ;;  %s2358_s13 = smul.u32 24, %s1857_s20 }
 0x4df   : >> { %1751 = vmatpush.msra.mxu3 %v3769_v26  ;;  %1673 = vmatpush.msra.mxu2 %v3794_v54  ;;  %v3811_v19 = vld [vmem:[#allocation13 + $0xc0] sm:$0xff]  ;;  %v3819_v25 = vld [vmem:[#allocation13 + $0x130] sm:$0xff]  ;;  %v3821_v29 = vld [vmem:[#allocation13 + $0xa8] sm:$0xff]  ;;  %s1972_s15 = sadd.s32 24, %s4035_s24  ;;  %s2345_s1 = sshll.u32 %s2971_s23, 3 }
 0x4e0   : >> { %1636 = vmatpush.msra.mxu0 %v3776_v36  ;;  %1656 = vmatpush.msra.mxu1 %v3778_v27  ;;  %v3823_v30 = vld [vmem:[#allocation13 + $0xb0] sm:$0xff]  ;;  %v3829_v31 = vld [vmem:[#allocation13 + $0x118] sm:$0xff]  ;;  %v3839_v37 = vld [vmem:[#allocation13 + $0x100] sm:$0xff]  ;;  %s4093_s27 = scalar_lea.vmem [#allocation4], %s2358_s13  ;;  %s1973_s26 = sshra.s32 %s1972_s15, 3 }
 0x4e1   : >> { %1752 = vmatpush.msra.mxu3 %v3776_v36  ;;  %1674 = vmatpush.msra.mxu2 %v3799_v6  ;;  %v3831_v32 = vld [vmem:[#allocation13 + $0x90] sm:$0xff]  ;;  %v3833_v8 = vld [vmem:[#allocation13 + $0x98] sm:$0xff]  ;;  %v3843_v39 = vld [vmem:[#allocation13 + $0x80] sm:$0xff]  ;;  %s2359_s3 = smul.u32 24, %s1973_s26  ;;  %s2183_s17 = scalar_lea.vmem [#allocation3], %s4035_s24 }
 0x4e2   : >> { %1637 = vmatpush.msra.mxu0 %v3783_v60  ;;  %1657 = vmatpush.msra.mxu1 %v3785_v61  ;;  %v3841_v38 = vld [vmem:[#allocation13 + $0x78] sm:$0xff]  ;;  %v3849_v40 = vld [vmem:[#allocation13 + $0xe8] sm:$0xff]  ;;  %v3851_v41 = vld [vmem:[#allocation13 + $0x60] sm:$0xff]  ;;  %s2092_s29 = scalar_lea.vmem %s3200_s2, %s2345_s1 [#allocation17]  ;;  %s1567_s23 = sadd.s32 1, %s2971_s23  }
 0x4e3   : >> { %1753 = vmatpush.msra.mxu3 %v3783_v60  ;;  %1675 = vmatpush.msra.mxu2 %v3809_v16  ;;  %v3853_v42 = vld [vmem:[#allocation13 + $0x68] sm:$0xff]  ;;  %v3859_v43 = vld [vmem:[#allocation13 + $0xd0] sm:$0xff]  ;;  %v3869_v46 = vld [vmem:[#allocation13 + $0xb8] sm:$0xff]  ;;  %p1564_p4 = scmp.ge.s32.totalorder %s1567_s23, 2  }
 0x4e4   : >> { %1638 = vmatpush.msra.mxu0 %v3790_v0  ;;  %1658 = vmatpush.msra.mxu1 %v3792_v3  ;;  %v3861_v44 = vld [vmem:[#allocation13 + $0x48] sm:$0xff]  ;;  %v3863_v45 = vld [vmem:[#allocation13 + $0x50] sm:$0xff]  ;;  %v3873_v48 = vld [vmem:[#allocation13 + $0x38] sm:$0xff]  ;;  %s2108_s13 = sshll.u32 (%p1564_p4), %s3200_s2, 4  ;;  %s2096_s15 = scalar_lea.sflag (%p1564_p4), [#allocation7], %s3177_s25  ;;  %s2109_s13 = int_to_ptr.vmem [resolvable:$true] %s2108_s13 }
 0x4e5   : >> { %1754 = vmatpush.msra.mxu3 %v3790_v0  ;;  %1676 = vmatpush.msra.mxu2 %v3819_v25  ;;  %v3871_v47 = vld [vmem:[#allocation13 + $0x30] sm:$0xff]  ;;  %v3879_v49 = vld [vmem:[#allocation13 + $0xa0] sm:$0xff]  ;;  %v3881_v50 = vld [vmem:[#allocation13 + $0x18] sm:$0xff] }
 0x4e6   : >> { %1639 = vmatpush.msra.mxu0 %v3801_v10  ;;  %1659 = vmatpush.msra.mxu1 %v3803_v13  ;;  %v3883_v51 = vld [vmem:[#allocation13 + $0x20] sm:$0xff]  ;;  %v3889_v52 = vld [vmem:[#allocation13 + $0x88] sm:$0xff]  ;;  %v3900_v57 = vld [vmem:[#allocation13 + $0x70] sm:$0xff] }
 0x4e7   : >> { %1755 = vmatpush.msra.mxu3 %v3801_v10  ;;  %1677 = vmatpush.msra.mxu2 %v3829_v31  ;;  %v3891_v53 = vld [vmem:[#allocation13] sm:$0xff]  ;;  %v3893_v56 = vld [vmem:[#allocation13 + $0x8] sm:$0xff]  ;;  %v3907_v58 = vld [vmem:[#allocation13 + $0x58] sm:$0xff] }
 0x4e8   : >> { %1640 = vmatpush.msra.mxu0 %v3811_v19  ;;  %1660 = vmatpush.msra.mxu1 %v3813_v22  ;;  %v3911_v59 = vld [vmem:[#allocation13 + $0x40] sm:$0xff]  ;;  %v3917_v62 = vld [vmem:[#allocation13 + $0x28] sm:$0xff]  ;;  %v3923_v63 = vld [vmem:[#allocation13 + $0x10] sm:$0xff] }
 0x4e9   : >> { %1756 = vmatpush.msra.mxu3 %v3811_v19  ;;  %1678 = vmatpush.msra.mxu2 %v3839_v37  ;;  %v1575_v4 = vld [vmem:[%s4044_s4] sm:$0xff]  ;;  %v1576_v34 = vld [vmem:[%s4044_s4 + $0x8] sm:$0xff] }
 0x4ea   : >> { %1641 = vmatpush.msra.mxu0 %v3821_v29  ;;  %1661 = vmatpush.msra.mxu1 %v3823_v30 }
 0x4eb   : >> { %1757 = vmatpush.msra.mxu3 %v3821_v29  ;;  %1679 = vmatpush.msra.mxu2 %v3849_v40 }
 0x4ec   : >> { %1642 = vmatpush.msra.mxu0 %v3831_v32  ;;  %1662 = vmatpush.msra.mxu1 %v3833_v8 }
 0x4ed   : >> { %1758 = vmatpush.msra.mxu3 %v3831_v32  ;;  %1680 = vmatpush.msra.mxu2 %v3859_v43 }
 0x4ee   : >> { %1643 = vmatpush.msra.mxu0 %v3841_v38  ;;  %1663 = vmatpush.msra.mxu1 %v3843_v39 }
 0x4ef   : >> { %1759 = vmatpush.msra.mxu3 %v3841_v38  ;;  %1681 = vmatpush.msra.mxu2 %v3869_v46 }
 0x4f0   : >> { %1644 = vmatpush.msra.mxu0 %v3851_v41  ;;  %1664 = vmatpush.msra.mxu1 %v3853_v42 }
 0x4f1   : >> { %1760 = vmatpush.msra.mxu3 %v3851_v41  ;;  %1682 = vmatpush.msra.mxu2 %v3879_v49 }
 0x4f2   : >> { %1645 = vmatpush.msra.mxu0 %v3861_v44  ;;  %1665 = vmatpush.msra.mxu1 %v3863_v45 }
 0x4f3   : >> { %1761 = vmatpush.msra.mxu3 %v3861_v44  ;;  %1683 = vmatpush.msra.mxu2 %v3889_v52 }
 0x4f4   : >> { %1646 = vmatpush.msra.mxu0 %v3871_v47  ;;  %1666 = vmatpush.msra.mxu1 %v3873_v48 }
 0x4f5   : >> { %1762 = vmatpush.msra.mxu3 %v3871_v47  ;;  %1684 = vmatpush.msra.mxu2 %v3900_v57 }
 0x4f6   : >> { %1647 = vmatpush.msra.mxu0 %v3881_v50  ;;  %1667 = vmatpush.msra.mxu1 %v3883_v51 }
 0x4f7   : >> { %1763 = vmatpush.msra.mxu3 %v3881_v50  ;;  %1685 = vmatpush.msra.mxu2 %v3907_v58 }
 0x4f8   : >> { %1648 = vmatpush.msra.mxu0 %v3891_v53  ;;  %1668 = vmatpush.msra.mxu1 %v3893_v56 }
 0x4f9   : >> { %1649 = vmatmul.f32.vlgmr.msra.gmra.mxu0 %v2967_v55  ;;  %1669 = vmatmul.f32.vlgmr.msra.gmra.mxu1 %v2967_v55 }
 0x4fa   : >> { %1769 = vmatpush.msrb.mxu0 %v3761_v21  ;;  %1789 = vmatpush.msrb.mxu1 %v3794_v54 }
 0x4fb   : >> { %1764 = vmatpush.msra.mxu3 %v3891_v53  ;;  %1686 = vmatpush.msra.mxu2 %v3911_v59 }
 0x4fc   : >> { %1770 = vmatpush.msrb.mxu0 %v3767_v24  ;;  %1790 = vmatpush.msrb.mxu1 %v3799_v6 }
 0x4fd   : >> { %1885 = vmatpush.msrb.mxu3 %v3761_v21  ;;  %1687 = vmatpush.msra.mxu2 %v3917_v62 }
 0x4fe   : >> { %1771 = vmatpush.msrb.mxu0 %v3771_v28  ;;  %1791 = vmatpush.msrb.mxu1 %v3809_v16 }
 0x4ff   : >> { %1886 = vmatpush.msrb.mxu3 %v3767_v24  ;;  %1688 = vmatpush.msra.mxu2 %v3923_v63 }
 0x500   : >> { %1772 = vmatpush.msrb.mxu0 %v3778_v27  ;;  %1792 = vmatpush.msrb.mxu1 %v3819_v25 }
 0x501   : >> { %1887 = vmatpush.msrb.mxu3 %v3771_v28  ;;  %1689 = vmatmul.f32.vlgmr.msra.gmra.mxu2 %v2967_v55 }
 0x502   : >> { %1773 = vmatpush.msrb.mxu0 %v3785_v61  ;;  %1793 = vmatpush.msrb.mxu1 %v3829_v31 }
 0x503   : >> { %1865 = vmatpush.msrb.mxu2 %v3759_v20  ;;  %1888 = vmatpush.msrb.mxu3 %v3778_v27 }
 0x504   : >> { %1774 = vmatpush.msrb.mxu0 %v3792_v3  ;;  %1794 = vmatpush.msrb.mxu1 %v3839_v37 }
 0x505   : >> { %1866 = vmatpush.msrb.mxu2 %v3763_v23  ;;  %1889 = vmatpush.msrb.mxu3 %v3785_v61 }
 0x506   : >> { %1775 = vmatpush.msrb.mxu0 %v3803_v13  ;;  %1795 = vmatpush.msrb.mxu1 %v3849_v40 }
 0x507   : >> { %1867 = vmatpush.msrb.mxu2 %v3769_v26  ;;  %1890 = vmatpush.msrb.mxu3 %v3792_v3 }
 0x508   : >> { %1776 = vmatpush.msrb.mxu0 %v3813_v22  ;;  %1796 = vmatpush.msrb.mxu1 %v3859_v43 }
 0x509   : >> { %1868 = vmatpush.msrb.mxu2 %v3776_v36  ;;  %1891 = vmatpush.msrb.mxu3 %v3803_v13 }
 0x50a   : >> { %1777 = vmatpush.msrb.mxu0 %v3823_v30  ;;  %1797 = vmatpush.msrb.mxu1 %v3869_v46 }
 0x50b   : >> { %1869 = vmatpush.msrb.mxu2 %v3783_v60  ;;  %1892 = vmatpush.msrb.mxu3 %v3813_v22 }
 0x50c   : >> { %1778 = vmatpush.msrb.mxu0 %v3833_v8  ;;  %1798 = vmatpush.msrb.mxu1 %v3879_v49 }
 0x50d   : >> { %1870 = vmatpush.msrb.mxu2 %v3790_v0  ;;  %1893 = vmatpush.msrb.mxu3 %v3823_v30 }
 0x50e   : >> { %1779 = vmatpush.msrb.mxu0 %v3843_v39  ;;  %1799 = vmatpush.msrb.mxu1 %v3889_v52 }
 0x50f   : >> { %1871 = vmatpush.msrb.mxu2 %v3801_v10  ;;  %1894 = vmatpush.msrb.mxu3 %v3833_v8 }
 0x510   : >> { %1780 = vmatpush.msrb.mxu0 %v3853_v42  ;;  %1800 = vmatpush.msrb.mxu1 %v3900_v57 }
 0x511   : >> { %1872 = vmatpush.msrb.mxu2 %v3811_v19  ;;  %1895 = vmatpush.msrb.mxu3 %v3843_v39 }
 0x512   : >> { %1781 = vmatpush.msrb.mxu0 %v3863_v45  ;;  %1801 = vmatpush.msrb.mxu1 %v3907_v58 }
 0x513   : >> { %1873 = vmatpush.msrb.mxu2 %v3821_v29  ;;  %1896 = vmatpush.msrb.mxu3 %v3853_v42 }
 0x514   : >> { %1782 = vmatpush.msrb.mxu0 %v3873_v48  ;;  %1802 = vmatpush.msrb.mxu1 %v3911_v59 }
 0x515   : >> { %1874 = vmatpush.msrb.mxu2 %v3831_v32  ;;  %1897 = vmatpush.msrb.mxu3 %v3863_v45 }
 0x516   : >> { %1783 = vmatpush.msrb.mxu0 %v3883_v51  ;;  %1803 = vmatpush.msrb.mxu1 %v3917_v62 }
 0x517   : >> { %1875 = vmatpush.msrb.mxu2 %v3841_v38  ;;  %1898 = vmatpush.msrb.mxu3 %v3873_v48 }
 0x518   : >> { %1784 = vmatpush.msrb.mxu0 %v3893_v56  ;;  %1804 = vmatpush.msrb.mxu1 %v3923_v63 }
 0x519   : >> { %1876 = vmatpush.msrb.mxu2 %v3851_v41  ;;  %1899 = vmatpush.msrb.mxu3 %v3883_v51 }
 0x51a   : >> { %1905 = vmatpush.msra.mxu0 %v3794_v54  ;;  %1981 = vmatpush.msra.mxu1 %v3759_v20 }
 0x51b   : >> { %1877 = vmatpush.msrb.mxu2 %v3861_v44  ;;  %1900 = vmatpush.msrb.mxu3 %v3893_v56 }
 0x51c   : >> { %1906 = vmatpush.msra.mxu0 %v3799_v6  ;;  %1982 = vmatpush.msra.mxu1 %v3763_v23 }
 0x51d   : >> { %1878 = vmatpush.msrb.mxu2 %v3871_v47 }
 0x51e   : >> { %1907 = vmatpush.msra.mxu0 %v3809_v16  ;;  %1983 = vmatpush.msra.mxu1 %v3769_v26 }
 0x51f   : >> { %1879 = vmatpush.msrb.mxu2 %v3881_v50 }
 0x520   : >> { %1908 = vmatpush.msra.mxu0 %v3819_v25  ;;  %1984 = vmatpush.msra.mxu1 %v3776_v36  ;;  %v4051_v36 = vperm.slane %v3680_v33, 2 }
 0x521   : >> { %1880 = vmatpush.msrb.mxu2 %v3891_v53 }
 0x522   : >> { %1909 = vmatpush.msra.mxu0 %v3829_v31  ;;  %1985 = vmatpush.msra.mxu1 %v3783_v60 }
 0x523   : >> { %2001 = vmatpush.msra.mxu2 %v3761_v21 }
 0x524   : >> { %1910 = vmatpush.msra.mxu0 %v3839_v37  ;;  %1986 = vmatpush.msra.mxu1 %v3790_v0 }
 0x525   : >> { %2002 = vmatpush.msra.mxu2 %v3767_v24 }
 0x526   : >> { %1911 = vmatpush.msra.mxu0 %v3849_v40  ;;  %1987 = vmatpush.msra.mxu1 %v3801_v10 }
 0x527   : >> { %2003 = vmatpush.msra.mxu2 %v3771_v28 }
 0x528   : >> { %1912 = vmatpush.msra.mxu0 %v3859_v43  ;;  %1988 = vmatpush.msra.mxu1 %v3811_v19 }
 0x529   : >> { %2004 = vmatpush.msra.mxu2 %v3778_v27 }
 0x52a   : >> { %1913 = vmatpush.msra.mxu0 %v3869_v46  ;;  %1989 = vmatpush.msra.mxu1 %v3821_v29 }
 0x52b   : >> { %2005 = vmatpush.msra.mxu2 %v3785_v61 }
 0x52c   : >> { %1914 = vmatpush.msra.mxu0 %v3879_v49  ;;  %1990 = vmatpush.msra.mxu1 %v3831_v32  ;;  %v1577_v32 = vld [vmem:[%s4044_s4 + $0x10] sm:$0xff]  ;;  %s4108_s4 = scalar_lea.vmem [#allocation4], %s2359_s3 }
 0x52d   : >> { %2006 = vmatpush.msra.mxu2 %v3792_v3 }
 0x52e   : >> { %1915 = vmatpush.msra.mxu0 %v3889_v52  ;;  %1991 = vmatpush.msra.mxu1 %v3841_v38 }
 0x52f   : >> { %2007 = vmatpush.msra.mxu2 %v3803_v13 }
 0x530   : >> { %1916 = vmatpush.msra.mxu0 %v3900_v57  ;;  %1992 = vmatpush.msra.mxu1 %v3851_v41 }
 0x531   : >> { %2008 = vmatpush.msra.mxu2 %v3813_v22 }
 0x532   : >> { %1917 = vmatpush.msra.mxu0 %v3907_v58  ;;  %1993 = vmatpush.msra.mxu1 %v3861_v44 }
 0x533   : >> { %2009 = vmatpush.msra.mxu2 %v3823_v30 }
 0x534   : >> { %1918 = vmatpush.msra.mxu0 %v3911_v59  ;;  %1994 = vmatpush.msra.mxu1 %v3871_v47 }
 0x535   : >> { %2010 = vmatpush.msra.mxu2 %v3833_v8 }
 0x536   : >> { %1919 = vmatpush.msra.mxu0 %v3917_v62  ;;  %1995 = vmatpush.msra.mxu1 %v3881_v50 }
 0x537   : >> { %2011 = vmatpush.msra.mxu2 %v3843_v39 }
 0x538   : >> { %1920 = vmatpush.msra.mxu0 %v3923_v63  ;;  %1996 = vmatpush.msra.mxu1 %v3891_v53 }
 0x539   : >> { %2012 = vmatpush.msra.mxu2 %v3853_v42 }
 0x53b   : >> { %2013 = vmatpush.msra.mxu2 %v3863_v45 }
 0x53d   : >> { %2014 = vmatpush.msra.mxu2 %v3873_v48 }
 0x53f   : >> { %2015 = vmatpush.msra.mxu2 %v3883_v51 }
 0x541   : >> { %2016 = vmatpush.msra.mxu2 %v3893_v56 }
 0x576   : >> { %v1650_v5 = vpop.f32.mrf.mxu0  ;;  %v1670_v7 = vpop.f32.mrf.mxu1 }
 0x577   : >> { %v1651_v9 = vadd.f32 %v1650_v5, %v4039_v1  ;;  %v1671_v11 = vadd.f32 %v1670_v7, %v4042_v2 }
 0x579   : >> { %v1693_v12 = vadd.f32 %v1651_v9, %v1575_v4  ;;  %v1694_v35 = vadd.f32 %v1671_v11, %v1576_v34 }
 0x57b   : >> { %v2332_v14 = vmul.f32 -1.442695, %v1693_v12  ;;  %v2333_v15 = vmul.f32 -1.442695, %v1694_v35 }
 0x57d   : >> { %2611 = vpow2.f32 %v2332_v14 }
 0x57e   : >> { %2613 = vpow2.f32 %v2333_v15 }
 0x583   : >> { %v2612_v17 = vpop.eup %2611 }
 0x584   : >> { %v2614_v18 = vpop.eup %2613  ;;  %v1701_v20 = vadd.f32 1.0, %v2612_v17  ;;  %v1690_v61 = vpop.f32.mrf.mxu2 }
 0x585   : >> { %v1702_v21 = vadd.f32 1.0, %v2614_v18  ;;  %v1691_v19 = vadd.f32 %v1690_v61, %v4051_v36 }
 0x586   : >> { %2615 = vrcp.f32 %v1701_v20  ;;  %v1714_v0 = vand.u32 2147483648, %v1701_v20  ;;  %v1712_v10 = vand.u32 2147483647, %v1701_v20  ;;  %vm1708_vm1 = vweird.f32 %v1701_v20 }
 0x587   : >> { %2617 = vrcp.f32 %v1702_v21  ;;  %vm1723_vm4 = vweird.f32 %v1702_v21  ;;  %v1729_v41 = vand.u32 2147483648, %v1702_v21  ;;  %v1727_v42 = vand.u32 2147483647, %v1702_v21 }
 0x588   : >> { %v1715_v29 = vor.u32 1.1754944e-38, %v1714_v0  ;;  %vm1713_vm3 = vcmp.eq.f32.partialorder %v1712_v10, 8.507059e+37 }
 0x589   : >> { %v1730_v47 = vor.u32 1.1754944e-38, %v1729_v41  ;;  %vm1728_vm7 = vcmp.eq.f32.partialorder %v1727_v42, 8.507059e+37 }
 0x58c   : >> { %v2616_v23 = vpop.eup %2615 }
 0x58d   : >> { %v2618_v24 = vpop.eup %2617  ;;  %v1704_v26 = vmul.f32 %v2616_v23, %v1701_v20  ;;  %vm1709_vm0 = vweird.f32 %v2616_v23 }
 0x58e   : >> { %v1719_v28 = vmul.f32 %v2618_v24, %v1702_v21  ;;  %vm1710_vm2 = vmor %vm1708_vm1, %vm1709_vm0  ;;  %vm1724_vm5 = vweird.f32 %v2618_v24  ;;  %v1748_v21 = vld [vmem:[%s4078_s18 + $0x10] sm:$0xff] }
 0x58f   : >> { %v1705_v27 = vsub.f32 1.0, %v1704_v26  ;;  %vm1725_vm6 = vmor %vm1723_vm4, %vm1724_vm5 }
 0x590   : >> { %v1720_v60 = vsub.f32 1.0, %v1719_v28 }
 0x591   : >> { %v1706_v3 = vmul.f32 %v2616_v23, %v1705_v27 }
 0x592   : >> { %v1721_v13 = vmul.f32 %v2618_v24, %v1720_v60 }
 0x593   : >> { %v1707_v22 = vadd.f32 %v2616_v23, %v1706_v3 }
 0x594   : >> { %v1722_v38 = vadd.f32 %v2618_v24, %v1721_v13 }
 0x595   : >> { %v1711_v30 = vsel %vm1710_vm2, %v2616_v23, %v1707_v22 }
 0x596   : >> { %v1716_v8 = vsel %vm1713_vm3, %v1715_v29, %v1711_v30  ;;  %v1726_v45 = vsel %vm1725_vm6, %v2618_v24, %v1722_v38  ;;  %v1862_v30 = vld [vmem:[%s4093_s27] sm:$0xff] }
 0x597   : >> { %v1733_v39 = vmul.f32 %v1716_v8, %v1691_v19  ;;  %v1731_v48 = vsel %vm1728_vm7, %v1730_v47, %v1726_v45  ;;  %v1863_v8 = vld [vmem:[%s4093_s27 + $0x8] sm:$0xff] }
 0x598   : >> { %v1736_v50 = vsub.f32 1.0, %v1731_v48  ;;  %v1738_v56 = vmul.f32 %v2967_v55, %v1731_v48  ;;  %v1747_v55 = vld [vmem:[%s4078_s18 + $0x8] sm:$0xff] }
 0x599   : >> { %v1734_v44 = vadd.f32 %v1733_v39, %v1577_v32 }
 0x59b   : >> { %2619 = vtanh.f32 %v1734_v44 }
 0x5a1   : >> { %v2620_v51 = vpop.eup %2619 }
 0x5a2   : >> { %v1737_v53 = vmul.f32 %v2620_v51, %v1736_v50 }
 0x5a4   : >> { %v4056_v4 = vadd.f32 %v1738_v56, %v1737_v53 }
 0x5a6   : >> { %1765 = vmatmul.f32.vlgmr.msra.gmra.mxu3 %v4056_v4  ;;  %1785 = vmatmul.f32.vlgmr.msrb.gmra.mxu0 %v4056_v4 }
 0x5a7   : >> { %1805 = vmatmul.f32.vlgmr.msrb.gmra.mxu1 %v4056_v4  ;;  %2021 = vmatpush.msra.mxu3 %v3794_v54 }
 0x5a9   : >> { %2022 = vmatpush.msra.mxu3 %v3799_v6 }
 0x5ab   : >> { %2023 = vmatpush.msra.mxu3 %v3809_v16 }
 0x5ad   : >> { %2024 = vmatpush.msra.mxu3 %v3819_v25 }
 0x5af   : >> { %2025 = vmatpush.msra.mxu3 %v3829_v31  ;;  %v1746_v31 = vld [vmem:[%s4078_s18] sm:$0xff]  ;;  %s2360_s18 = sshll.u32 (%p1564_p4), %s3060_s16, 4  ;;  %s2881_s16 = scalar_lea.hbm (%p1564_p4), %s4168_s9, 32 }
 0x5b0   : > { %s2107_s20 = scalar_lea.hbm (%p1564_p4), %s4168_s9, %s2360_s18 }
 0x5b1   : >> { %2026 = vmatpush.msra.mxu3 %v3839_v37 }
 0x5b3   : >> { %2027 = vmatpush.msra.mxu3 %v3849_v40 }
 0x5b5   : >> { %2028 = vmatpush.msra.mxu3 %v3859_v43 }
 0x5b7   : >> { %2029 = vmatpush.msra.mxu3 %v3869_v46 }
 0x5b9   : >> { %2030 = vmatpush.msra.mxu3 %v3879_v49 }
 0x5bb   : >> { %2031 = vmatpush.msra.mxu3 %v3889_v52 }
 0x5bd   : >> { %2032 = vmatpush.msra.mxu3 %v3900_v57 }
 0x5bf   : >> { %2033 = vmatpush.msra.mxu3 %v3907_v58 }
 0x5c1   : >> { %2034 = vmatpush.msra.mxu3 %v3911_v59 }
 0x5c3   : >> { %2035 = vmatpush.msra.mxu3 %v3917_v62 }
 0x5c5   : >> { %2036 = vmatpush.msra.mxu3 %v3923_v63 }
 0x623   : >> { %v1786_v54 = vpop.f32.mrf.mxu0 }
 0x624   : >> { %v1787_v6 = vadd.f32 %v1786_v54, %v4042_v2  ;;  %v1806_v35 = vpop.f32.mrf.mxu1 }
 0x625   : >> { %v1807_v18 = vadd.f32 %v1806_v35, %v4051_v36 }
 0x626   : >> { %v1810_v16 = vadd.f32 %v1787_v6, %v1747_v55 }
 0x628   : >> { %v2336_v25 = vmul.f32 -1.442695, %v1810_v16 }
 0x629   : >> { %v1766_v37 = vpop.f32.mrf.mxu3 }
 0x62a   : >> { %2621 = vpow2.f32 %v2336_v25  ;;  %v1767_v40 = vadd.f32 %v1766_v37, %v4039_v1 }
 0x62c   : >> { %v1809_v43 = vadd.f32 %v1767_v40, %v1746_v31 }
 0x62e   : >> { %v2335_v46 = vmul.f32 -1.442695, %v1809_v43 }
 0x630   : >> { %v2622_v49 = vpop.eup %2621  ;;  %2623 = vpow2.f32 %v2335_v46 }
 0x631   : >> { %v1818_v52 = vadd.f32 1.0, %v2622_v49 }
 0x633   : >> { %2625 = vrcp.f32 %v1818_v52  ;;  %v1845_v26 = vand.u32 2147483648, %v1818_v52  ;;  %vm1839_vm13 = vweird.f32 %v1818_v52  ;;  %v1843_v27 = vand.u32 2147483647, %v1818_v52 }
 0x635   : >> { %v1846_v0 = vor.u32 1.1754944e-38, %v1845_v26  ;;  %vm1844_vm15 = vcmp.eq.f32.partialorder %v1843_v27, 8.507059e+37 }
 0x636   : >> { %v2624_v57 = vpop.eup %2623 }
 0x637   : >> { %v1817_v58 = vadd.f32 1.0, %v2624_v57 }
 0x639   : >> { %2627 = vrcp.f32 %v1817_v58  ;;  %v2626_v59 = vpop.eup %2625  ;;  %v1830_v9 = vand.u32 2147483648, %v1817_v58  ;;  %v1828_v12 = vand.u32 2147483647, %v1817_v58  ;;  %vm1824_vm9 = vweird.f32 %v1817_v58 }
 0x63a   : >> { %v1835_v62 = vmul.f32 %v2626_v59, %v1818_v52  ;;  %vm1840_vm12 = vweird.f32 %v2626_v59 }
 0x63b   : >> { %v1831_v17 = vor.u32 1.1754944e-38, %v1830_v9  ;;  %vm1829_vm11 = vcmp.eq.f32.partialorder %v1828_v12, 8.507059e+37  ;;  %vm1841_vm14 = vmor %vm1839_vm13, %vm1840_vm12 }
 0x63c   : >> { %v1836_v34 = vsub.f32 1.0, %v1835_v62 }
 0x63e   : >> { %v1837_v14 = vmul.f32 %v2626_v59, %v1836_v34 }
 0x63f   : >> { %v2628_v63 = vpop.eup %2627 }
 0x640   : >> { %v1820_v5 = vmul.f32 %v2628_v63, %v1817_v58  ;;  %vm1825_vm8 = vweird.f32 %v2628_v63  ;;  %v1838_v24 = vadd.f32 %v2626_v59, %v1837_v14  ;;  %v1864_v58 = vld [vmem:[%s4093_s27 + $0x10] sm:$0xff]  ;;  %s2110_s27 = sshll.u32 (%p1564_p4), %s2107_s20, 4  ;;  %s2111_s27 = int_to_ptr.hbm [resolvable:$true] %s2110_s27 }
 0x641   : >> { %vm1826_vm10 = vmor %vm1824_vm9, %vm1825_vm8  ;;  %s2875_s26 = sshra.s32 (%p1564_p4), %s2111_s27, 4  ;;  %s2876_s26 = int_to_ptr.hbm [resolvable:$true] %s2875_s26 }
 0x642   : >> { %v1821_v7 = vsub.f32 1.0, %v1820_v5  ;;  %v1842_v61 = vsel %vm1841_vm14, %v2626_v59, %v1838_v24  ;;  %s2877_s3 = scalar_lea.hbm (%p1564_p4), %s2876_s26, 16  ;;  %p2882_p10 = scmp.lt.s32.totalorder (%p1564_p4), %s2876_s26, %s4168_s9 }
 0x643   : >> { %v1847_v3 = vsel %vm1844_vm15, %v1846_v0, %v1842_v61  ;;  %p2878_p6 = scmp.ne.s32.totalorder (%p1564_p4), %s2876_s26, %s2877_s3  ;;  %p2883_p11 = scmp.lt.s32.totalorder (%p1564_p4), %s2881_s16, %s2877_s3 }
 0x644   : >> { %v1822_v11 = vmul.f32 %v2628_v63, %v1821_v7  ;;  %v1852_v10 = vsub.f32 1.0, %v1847_v3  ;;  %v1854_v22 = vmul.f32 %v1847_v3, %v4056_v4 }
 0x645   : > { %p2879_p13 = pnand (%p1564_p4), %p2878_p6, %p3146_p7  ;;  %p2884_p0 = por (%p1564_p4), %p2883_p11, %p2882_p10 }
 0x646   : >> { %v1823_v15 = vadd.f32 %v2628_v63, %v1822_v11 }
 0x647   : > { %p2880_p9 = pneg (%p1564_p4), %p2879_p13 }
 0x648   : >> { %v1827_v20 = vsel %vm1826_vm10, %v2628_v63, %v1823_v15 }
 0x649   : >> { %v1832_v23 = vsel %vm1829_vm11, %v1831_v17, %v1827_v20  ;;  %v1978_v20 = vld [vmem:[%s4108_s4] sm:$0xff]  ;;  %p2885_p2 = pnand (%p1564_p4), %p2884_p0, %p2880_p9 }
 0x64a   : >> { %v1849_v28 = vmul.f32 %v1832_v23, %v1807_v18 }
 0x64c   : >> { %v1850_v60 = vadd.f32 %v1849_v28, %v1748_v21  ;;  %v1979_v28 = vld [vmem:[%s4108_s4 + $0x8] sm:$0xff] }
 0x64e   : >> { %2629 = vtanh.f32 %v1850_v60 }
 0x654   : >> { %v2630_v13 = vpop.eup %2629 }
 0x655   : >> { %v1853_v19 = vmul.f32 %v2630_v13, %v1852_v10 }
 0x657   : >> { %v4087_v29 = vadd.f32 %v1854_v22, %v1853_v19 }
 0x659   : >> { %1881 = vmatmul.f32.vlgmr.msrb.gmra.mxu2 %v4087_v29  ;;  %1901 = vmatmul.f32.vlgmr.msrb.gmra.mxu3 %v4087_v29 }
 0x65a   : >> { %1921 = vmatmul.f32.vlgmr.msra.gmra.mxu0 %v4087_v29 }
 0x6d7   : >> { %v1922_v40 = vpop.f32.mrf.mxu0 }
 0x6d8   : >> { %v1923_v52 = vadd.f32 %v1922_v40, %v4051_v36 }
 0x6dc   : >> { %v1882_v32 = vpop.f32.mrf.mxu2  ;;  %v1902_v38 = vpop.f32.mrf.mxu3 }
 0x6dd   : >> { %v1883_v39 = vadd.f32 %v1882_v32, %v4039_v1  ;;  %v1903_v41 = vadd.f32 %v1902_v38, %v4042_v2 }
 0x6df   : >> { %v1925_v42 = vadd.f32 %v1883_v39, %v1862_v30  ;;  %v1926_v44 = vadd.f32 %v1903_v41, %v1863_v8 }
 0x6e1   : >> { %v2338_v45 = vmul.f32 -1.442695, %v1925_v42  ;;  %v2339_v47 = vmul.f32 -1.442695, %v1926_v44 }
 0x6e3   : >> { %2631 = vpow2.f32 %v2338_v45 }
 0x6e4   : >> { %2633 = vpow2.f32 %v2339_v47 }
 0x6e9   : >> { %v2632_v48 = vpop.eup %2631 }
 0x6ea   : >> { %v2634_v50 = vpop.eup %2633  ;;  %v1933_v51 = vadd.f32 1.0, %v2632_v48  ;;  %v1980_v48 = vld [vmem:[%s4108_s4 + $0x10] sm:$0xff] }
 0x6eb   : >> { %v1934_v53 = vadd.f32 1.0, %v2634_v50 }
 0x6ec   : >> { %2635 = vrcp.f32 %v1933_v51  ;;  %v1946_v16 = vand.u32 2147483648, %v1933_v51  ;;  %v1944_v37 = vand.u32 2147483647, %v1933_v51  ;;  %vm1940_vm1 = vweird.f32 %v1933_v51 }
 0x6ed   : >> { %2637 = vrcp.f32 %v1934_v53  ;;  %v1961_v5 = vand.u32 2147483648, %v1934_v53  ;;  %vm1955_vm5 = vweird.f32 %v1934_v53  ;;  %v1959_v34 = vand.u32 2147483647, %v1934_v53 }
 0x6ee   : >> { %v1947_v49 = vor.u32 1.1754944e-38, %v1946_v16  ;;  %vm1945_vm3 = vcmp.eq.f32.partialorder %v1944_v37, 8.507059e+37 }
 0x6ef   : >> { %v1962_v11 = vor.u32 1.1754944e-38, %v1961_v5  ;;  %vm1960_vm7 = vcmp.eq.f32.partialorder %v1959_v34, 8.507059e+37 }
 0x6f2   : >> { %v2636_v56 = vpop.eup %2635 }
 0x6f3   : >> { %v2638_v4 = vpop.eup %2637  ;;  %v1936_v55 = vmul.f32 %v2636_v56, %v1933_v51  ;;  %vm1941_vm0 = vweird.f32 %v2636_v56 }
 0x6f4   : >> { %v1951_v54 = vmul.f32 %v2638_v4, %v1934_v53  ;;  %vm1942_vm2 = vmor %vm1940_vm1, %vm1941_vm0  ;;  %vm1956_vm4 = vweird.f32 %v2638_v4 }
 0x6f5   : >> { %v1937_v6 = vsub.f32 1.0, %v1936_v55  ;;  %vm1957_vm6 = vmor %vm1955_vm5, %vm1956_vm4 }
 0x6f6   : >> { %v1952_v25 = vsub.f32 1.0, %v1951_v54 }
 0x6f7   : >> { %v1938_v31 = vmul.f32 %v2636_v56, %v1937_v6 }
 0x6f8   : >> { %v1953_v43 = vmul.f32 %v2638_v4, %v1952_v25 }
 0x6f9   : >> { %v1939_v46 = vadd.f32 %v2636_v56, %v1938_v31 }
 0x6fa   : >> { %v1954_v62 = vadd.f32 %v2638_v4, %v1953_v43  ;;  %v2344_v43 = vld [vmem:[%s2183_s17 + $0x18] sm:$0xff] }
 0x6fb   : >> { %v1943_v57 = vsel %vm1942_vm2, %v2636_v56, %v1939_v46 }
 0x6fc   : >> { %v1948_v59 = vsel %vm1945_vm3, %v1947_v49, %v1943_v57  ;;  %v1958_v9 = vsel %vm1957_vm6, %v2638_v4, %v1954_v62 }
 0x6fd   : >> { %v1965_v63 = vmul.f32 %v1948_v59, %v1923_v52  ;;  %v1963_v12 = vsel %vm1960_vm7, %v1962_v11, %v1958_v9 }
 0x6fe   : >> { %v1968_v35 = vsub.f32 1.0, %v1963_v12  ;;  %v1970_v17 = vmul.f32 %v1963_v12, %v4087_v29 }
 0x6ff   : >> { %v1966_v7 = vadd.f32 %v1965_v63, %v1864_v58 }
 0x701   : >> { %2639 = vtanh.f32 %v1966_v7 }
 0x707   : >> { %v2640_v14 = vpop.eup %2639 }
 0x708   : >> { %v1969_v15 = vmul.f32 %v2640_v14, %v1968_v35 }
 0x70a   : >> { %v4102_v18 = vadd.f32 %v1970_v17, %v1969_v15 }
 0x70c   : >> { %1997 = vmatmul.f32.vlgmr.msra.gmra.mxu1 %v4102_v18  ;;  %2017 = vmatmul.f32.vlgmr.msra.gmra.mxu2 %v4102_v18 }
 0x70d   : >> { %2037 = vmatmul.f32.vlgmr.msra.gmra.mxu3 %v4102_v18 }
 0x789   : >> { %v1998_v21 = vpop.f32.mrf.mxu1 }
 0x78a   : >> { %v1999_v23 = vadd.f32 %v1998_v21, %v4039_v1 }
 0x78c   : >> { %v2041_v24 = vadd.f32 %v1999_v23, %v1978_v20 }
 0x78e   : >> { %v2341_v26 = vmul.f32 -1.442695, %v2041_v24 }
 0x78f   : >> { %v2018_v27 = vpop.f32.mrf.mxu2 }
 0x790   : >> { %2641 = vpow2.f32 %v2341_v26  ;;  %v2019_v60 = vadd.f32 %v2018_v27, %v4042_v2  ;;  %v2038_v39 = vpop.f32.mrf.mxu3 }
 0x791   : >> { %v2039_v45 = vadd.f32 %v2038_v39, %v4051_v36 }
 0x792   : >> { %v2042_v61 = vadd.f32 %v2019_v60, %v1979_v28 }
 0x794   : >> { %v2342_v0 = vmul.f32 -1.442695, %v2042_v61 }
 0x796   : >> { %v2642_v3 = vpop.eup %2641  ;;  %2643 = vpow2.f32 %v2342_v0 }
 0x797   : >> { %v2049_v10 = vadd.f32 1.0, %v2642_v3 }
 0x799   : >> { %2645 = vrcp.f32 %v2049_v10  ;;  %v2062_v1 = vand.u32 2147483648, %v2049_v10  ;;  %v2060_v8 = vand.u32 2147483647, %v2049_v10  ;;  %vm2056_vm9 = vweird.f32 %v2049_v10 }
 0x79b   : >> { %v2063_v42 = vor.u32 1.1754944e-38, %v2062_v1  ;;  %vm2061_vm11 = vcmp.eq.f32.partialorder %v2060_v8, 8.507059e+37 }
 0x79c   : >> { %v2644_v13 = vpop.eup %2643 }
 0x79d   : >> { %v2050_v19 = vadd.f32 1.0, %v2644_v13 }
 0x79f   : >> { %v2646_v22 = vpop.eup %2645  ;;  %2647 = vrcp.f32 %v2050_v19  ;;  %v2077_v53 = vand.u32 2147483648, %v2050_v19  ;;  %v2075_v4 = vand.u32 2147483647, %v2050_v19  ;;  %vm2071_vm13 = vweird.f32 %v2050_v19 }
 0x7a0   : >> { %v2052_v29 = vmul.f32 %v2646_v22, %v2049_v10  ;;  %vm2057_vm8 = vweird.f32 %v2646_v22 }
 0x7a1   : >> { %vm2058_vm10 = vmor %vm2056_vm9, %vm2057_vm8  ;;  %v2078_v6 = vor.u32 1.1754944e-38, %v2077_v53  ;;  %vm2076_vm15 = vcmp.eq.f32.partialorder %v2075_v4, 8.507059e+37 }
 0x7a2   : >> { %v2053_v30 = vsub.f32 1.0, %v2052_v29 }
 0x7a4   : >> { %v2054_v32 = vmul.f32 %v2646_v22, %v2053_v30 }
 0x7a5   : >> { %v2648_v38 = vpop.eup %2647 }
 0x7a6   : >> { %v2067_v2 = vmul.f32 %v2648_v38, %v2050_v19  ;;  %v2055_v41 = vadd.f32 %v2646_v22, %v2054_v32  ;;  %vm2072_vm12 = vweird.f32 %v2648_v38 }
 0x7a7   : >> { %vm2073_vm14 = vmor %vm2071_vm13, %vm2072_vm12 }
 0x7a8   : >> { %v2068_v44 = vsub.f32 1.0, %v2067_v2  ;;  %v2059_v47 = vsel %vm2058_vm10, %v2646_v22, %v2055_v41 }
 0x7a9   : >> { %v2064_v50 = vsel %vm2061_vm11, %v2063_v42, %v2059_v47 }
 0x7aa   : >> { %v2069_v51 = vmul.f32 %v2648_v38, %v2068_v44  ;;  %v2081_v56 = vmul.f32 %v2064_v50, %v2039_v45 }
 0x7ac   : >> { %v2070_v55 = vadd.f32 %v2648_v38, %v2069_v51  ;;  %v2082_v54 = vadd.f32 %v2081_v56, %v1980_v48 }
 0x7ae   : >> { %v2074_v16 = vsel %vm2073_vm14, %v2648_v38, %v2070_v55  ;;  %2649 = vtanh.f32 %v2082_v54 }
 0x7af   : >> { %v2079_v36 = vsel %vm2076_vm15, %v2078_v6, %v2074_v16 }
 0x7b0   : >> { %v2084_v25 = vsub.f32 1.0, %v2079_v36  ;;  %v2086_v40 = vmul.f32 %v2079_v36, %v4102_v18 }
 0x7b4   : >> { %v2650_v31 = vpop.eup %2649 }
 0x7b5   : >> { %v2085_v37 = vmul.f32 %v2650_v31, %v2084_v25 }
 0x7b7   : >> { %v2087_v46 = vadd.f32 %v2086_v40, %v2085_v37   ;;  %1566 = sbr.rel (!%p1564_p4) target bundleno = 1241 (0x4d9), region = 169 }
 0x7b9   : >> { %v2090_v49 = vadd.f32 %v2344_v43, %v2087_v46  ;;  %v4186_v55 = vmov %v2087_v46  ;;  %2094 = vst [vmem:[#allocation2 + $0x8] sm:$0xff] (%p1564_p4), %v2087_v46 }
 0x7bb   : >> { %2093 = vst [vmem:[%s2092_s29] sm:$0xff] %v2090_v49 }
 0x7bc   : > { %2888 = shalt.err (!%p2885_p2)
}
 0x7bd   : > { %s2984_s25 = smov 128   ;;  %s2985_s2 = smov 8  }
 0x7be   : > { %2451 = dma.vmem_to_hbm [thread:$0]  (%p3146_p7), %s2109_s13, 256, %s2111_s27, %s2096_s15, %s2984_s25, %s2984_s25, %s2985_s2  }
 0x7bf PF: > { %s2125_s29 = sand.u32 1, %s2943_s30   ;;  %p4187_p12 = scmp.ge.s32.totalorder %s2955_s12, 2 }
 0x7c0   : > { %s2126_s18 = scalar_lea.sflag [#allocation7], %s2125_s29 }
 0x7c1   : > { %p2477_p5 = pnand %p4187_p12, %p3150_p8 }
 0x7c3   : > { %p2478_p3 = pneg %p2477_p5 }
 0x7c5   : > { %2938 = dma.done.wait (%p2478_p3), %s2126_s18, 256  }
 0x7c6   : > { %2940 = vsyncadd (%p2478_p3), %s2126_s18, 4294967040  ;;  %p25_p1 = scmp.ge.s32.totalorder %s3120_s19, 4   ;;  %s4188_s30 = smov %s2947_s10 }
 0x7c7   : > { %s4189_s10 = smov %s2951_s11  ;;  %s4190_s11 = smov %s3131_s22 }
 0x7c8   : > { %s4191_s12 = smov %s3120_s19  ;;  %27 = sbr.rel (!%p25_p1) target bundleno = 13 (0xd), region = 180 }
 0x7cd   :  { %2132 = vsyncpa [#allocation6], 1 }
 0x7ce   :  { %2134 = vsyncpa [#allocation6 + $0x1], 1 }
 0x7cf   :  { %2135 = vsyncpa [#allocation9], 1 }
 0x7d0   :  { %2136 = vsyncpa [#allocation12], 1 }
 0x7d1   :  { %2137 = vsyncpa [#allocation15], 1 }
 0x7d2   :  { %2138 = vsyncpa [#allocation7], 1 }
 0x7d3   :  { %2140 = vsyncpa [#allocation7 + $0x1], 1 }

</bundles_post_ra>
